<compile_context>
chip_gen: v7x
topology: tpu7x:2x2x1
jax: 0.10.0
libtpu: 0.0.40
codegen_flags: <defaults>
</compile_context>

<pallas_src>
import jax
import jax.numpy as jnp
from jax.experimental import pallas as pl
from jax.experimental.pallas import tpu as pltpu


# ----------------------------- in-kernel helpers ----------------------------

def _conv1d_same_k3(x, w_ref, t):
    """Conv1d(kernel=3, padding=1) on a flattened (rows*t, cin) f32 slab.

    Three accumulating MXU matmuls (one per tap), bf16 operands / f32 accumulation.
    The t-1 / t+1 taps are one-row shifts of the slab with a per-row boundary mask,
    so rows belonging to different batch items never mix ("same" padding per row).
    Returns the pre-bias / pre-activation (rows*t, cout) f32 accumulator.
    """
    L, cin = x.shape
    wd = w_ref.dtype

    zrow = jnp.zeros((1, cin), jnp.float32)
    frame = jax.lax.broadcasted_iota(jnp.int32, (L, 1), 0) % t     # frame index within row
    keep_prev = (frame != 0).astype(jnp.float32)                    # zero tap at frame 0
    keep_next = (frame != t - 1).astype(jnp.float32)                # zero tap at frame t-1

    x_prev = jnp.concatenate([zrow, x[:L - 1, :]], axis=0) * keep_prev
    x_next = jnp.concatenate([x[1:, :], zrow], axis=0) * keep_next

    acc = jnp.dot(x_prev.astype(wd), w_ref[0:cin, :],
                  preferred_element_type=jnp.float32)
    acc += jnp.dot(x.astype(wd), w_ref[cin:2 * cin, :],
                   preferred_element_type=jnp.float32)
    acc += jnp.dot(x_next.astype(wd), w_ref[2 * cin:3 * cin, :],
                   preferred_element_type=jnp.float32)
    return acc


def _maxpool2_rows(acc, rows, t):
    """MaxPool1d(2) on a flattened (rows*t, c) slab, per row.

    A trailing odd frame is truncated, matching PyTorch MaxPool1d(2).
    Returns (pooled (rows*(t//2), c), t//2).
    """
    c = acc.shape[1]
    th = t // 2
    if t % 2:  # drop the last frame of each row before pairing
        acc = acc.reshape(rows, t, c)[:, : 2 * th, :].reshape(rows * 2 * th, c)
    return jnp.max(acc.reshape(rows * th, 2, c), axis=1), th


# ------------------------------ fused kernel --------------------------------

def _extract_kernel(x_ref,
                    c1w_ref, c1b_ref, c2w_ref, c2b_ref, c3w_ref, c3b_ref,
                    e1w_ref, e1b_ref, e2w_ref, e2b_ref,
                    o_ref):
    """A block of batch rows through the whole feature extractor, entirely in VMEM."""
    rows, t, f = x_ref.shape
    x = x_ref[...].reshape(rows * t, f)                            # (rows*T, 80) f32

    # conv1 + folded BN, MaxPool folded pre-epilogue, then bias + ReLU
    a1 = _conv1d_same_k3(x, c1w_ref, t)                            # (rows*T,   128)
    p1, t1 = _maxpool2_rows(a1, rows, t)
    h1 = jnp.maximum(p1 + c1b_ref[...], 0.0)                       # (rows*T/2, 128)

    a2 = _conv1d_same_k3(h1, c2w_ref, t1)                          # (rows*T/2, 256)
    p2, t2 = _maxpool2_rows(a2, rows, t1)
    h2 = jnp.maximum(p2 + c2b_ref[...], 0.0)                       # (rows*T/4, 256)

    a3 = _conv1d_same_k3(h2, c3w_ref, t2)                          # (rows*T/4, 512)
    h3 = jnp.maximum(a3 + c3b_ref[...], 0.0)

    # AdaptiveAvgPool1d(1): mean over frames, per batch row
    feat = jnp.mean(h3.reshape(rows, t2, h3.shape[1]), axis=1)     # (rows, 512)

    # embedding_layers: Linear(512,256)+ReLU+Dropout(id)+Linear(256,512)+Tanh
    z = jnp.dot(feat.astype(e1w_ref.dtype), e1w_ref[...],
                preferred_element_type=jnp.float32) + e1b_ref[...]
    z = jnp.maximum(z, 0.0)
    e = jnp.tanh(jnp.dot(z.astype(e2w_ref.dtype), e2w_ref[...],
                         preferred_element_type=jnp.float32) + e2b_ref[...])

    # F.normalize(p=2, dim=1): x / max(||x||, 1e-12)   (rsqrt -> EUP slot)
    sumsq = jnp.sum(e * e, axis=1, keepdims=True)
    inv = jax.lax.rsqrt(jnp.maximum(sumsq, 1e-24))
    o_ref[...] = (e * inv).astype(o_ref.dtype)


# ------------------------------ wrappers -------------------------------------

def extract_features(x, p, block_rows=8):
    """x: (N, T, 80) -> L2-normalized embeddings (N, 512).  One pallas_call."""
    N, T, F = x.shape
    assert T >= 4, "need at least 4 frames (two MaxPool1d(2) stages before the mean)"

    Bb = min(block_rows, N)                       # rows per grid step
    grid = pl.cdiv(N, Bb)
    Np = grid * Bb
    if Np != N:
        x = jnp.pad(x, ((0, Np - N), (0, 0), (0, 0)))

    # advisory cost estimate so XLA schedules surrounding ops around the call
    T1, T2 = T // 2, T // 4
    flops = 2 * Np * (T * 3 * F * 128 + T1 * 3 * 128 * 256 + T2 * 3 * 256 * 512
                      + 512 * 256 + 256 * 512)
    transcendentals = Np * (512 + 1)              # tanh + rsqrt
    weight_bytes = sum(int(p[k].size) * p[k].dtype.itemsize
                       for k in ("c1_w", "c1_b", "c2_w", "c2_b", "c3_w", "c3_b",
                                 "e1_w", "e1_b", "e2_w", "e2_b"))
    bytes_accessed = Np * T * F * 4 + Np * 512 * 4 + weight_bytes

    emb = pl.pallas_call(
        _extract_kernel,
        out_shape=jax.ShapeDtypeStruct((Np, 512), jnp.float32),
        grid=(grid,),
        in_specs=[
            pl.BlockSpec((Bb, T, F), lambda b: (b, 0, 0)),      # raw 80-lane input block
            pl.BlockSpec((3 * F, 128), lambda b: (0, 0)),
            pl.BlockSpec((1, 128), lambda b: (0, 0)),
            pl.BlockSpec((3 * 128, 256), lambda b: (0, 0)),
            pl.BlockSpec((1, 256), lambda b: (0, 0)),
            pl.BlockSpec((3 * 256, 512), lambda b: (0, 0)),
            pl.BlockSpec((1, 512), lambda b: (0, 0)),
            pl.BlockSpec((512, 256), lambda b: (0, 0)),
            pl.BlockSpec((1, 256), lambda b: (0, 0)),
            pl.BlockSpec((256, 512), lambda b: (0, 0)),
            pl.BlockSpec((1, 512), lambda b: (0, 0)),
        ],
        out_specs=pl.BlockSpec((Bb, 512), lambda b: (b, 0)),
        compiler_params=pltpu.CompilerParams(
            dimension_semantics=("parallel",),
            vmem_limit_bytes=32 * 1024 * 1024,    # above v5e's 16 MiB default, below v7x physical
        ),
        cost_estimate=pl.CostEstimate(flops=flops,
                                      transcendentals=transcendentals,
                                      bytes_accessed=bytes_accessed),
    )(x, p["c1_w"], p["c1_b"], p["c2_w"], p["c2_b"], p["c3_w"], p["c3_b"],
      p["e1_w"], p["e1_b"], p["e2_w"], p["e2_b"])

    return emb[:N] if Np != N else emb


def forward_pair(x1, x2, p):
    """forward(x1, x2): verification score (B, 1).  One extractor launch + JAX head."""
    B = x1.shape[0]
    xs = jnp.concatenate([x1, x2], axis=0)                         # (2B, T, F)
    emb = extract_features(xs, p)                                  # (2B, 512)
    combined = jnp.concatenate([emb[:B], emb[B:]], axis=1)         # (B, 1024)
    # verification_head in plain JAX (~0.5 MFLOP; a second pallas_call launch
    # would cost more than the math).  Dropout = identity in eval mode.
    h = jax.nn.relu(combined @ p["v1_w"] + p["v1_b"])
    return jax.nn.sigmoid(h @ p["v2_w"] + p["v2_b"])


# ------------------------------ parameters -----------------------------------

def init_params(key):
    ks = iter(jax.random.split(key, 16))

    def dense(k, fan_in, shape):
        return jax.random.normal(k, shape, jnp.float32) / jnp.sqrt(float(fan_in))

    p = {}
    for n, (ci, co) in enumerate([(80, 128), (128, 256), (256, 512)], start=1):
        w = dense(next(ks), 3 * ci, (3, ci, co))          # tap-major (K, Cin, Cout)
        b = dense(next(ks), 3 * ci, (co,))
        # BatchNorm1d, PyTorch default init / running stats, eval mode -> fold into conv.
        gamma = jnp.ones((co,), jnp.float32)
        beta = jnp.zeros((co,), jnp.float32)
        mean = jnp.zeros((co,), jnp.float32)
        var = jnp.ones((co,), jnp.float32)
        scale = gamma / jnp.sqrt(var + 1e-5)
        p[f"c{n}_w"] = (w * scale[None, None, :]).reshape(3 * ci, co).astype(jnp.bfloat16)
        p[f"c{n}_b"] = ((b - mean) * scale + beta).reshape(1, co)

    # embedding_layers: Linear(512,256) -> Linear(256,512)   (MXU operands in bf16)
    p["e1_w"] = dense(next(ks), 512, (512, 256)).astype(jnp.bfloat16)
    p["e1_b"] = dense(next(ks), 512, (1, 256))
    p["e2_w"] = dense(next(ks), 256, (256, 512)).astype(jnp.bfloat16)
    p["e2_b"] = dense(next(ks), 256, (1, 512))
    # verification_head: Linear(1024,256) -> Linear(256,1)   (plain JAX, keep f32)
    p["v1_w"] = dense(next(ks), 1024, (1024, 256))
    p["v1_b"] = dense(next(ks), 1024, (1, 256))
    p["v2_w"] = dense(next(ks), 256, (256, 1))
    p["v2_b"] = dense(next(ks), 256, (1, 1))
    return p


# ------------------------------ main -----------------------------------------

if __name__ == "__main__":
    key = jax.random.PRNGKey(0)
    kp, k1, k2 = jax.random.split(key, 3)
    params = init_params(kp)

    B, T, F = 2, 16, 80                                  # (batch, frames, mel-features)
    x1 = jax.random.normal(k1, (B, T, F), jnp.float32)
    x2 = jax.random.normal(k2, (B, T, F), jnp.float32)

    emb = jax.jit(extract_features)(x1, params)          # forward(x1)      -> (B, 512)
    score = jax.jit(forward_pair)(x1, x2, params)        # forward(x1, x2)  -> (B, 1)
    jax.block_until_ready((emb, score))

    assert emb.shape == (B, 512) and score.shape == (B, 1)
    assert bool(jnp.all(jnp.isfinite(emb))) and bool(jnp.all((score >= 0) & (score <= 1)))
    print("KERNEL_OK")
</pallas_src>

<mosaic_0001>
module attributes {stable_mosaic.version = 11 : i64} {
  func.func @_extract_kernel(%arg0: i32, %arg1: memref<2x16x80xf32, #tpu.memory_space<vmem>>, %arg2: memref<240x128xbf16, #tpu.memory_space<vmem>>, %arg3: memref<1x128xf32, #tpu.memory_space<vmem>>, %arg4: memref<384x256xbf16, #tpu.memory_space<vmem>>, %arg5: memref<1x256xf32, #tpu.memory_space<vmem>>, %arg6: memref<768x512xbf16, #tpu.memory_space<vmem>>, %arg7: memref<1x512xf32, #tpu.memory_space<vmem>>, %arg8: memref<512x256xbf16, #tpu.memory_space<vmem>>, %arg9: memref<1x256xf32, #tpu.memory_space<vmem>>, %arg10: memref<256x512xbf16, #tpu.memory_space<vmem>>, %arg11: memref<1x512xf32, #tpu.memory_space<vmem>>, %arg12: memref<2x512xf32, #tpu.memory_space<vmem>>) attributes {dimension_semantics = [#tpu.dimension_semantics<parallel>], iteration_bounds = array<i64: 1>, scalar_prefetch = 0 : i64, scratch_operands = 0 : i64, tpu.core_type = #tpu.core_type<tc>, window_params = [{transform_indices = @transform_0, window_bounds = array<i64: 2, 16, 80>}, {pipeline_mode = #tpu.pipeline_mode<synchronous>, transform_indices = @transform_1, window_bounds = array<i64: 240, 128>}, {pipeline_mode = #tpu.pipeline_mode<synchronous>, transform_indices = @transform_2, window_bounds = array<i64: 1, 128>}, {pipeline_mode = #tpu.pipeline_mode<synchronous>, transform_indices = @transform_3, window_bounds = array<i64: 384, 256>}, {pipeline_mode = #tpu.pipeline_mode<synchronous>, transform_indices = @transform_4, window_bounds = array<i64: 1, 256>}, {pipeline_mode = #tpu.pipeline_mode<synchronous>, transform_indices = @transform_5, window_bounds = array<i64: 768, 512>}, {pipeline_mode = #tpu.pipeline_mode<synchronous>, transform_indices = @transform_6, window_bounds = array<i64: 1, 512>}, {pipeline_mode = #tpu.pipeline_mode<synchronous>, transform_indices = @transform_7, window_bounds = array<i64: 512, 256>}, {pipeline_mode = #tpu.pipeline_mode<synchronous>, transform_indices = @transform_8, window_bounds = array<i64: 1, 256>}, {pipeline_mode = #tpu.pipeline_mode<synchronous>, transform_indices = @transform_9, window_bounds = array<i64: 256, 512>}, {pipeline_mode = #tpu.pipeline_mode<synchronous>, transform_indices = @transform_10, window_bounds = array<i64: 1, 512>}, {transform_indices = @transform_11, window_bounds = array<i64: 2, 512>}]} {
    %c0 = arith.constant 0 : index
    %c0_0 = arith.constant 0 : index
    %c0_1 = arith.constant 0 : index
    %0 = vector.load %arg1[%c0, %c0_0, %c0_1] : memref<2x16x80xf32, #tpu.memory_space<vmem>>, vector<2x16x80xf32>
    %1 = vector.shape_cast %0 : vector<2x16x80xf32> to vector<32x80xf32>
    %cst = arith.constant 0.000000e+00 : f32
    %2 = vector.broadcast %cst : f32 to vector<1x80xf32>
    %3 = tpu.iota {dimensions = array<i32: 0>} : vector<32x1xi32>
    %c16_i32 = arith.constant 16 : i32
    %c0_i32 = arith.constant 0 : i32
    %4 = arith.cmpi eq, %c16_i32, %c0_i32 : i32
    %c1_i32 = arith.constant 1 : i32
    %5 = arith.select %4, %c1_i32, %c16_i32 : i32
    %6 = vector.broadcast %5 : i32 to vector<32x1xi32>
    %7 = arith.remsi %3, %6 : vector<32x1xi32>
    %c0_i32_2 = arith.constant 0 : i32
    %8 = vector.broadcast %c0_i32_2 : i32 to vector<32x1xi32>
    %9 = arith.cmpi ne, %7, %8 : vector<32x1xi32>
    %c0_i32_3 = arith.constant 0 : i32
    %10 = vector.broadcast %c0_i32_3 : i32 to vector<32x1xi32>
    %11 = arith.cmpi slt, %7, %10 : vector<32x1xi32>
    %c0_i32_4 = arith.constant 0 : i32
    %12 = arith.cmpi slt, %5, %c0_i32_4 : i32
    %13 = vector.broadcast %12 : i1 to vector<32x1xi1>
    %14 = vector.broadcast %13 : vector<32x1xi1> to vector<32x1xi1>
    %15 = arith.xori %11, %14 : vector<32x1xi1>
    %16 = arith.andi %15, %9 : vector<32x1xi1>
    %17 = vector.broadcast %5 : i32 to vector<32x1xi32>
    %18 = arith.addi %7, %17 : vector<32x1xi32>
    %19 = arith.select %16, %18, %7 : vector<32x1xi1>, vector<32x1xi32>
    %c0_i32_5 = arith.constant 0 : i32
    %20 = vector.broadcast %c0_i32_5 : i32 to vector<32x1xi32>
    %21 = arith.cmpi ne, %19, %20 : vector<32x1xi32>
    %22 = arith.extui %21 : vector<32x1xi1> to vector<32x1xi32>
    %23 = arith.sitofp %22 : vector<32x1xi32> to vector<32x1xf32>
    %c15_i32 = arith.constant 15 : i32
    %24 = vector.broadcast %c15_i32 : i32 to vector<32x1xi32>
    %25 = arith.cmpi ne, %19, %24 : vector<32x1xi32>
    %26 = arith.extui %25 : vector<32x1xi1> to vector<32x1xi32>
    %27 = arith.sitofp %26 : vector<32x1xi32> to vector<32x1xf32>
    %28 = vector.extract_strided_slice %1 {offsets = [0, 0], sizes = [31, 80], strides = [1, 1]} : vector<32x80xf32> to vector<31x80xf32>
    %29 = tpu.concatenate %2, %28 in 0 : vector<1x80xf32>, vector<31x80xf32> -> vector<32x80xf32>
    %30 = vector.broadcast %23 : vector<32x1xf32> to vector<32x80xf32>
    %31 = arith.mulf %29, %30 : vector<32x80xf32>
    %32 = vector.extract_strided_slice %1 {offsets = [1, 0], sizes = [31, 80], strides = [1, 1]} : vector<32x80xf32> to vector<31x80xf32>
    %33 = tpu.concatenate %32, %2 in 0 : vector<31x80xf32>, vector<1x80xf32> -> vector<32x80xf32>
    %34 = vector.broadcast %27 : vector<32x1xf32> to vector<32x80xf32>
    %35 = arith.mulf %33, %34 : vector<32x80xf32>
    %36 = arith.truncf %31 : vector<32x80xf32> to vector<32x80xbf16>
    %c0_6 = arith.constant 0 : index
    %c0_7 = arith.constant 0 : index
    %37 = vector.load %arg2[%c0_6, %c0_7] : memref<240x128xbf16, #tpu.memory_space<vmem>>, vector<80x128xbf16>
    %cst_8 = arith.constant dense<0.000000e+00> : vector<32x128xf32>
    %38 = tpu.matmul %36, %37, %cst_8 {dimension_numbers = #tpu.dot_dimension_numbers<[1], [0], [0], [1], [0, 0, 1, 1], [], []>} : vector<32x80xbf16>, vector<80x128xbf16>, vector<32x128xf32> -> vector<32x128xf32>
    %39 = arith.truncf %1 : vector<32x80xf32> to vector<32x80xbf16>
    %c80 = arith.constant 80 : index
    %c0_9 = arith.constant 0 : index
    %40 = vector.load %arg2[%c80, %c0_9] : memref<240x128xbf16, #tpu.memory_space<vmem>>, vector<80x128xbf16>
    %cst_10 = arith.constant dense<0.000000e+00> : vector<32x128xf32>
    %41 = tpu.matmul %39, %40, %cst_10 {dimension_numbers = #tpu.dot_dimension_numbers<[1], [0], [0], [1], [0, 0, 1, 1], [], []>} : vector<32x80xbf16>, vector<80x128xbf16>, vector<32x128xf32> -> vector<32x128xf32>
    %42 = arith.addf %38, %41 : vector<32x128xf32>
    %43 = arith.truncf %35 : vector<32x80xf32> to vector<32x80xbf16>
    %c160 = arith.constant 160 : index
    %c0_11 = arith.constant 0 : index
    %44 = vector.load %arg2[%c160, %c0_11] : memref<240x128xbf16, #tpu.memory_space<vmem>>, vector<80x128xbf16>
    %cst_12 = arith.constant dense<0.000000e+00> : vector<32x128xf32>
    %45 = tpu.matmul %43, %44, %cst_12 {dimension_numbers = #tpu.dot_dimension_numbers<[1], [0], [0], [1], [0, 0, 1, 1], [], []>} : vector<32x80xbf16>, vector<80x128xbf16>, vector<32x128xf32> -> vector<32x128xf32>
    %46 = arith.addf %42, %45 : vector<32x128xf32>
    %47 = vector.shape_cast %46 : vector<32x128xf32> to vector<16x2x128xf32>
    %cst_13 = arith.constant dense<0xFF800000> : vector<16x128xf32>
    %48 = vector.multi_reduction <maximumf>, %47, %cst_13 [1] : vector<16x2x128xf32> to vector<16x128xf32>
    %c0_14 = arith.constant 0 : index
    %c0_15 = arith.constant 0 : index
    %49 = vector.load %arg3[%c0_14, %c0_15] : memref<1x128xf32, #tpu.memory_space<vmem>>, vector<1x128xf32>
    %50 = vector.broadcast %49 : vector<1x128xf32> to vector<16x128xf32>
    %51 = arith.addf %48, %50 : vector<16x128xf32>
    %cst_16 = arith.constant 0.000000e+00 : f32
    %52 = vector.broadcast %cst_16 : f32 to vector<16x128xf32>
    %53 = arith.maximumf %51, %52 : vector<16x128xf32>
    %cst_17 = arith.constant 0.000000e+00 : f32
    %54 = vector.broadcast %cst_17 : f32 to vector<1x128xf32>
    %55 = tpu.iota {dimensions = array<i32: 0>} : vector<16x1xi32>
    %c8_i32 = arith.constant 8 : i32
    %c0_i32_18 = arith.constant 0 : i32
    %56 = arith.cmpi eq, %c8_i32, %c0_i32_18 : i32
    %c1_i32_19 = arith.constant 1 : i32
    %57 = arith.select %56, %c1_i32_19, %c8_i32 : i32
    %58 = vector.broadcast %57 : i32 to vector<16x1xi32>
    %59 = arith.remsi %55, %58 : vector<16x1xi32>
    %c0_i32_20 = arith.constant 0 : i32
    %60 = vector.broadcast %c0_i32_20 : i32 to vector<16x1xi32>
    %61 = arith.cmpi ne, %59, %60 : vector<16x1xi32>
    %c0_i32_21 = arith.constant 0 : i32
    %62 = vector.broadcast %c0_i32_21 : i32 to vector<16x1xi32>
    %63 = arith.cmpi slt, %59, %62 : vector<16x1xi32>
    %c0_i32_22 = arith.constant 0 : i32
    %64 = arith.cmpi slt, %57, %c0_i32_22 : i32
    %65 = vector.broadcast %64 : i1 to vector<16x1xi1>
    %66 = vector.broadcast %65 : vector<16x1xi1> to vector<16x1xi1>
    %67 = arith.xori %63, %66 : vector<16x1xi1>
    %68 = arith.andi %67, %61 : vector<16x1xi1>
    %69 = vector.broadcast %57 : i32 to vector<16x1xi32>
    %70 = arith.addi %59, %69 : vector<16x1xi32>
    %71 = arith.select %68, %70, %59 : vector<16x1xi1>, vector<16x1xi32>
    %c0_i32_23 = arith.constant 0 : i32
    %72 = vector.broadcast %c0_i32_23 : i32 to vector<16x1xi32>
    %73 = arith.cmpi ne, %71, %72 : vector<16x1xi32>
    %74 = arith.extui %73 : vector<16x1xi1> to vector<16x1xi32>
    %75 = arith.sitofp %74 : vector<16x1xi32> to vector<16x1xf32>
    %c7_i32 = arith.constant 7 : i32
    %76 = vector.broadcast %c7_i32 : i32 to vector<16x1xi32>
    %77 = arith.cmpi ne, %71, %76 : vector<16x1xi32>
    %78 = arith.extui %77 : vector<16x1xi1> to vector<16x1xi32>
    %79 = arith.sitofp %78 : vector<16x1xi32> to vector<16x1xf32>
    %80 = vector.extract_strided_slice %53 {offsets = [0, 0], sizes = [15, 128], strides = [1, 1]} : vector<16x128xf32> to vector<15x128xf32>
    %81 = tpu.concatenate %54, %80 in 0 : vector<1x128xf32>, vector<15x128xf32> -> vector<16x128xf32>
    %82 = vector.broadcast %75 : vector<16x1xf32> to vector<16x128xf32>
    %83 = arith.mulf %81, %82 : vector<16x128xf32>
    %84 = vector.extract_strided_slice %53 {offsets = [1, 0], sizes = [15, 128], strides = [1, 1]} : vector<16x128xf32> to vector<15x128xf32>
    %85 = tpu.concatenate %84, %54 in 0 : vector<15x128xf32>, vector<1x128xf32> -> vector<16x128xf32>
    %86 = vector.broadcast %79 : vector<16x1xf32> to vector<16x128xf32>
    %87 = arith.mulf %85, %86 : vector<16x128xf32>
    %88 = arith.truncf %83 : vector<16x128xf32> to vector<16x128xbf16>
    %c0_24 = arith.constant 0 : index
    %c0_25 = arith.constant 0 : index
    %89 = vector.load %arg4[%c0_24, %c0_25] : memref<384x256xbf16, #tpu.memory_space<vmem>>, vector<128x256xbf16>
    %cst_26 = arith.constant dense<0.000000e+00> : vector<16x256xf32>
    %90 = tpu.matmul %88, %89, %cst_26 {dimension_numbers = #tpu.dot_dimension_numbers<[1], [0], [0], [1], [0, 0, 1, 1], [], []>} : vector<16x128xbf16>, vector<128x256xbf16>, vector<16x256xf32> -> vector<16x256xf32>
    %91 = arith.truncf %53 : vector<16x128xf32> to vector<16x128xbf16>
    %c128 = arith.constant 128 : index
    %c0_27 = arith.constant 0 : index
    %92 = vector.load %arg4[%c128, %c0_27] : memref<384x256xbf16, #tpu.memory_space<vmem>>, vector<128x256xbf16>
    %cst_28 = arith.constant dense<0.000000e+00> : vector<16x256xf32>
    %93 = tpu.matmul %91, %92, %cst_28 {dimension_numbers = #tpu.dot_dimension_numbers<[1], [0], [0], [1], [0, 0, 1, 1], [], []>} : vector<16x128xbf16>, vector<128x256xbf16>, vector<16x256xf32> -> vector<16x256xf32>
    %94 = arith.addf %90, %93 : vector<16x256xf32>
    %95 = arith.truncf %87 : vector<16x128xf32> to vector<16x128xbf16>
    %c256 = arith.constant 256 : index
    %c0_29 = arith.constant 0 : index
    %96 = vector.load %arg4[%c256, %c0_29] : memref<384x256xbf16, #tpu.memory_space<vmem>>, vector<128x256xbf16>
    %cst_30 = arith.constant dense<0.000000e+00> : vector<16x256xf32>
    %97 = tpu.matmul %95, %96, %cst_30 {dimension_numbers = #tpu.dot_dimension_numbers<[1], [0], [0], [1], [0, 0, 1, 1], [], []>} : vector<16x128xbf16>, vector<128x256xbf16>, vector<16x256xf32> -> vector<16x256xf32>
    %98 = arith.addf %94, %97 : vector<16x256xf32>
    %99 = vector.shape_cast %98 : vector<16x256xf32> to vector<8x2x256xf32>
    %cst_31 = arith.constant dense<0xFF800000> : vector<8x256xf32>
    %100 = vector.multi_reduction <maximumf>, %99, %cst_31 [1] : vector<8x2x256xf32> to vector<8x256xf32>
    %c0_32 = arith.constant 0 : index
    %c0_33 = arith.constant 0 : index
    %101 = vector.load %arg5[%c0_32, %c0_33] : memref<1x256xf32, #tpu.memory_space<vmem>>, vector<1x256xf32>
    %102 = vector.broadcast %101 : vector<1x256xf32> to vector<8x256xf32>
    %103 = arith.addf %100, %102 : vector<8x256xf32>
    %cst_34 = arith.constant 0.000000e+00 : f32
    %104 = vector.broadcast %cst_34 : f32 to vector<8x256xf32>
    %105 = arith.maximumf %103, %104 : vector<8x256xf32>
    %cst_35 = arith.constant 0.000000e+00 : f32
    %106 = vector.broadcast %cst_35 : f32 to vector<1x256xf32>
    %107 = tpu.iota {dimensions = array<i32: 0>} : vector<8x1xi32>
    %c4_i32 = arith.constant 4 : i32
    %c0_i32_36 = arith.constant 0 : i32
    %108 = arith.cmpi eq, %c4_i32, %c0_i32_36 : i32
    %c1_i32_37 = arith.constant 1 : i32
    %109 = arith.select %108, %c1_i32_37, %c4_i32 : i32
    %110 = vector.broadcast %109 : i32 to vector<8x1xi32>
    %111 = arith.remsi %107, %110 : vector<8x1xi32>
    %c0_i32_38 = arith.constant 0 : i32
    %112 = vector.broadcast %c0_i32_38 : i32 to vector<8x1xi32>
    %113 = arith.cmpi ne, %111, %112 : vector<8x1xi32>
    %c0_i32_39 = arith.constant 0 : i32
    %114 = vector.broadcast %c0_i32_39 : i32 to vector<8x1xi32>
    %115 = arith.cmpi slt, %111, %114 : vector<8x1xi32>
    %c0_i32_40 = arith.constant 0 : i32
    %116 = arith.cmpi slt, %109, %c0_i32_40 : i32
    %117 = vector.broadcast %116 : i1 to vector<8x1xi1>
    %118 = vector.broadcast %117 : vector<8x1xi1> to vector<8x1xi1>
    %119 = arith.xori %115, %118 : vector<8x1xi1>
    %120 = arith.andi %119, %113 : vector<8x1xi1>
    %121 = vector.broadcast %109 : i32 to vector<8x1xi32>
    %122 = arith.addi %111, %121 : vector<8x1xi32>
    %123 = arith.select %120, %122, %111 : vector<8x1xi1>, vector<8x1xi32>
    %c0_i32_41 = arith.constant 0 : i32
    %124 = vector.broadcast %c0_i32_41 : i32 to vector<8x1xi32>
    %125 = arith.cmpi ne, %123, %124 : vector<8x1xi32>
    %126 = arith.extui %125 : vector<8x1xi1> to vector<8x1xi32>
    %127 = arith.sitofp %126 : vector<8x1xi32> to vector<8x1xf32>
    %c3_i32 = arith.constant 3 : i32
    %128 = vector.broadcast %c3_i32 : i32 to vector<8x1xi32>
    %129 = arith.cmpi ne, %123, %128 : vector<8x1xi32>
    %130 = arith.extui %129 : vector<8x1xi1> to vector<8x1xi32>
    %131 = arith.sitofp %130 : vector<8x1xi32> to vector<8x1xf32>
    %132 = vector.extract_strided_slice %105 {offsets = [0, 0], sizes = [7, 256], strides = [1, 1]} : vector<8x256xf32> to vector<7x256xf32>
    %133 = tpu.concatenate %106, %132 in 0 : vector<1x256xf32>, vector<7x256xf32> -> vector<8x256xf32>
    %134 = vector.broadcast %127 : vector<8x1xf32> to vector<8x256xf32>
    %135 = arith.mulf %133, %134 : vector<8x256xf32>
    %136 = vector.extract_strided_slice %105 {offsets = [1, 0], sizes = [7, 256], strides = [1, 1]} : vector<8x256xf32> to vector<7x256xf32>
    %137 = tpu.concatenate %136, %106 in 0 : vector<7x256xf32>, vector<1x256xf32> -> vector<8x256xf32>
    %138 = vector.broadcast %131 : vector<8x1xf32> to vector<8x256xf32>
    %139 = arith.mulf %137, %138 : vector<8x256xf32>
    %140 = arith.truncf %135 : vector<8x256xf32> to vector<8x256xbf16>
    %c0_42 = arith.constant 0 : index
    %c0_43 = arith.constant 0 : index
    %141 = vector.load %arg6[%c0_42, %c0_43] : memref<768x512xbf16, #tpu.memory_space<vmem>>, vector<256x512xbf16>
    %cst_44 = arith.constant dense<0.000000e+00> : vector<8x512xf32>
    %142 = tpu.matmul %140, %141, %cst_44 {dimension_numbers = #tpu.dot_dimension_numbers<[1], [0], [0], [1], [0, 0, 1, 1], [], []>} : vector<8x256xbf16>, vector<256x512xbf16>, vector<8x512xf32> -> vector<8x512xf32>
    %143 = arith.truncf %105 : vector<8x256xf32> to vector<8x256xbf16>
    %c256_45 = arith.constant 256 : index
    %c0_46 = arith.constant 0 : index
    %144 = vector.load %arg6[%c256_45, %c0_46] : memref<768x512xbf16, #tpu.memory_space<vmem>>, vector<256x512xbf16>
    %cst_47 = arith.constant dense<0.000000e+00> : vector<8x512xf32>
    %145 = tpu.matmul %143, %144, %cst_47 {dimension_numbers = #tpu.dot_dimension_numbers<[1], [0], [0], [1], [0, 0, 1, 1], [], []>} : vector<8x256xbf16>, vector<256x512xbf16>, vector<8x512xf32> -> vector<8x512xf32>
    %146 = arith.addf %142, %145 : vector<8x512xf32>
    %147 = arith.truncf %139 : vector<8x256xf32> to vector<8x256xbf16>
    %c512 = arith.constant 512 : index
    %c0_48 = arith.constant 0 : index
    %148 = vector.load %arg6[%c512, %c0_48] : memref<768x512xbf16, #tpu.memory_space<vmem>>, vector<256x512xbf16>
    %cst_49 = arith.constant dense<0.000000e+00> : vector<8x512xf32>
    %149 = tpu.matmul %147, %148, %cst_49 {dimension_numbers = #tpu.dot_dimension_numbers<[1], [0], [0], [1], [0, 0, 1, 1], [], []>} : vector<8x256xbf16>, vector<256x512xbf16>, vector<8x512xf32> -> vector<8x512xf32>
    %150 = arith.addf %146, %149 : vector<8x512xf32>
    %c0_50 = arith.constant 0 : index
    %c0_51 = arith.constant 0 : index
    %151 = vector.load %arg7[%c0_50, %c0_51] : memref<1x512xf32, #tpu.memory_space<vmem>>, vector<1x512xf32>
    %152 = vector.broadcast %151 : vector<1x512xf32> to vector<8x512xf32>
    %153 = arith.addf %150, %152 : vector<8x512xf32>
    %cst_52 = arith.constant 0.000000e+00 : f32
    %154 = vector.broadcast %cst_52 : f32 to vector<8x512xf32>
    %155 = arith.maximumf %153, %154 : vector<8x512xf32>
    %156 = vector.shape_cast %155 : vector<8x512xf32> to vector<2x4x512xf32>
    %cst_53 = arith.constant dense<0.000000e+00> : vector<2x512xf32>
    %157 = vector.multi_reduction <add>, %156, %cst_53 [1] : vector<2x4x512xf32> to vector<2x512xf32>
    %cst_54 = arith.constant 4.000000e+00 : f32
    %158 = vector.broadcast %cst_54 : f32 to vector<2x512xf32>
    %159 = arith.divf %157, %158 : vector<2x512xf32>
    %160 = arith.truncf %159 : vector<2x512xf32> to vector<2x512xbf16>
    %c0_55 = arith.constant 0 : index
    %c0_56 = arith.constant 0 : index
    %161 = vector.load %arg8[%c0_55, %c0_56] : memref<512x256xbf16, #tpu.memory_space<vmem>>, vector<512x256xbf16>
    %cst_57 = arith.constant dense<0.000000e+00> : vector<2x256xf32>
    %162 = tpu.matmul %160, %161, %cst_57 {dimension_numbers = #tpu.dot_dimension_numbers<[1], [0], [0], [1], [0, 0, 1, 1], [], []>} : vector<2x512xbf16>, vector<512x256xbf16>, vector<2x256xf32> -> vector<2x256xf32>
    %c0_58 = arith.constant 0 : index
    %c0_59 = arith.constant 0 : index
    %163 = vector.load %arg9[%c0_58, %c0_59] : memref<1x256xf32, #tpu.memory_space<vmem>>, vector<1x256xf32>
    %164 = vector.broadcast %163 : vector<1x256xf32> to vector<2x256xf32>
    %165 = arith.addf %162, %164 : vector<2x256xf32>
    %cst_60 = arith.constant 0.000000e+00 : f32
    %166 = vector.broadcast %cst_60 : f32 to vector<2x256xf32>
    %167 = arith.maximumf %165, %166 : vector<2x256xf32>
    %168 = arith.truncf %167 : vector<2x256xf32> to vector<2x256xbf16>
    %c0_61 = arith.constant 0 : index
    %c0_62 = arith.constant 0 : index
    %169 = vector.load %arg10[%c0_61, %c0_62] : memref<256x512xbf16, #tpu.memory_space<vmem>>, vector<256x512xbf16>
    %cst_63 = arith.constant dense<0.000000e+00> : vector<2x512xf32>
    %170 = tpu.matmul %168, %169, %cst_63 {dimension_numbers = #tpu.dot_dimension_numbers<[1], [0], [0], [1], [0, 0, 1, 1], [], []>} : vector<2x256xbf16>, vector<256x512xbf16>, vector<2x512xf32> -> vector<2x512xf32>
    %c0_64 = arith.constant 0 : index
    %c0_65 = arith.constant 0 : index
    %171 = vector.load %arg11[%c0_64, %c0_65] : memref<1x512xf32, #tpu.memory_space<vmem>>, vector<1x512xf32>
    %172 = vector.broadcast %171 : vector<1x512xf32> to vector<2x512xf32>
    %173 = arith.addf %170, %172 : vector<2x512xf32>
    %174 = math.tanh %173 : vector<2x512xf32>
    %175 = arith.mulf %174, %174 : vector<2x512xf32>
    %cst_66 = arith.constant dense<0.000000e+00> : vector<2xf32>
    %176 = vector.multi_reduction <add>, %175, %cst_66 [1] : vector<2x512xf32> to vector<2xf32>
    %177 = vector.shape_cast %176 : vector<2xf32> to vector<2x1xf32>
    %cst_67 = arith.constant 1.000000e-24 : f32
    %178 = vector.broadcast %cst_67 : f32 to vector<2x1xf32>
    %179 = arith.maximumf %177, %178 : vector<2x1xf32>
    %180 = math.rsqrt %179 : vector<2x1xf32>
    %181 = vector.broadcast %180 : vector<2x1xf32> to vector<2x512xf32>
    %182 = arith.mulf %174, %181 : vector<2x512xf32>
    %c0_68 = arith.constant 0 : index
    %c0_69 = arith.constant 0 : index
    %183 = vector.load %arg12[%c0_68, %c0_69] : memref<2x512xf32, #tpu.memory_space<vmem>>, vector<2x512xf32>
    tpu.vector_store %arg12[%c0_68, %c0_69], %182 {strides = array<i32>} : memref<2x512xf32, #tpu.memory_space<vmem>>, vector<2x512xf32>,
    return
  }
  func.func @transform_0(%arg0: i32) -> (i32, i32, i32) {
    %c0_i32 = arith.constant 0 : i32
    %c0_i32_0 = arith.constant 0 : i32
    %c0_i32_1 = arith.constant 0 : i32
    return %arg0, %c0_i32, %c0_i32_0 : i32, i32, i32
  }
  func.func @transform_1(%arg0: i32) -> (i32, i32) {
    %c0_i32 = arith.constant 0 : i32
    %c0_i32_0 = arith.constant 0 : i32
    %c0_i32_1 = arith.constant 0 : i32
    return %c0_i32, %c0_i32_0 : i32, i32
  }
  func.func @transform_2(%arg0: i32) -> (i32, i32) {
    %c0_i32 = arith.constant 0 : i32
    %c0_i32_0 = arith.constant 0 : i32
    %c0_i32_1 = arith.constant 0 : i32
    return %c0_i32, %c0_i32_0 : i32, i32
  }
  func.func @transform_3(%arg0: i32) -> (i32, i32) {
    %c0_i32 = arith.constant 0 : i32
    %c0_i32_0 = arith.constant 0 : i32
    %c0_i32_1 = arith.constant 0 : i32
    return %c0_i32, %c0_i32_0 : i32, i32
  }
  func.func @transform_4(%arg0: i32) -> (i32, i32) {
    %c0_i32 = arith.constant 0 : i32
    %c0_i32_0 = arith.constant 0 : i32
    %c0_i32_1 = arith.constant 0 : i32
    return %c0_i32, %c0_i32_0 : i32, i32
  }
  func.func @transform_5(%arg0: i32) -> (i32, i32) {
    %c0_i32 = arith.constant 0 : i32
    %c0_i32_0 = arith.constant 0 : i32
    %c0_i32_1 = arith.constant 0 : i32
    return %c0_i32, %c0_i32_0 : i32, i32
  }
  func.func @transform_6(%arg0: i32) -> (i32, i32) {
    %c0_i32 = arith.constant 0 : i32
    %c0_i32_0 = arith.constant 0 : i32
    %c0_i32_1 = arith.constant 0 : i32
    return %c0_i32, %c0_i32_0 : i32, i32
  }
  func.func @transform_7(%arg0: i32) -> (i32, i32) {
    %c0_i32 = arith.constant 0 : i32
    %c0_i32_0 = arith.constant 0 : i32
    %c0_i32_1 = arith.constant 0 : i32
    return %c0_i32, %c0_i32_0 : i32, i32
  }
  func.func @transform_8(%arg0: i32) -> (i32, i32) {
    %c0_i32 = arith.constant 0 : i32
    %c0_i32_0 = arith.constant 0 : i32
    %c0_i32_1 = arith.constant 0 : i32
    return %c0_i32, %c0_i32_0 : i32, i32
  }
  func.func @transform_9(%arg0: i32) -> (i32, i32) {
    %c0_i32 = arith.constant 0 : i32
    %c0_i32_0 = arith.constant 0 : i32
    %c0_i32_1 = arith.constant 0 : i32
    return %c0_i32, %c0_i32_0 : i32, i32
  }
  func.func @transform_10(%arg0: i32) -> (i32, i32) {
    %c0_i32 = arith.constant 0 : i32
    %c0_i32_0 = arith.constant 0 : i32
    %c0_i32_1 = arith.constant 0 : i32
    return %c0_i32, %c0_i32_0 : i32, i32
  }
  func.func @transform_11(%arg0: i32) -> (i32, i32) {
    %c0_i32 = arith.constant 0 : i32
    %c0_i32_0 = arith.constant 0 : i32
    return %arg0, %c0_i32 : i32, i32
  }
}

</mosaic_0001>

<bundles_post_ra>
// kernel: extract_features.1
= control target key start
LH: loop header
LB: loop body
LE: loop exit
PB: predicated region body
PF: predicated region fallthrough
CT: control target
= control target key end

     0   :  { %16 = vsyncpa [#allocation3], 0  ;;  %s6465_s0 = inlined_call_operand.hbm [shape: f32[2,16,80], index: 0, kind: input, shape index: {}]   ;;  %s6466_s1 = inlined_call_operand.hbm [shape: bf16[240,128], index: 1, kind: input, shape index: {}]   ;;  %s6467_s2 = inlined_call_operand.vmem [shape: f32[1,128], index: 2, kind: input, shape index: {}]   ;;  %s6468_s3 = inlined_call_operand.hbm [shape: bf16[384,256], index: 3, kind: input, shape index: {}]   ;;  %s6469_s4 = inlined_call_operand.vmem [shape: f32[1,256], index: 4, kind: input, shape index: {}]   ;;  %s6470_s5 = inlined_call_operand.hbm [shape: bf16[768,512], index: 5, kind: input, shape index: {}]   ;;  %s6471_s6 = inlined_call_operand.vmem [shape: f32[1,512], index: 6, kind: input, shape index: {}]   ;;  %s6472_s7 = inlined_call_operand.hbm [shape: bf16[512,256], index: 7, kind: input, shape index: {}]   ;;  %s6473_s8 = inlined_call_operand.vmem [shape: f32[1,256], index: 8, kind: input, shape index: {}]   ;;  %s6474_s9 = inlined_call_operand.hbm [shape: bf16[256,512], index: 9, kind: input, shape index: {}]   ;;  %s6475_s10 = inlined_call_operand.vmem [shape: f32[1,512], index: 10, kind: input, shape index: {}]   ;;  %s6476_s11 = inlined_call_operand.hbm [shape: f32[2,512], index: 11, kind: output, shape index: {}]  }
   0x1   :  { %17 = vsyncpa [#allocation6], 0 }
   0x2   :  { %18 = vsyncpa [#allocation9], 0 }
   0x3   :  { %19 = vsyncpa [#allocation12], 0 }
   0x4   :  { %20 = vsyncpa [#allocation4], 0  ;;  %s5690_s17 = smov [#allocation5]   ;;  %s5526_s21 = scalar_lea.hbm %s6466_s1, 1920 }
   0x5   :  { %s38_s18 = sshll.u32 %s5690_s17, 4  ;;  %p5527_p0 = scmp.ne.s32.totalorder %s6466_s1, %s5526_s21  ;;  %s39_s18 = int_to_ptr.vmem [resolvable:$true] %s38_s18 }
   0x6   :  { %p5530_p1 = scmp.lt.u32.totalorder %s5526_s21, %s6466_s1 }
   0x8   :  { %p5532_p2 = pnand %p5530_p1, %p5527_p0 }
   0xa   :  { %5535 = shalt.err (!%p5532_p2)
}
   0xb   :  { %s5536_s26 = scalar_lea.vmem %s39_s18, 1920  ;;  %p5541_p4 = scmp.lt.s32.totalorder %s39_s18, %s39_s18 }
   0xc   :  { %p5537_p3 = scmp.ne.s32.totalorder %s39_s18, %s5536_s26  ;;  %p5542_p5 = scmp.lt.s32.totalorder %s5536_s26, %s5536_s26 }
   0xe   :  { %p5543_p6 = por %p5542_p5, %p5541_p4 }
  0x10   :  { %p5544_p7 = pnand %p5543_p6, %p5537_p3 }
  0x12   :  { %5547 = shalt.err (!%p5544_p7)
}
  0x13   :  { %s5691_s27 = smov 64   ;;  %s5692_s28 = smov 4  }
  0x14   :  { %44 = dma.hbm_to_vmem [thread:$0]  %s6466_s1, 1920, %s39_s18, [#allocation6], %s5691_s27, %s5691_s27, %s5692_s28  }
  0x15   :  { %s5693_s12 = smov [#allocation8]   ;;  %s5548_s16 = scalar_lea.hbm %s6470_s5, 24576 }
  0x16   :  { %s66_s13 = sshll.u32 %s5693_s12, 4  ;;  %p5549_p8 = scmp.ne.s32.totalorder %s6470_s5, %s5548_s16  ;;  %s67_s13 = int_to_ptr.vmem [resolvable:$true] %s66_s13 }
  0x17   :  { %p5552_p9 = scmp.lt.u32.totalorder %s5548_s16, %s6470_s5 }
  0x19   :  { %p5554_p10 = pnand %p5552_p9, %p5549_p8 }
  0x1b   :  { %5557 = shalt.err (!%p5554_p10)
}
  0x1c   :  { %s5558_s22 = scalar_lea.vmem %s67_s13, 24576  ;;  %p5563_p12 = scmp.lt.s32.totalorder %s67_s13, %s67_s13 }
  0x1d   :  { %p5559_p11 = scmp.ne.s32.totalorder %s67_s13, %s5558_s22  ;;  %p5564_p13 = scmp.lt.s32.totalorder %s5558_s22, %s5558_s22 }
  0x1f   :  { %p5565_p0 = por %p5564_p13, %p5563_p12 }
  0x21   :  { %p5566_p1 = pnand %p5565_p0, %p5559_p11 }
  0x23   :  { %5569 = shalt.err (!%p5566_p1)
}
  0x24   :  { %s5694_s1 = smov 256   ;;  %s5695_s18 = smov 16  }
  0x25   :  { %72 = dma.hbm_to_vmem [thread:$0]  %s6470_s5, 24576, %s67_s13, [#allocation9], %s5694_s1, %s5694_s1, %s5695_s18  }
  0x26   :  { %s5696_s25 = smov [#allocation2]   ;;  %s5570_s29 = scalar_lea.hbm %s6465_s0, 512 }
  0x27   :  { %s26_s26 = sshll.u32 %s5696_s25, 4  ;;  %p5571_p2 = scmp.ne.s32.totalorder %s6465_s0, %s5570_s29  ;;  %s27_s26 = int_to_ptr.vmem [resolvable:$true] %s26_s26 }
  0x28   :  { %p5574_p3 = scmp.lt.u32.totalorder %s5570_s29, %s6465_s0 }
  0x2a   :  { %p5576_p4 = pnand %p5574_p3, %p5571_p2 }
  0x2c   :  { %5579 = shalt.err (!%p5576_p4)
}
  0x2d   :  { %s5580_s16 = scalar_lea.vmem %s27_s26, 512  ;;  %p5585_p6 = scmp.lt.s32.totalorder %s27_s26, %s27_s26 }
  0x2e   :  { %p5581_p5 = scmp.ne.s32.totalorder %s27_s26, %s5580_s16  ;;  %p5586_p7 = scmp.lt.s32.totalorder %s5580_s16, %s5580_s16 }
  0x30   :  { %p5587_p8 = por %p5586_p7, %p5585_p6 }
  0x32   :  { %p5588_p9 = pnand %p5587_p8, %p5581_p5 }
  0x34   :  { %5591 = shalt.err (!%p5588_p9)
}
  0x35   :  { %s5697_s5 = smov 128   ;;  %s5698_s13 = smov 8  }
  0x36   :  { %32 = dma.hbm_to_vmem [thread:$0]  %s6465_s0, 512, %s27_s26, [#allocation3], %s5697_s5, %s5697_s5, %s5698_s13  }
  0x37   :  { %s5699_s20 = smov [#allocation7]   ;;  %s5700_s22 = smov [#allocation10]  }
  0x38   :  { %s52_s21 = sshll.u32 %s5699_s20, 4  ;;  %s80_s23 = sshll.u32 %s5700_s22, 4  ;;  %s53_s21 = int_to_ptr.vmem [resolvable:$true] %s52_s21  ;;  %s81_s23 = int_to_ptr.vmem [resolvable:$true] %s80_s23 }
  0x39   :  { %s5592_s27 = scalar_lea.hbm %s6468_s3, 6144 }
  0x3a   :  { %p5593_p10 = scmp.ne.s32.totalorder %s6468_s3, %s5592_s27  ;;  %p5596_p11 = scmp.lt.u32.totalorder %s5592_s27, %s6468_s3 }
  0x3c   :  { %p5598_p12 = pnand %p5596_p11, %p5593_p10 }
  0x3e   :  { %5601 = shalt.err (!%p5598_p12)
}
  0x3f   :  { %s5602_s0 = scalar_lea.vmem %s53_s21, 6144  ;;  %p5607_p0 = scmp.lt.s32.totalorder %s53_s21, %s53_s21 }
  0x40   :  { %p5603_p13 = scmp.ne.s32.totalorder %s53_s21, %s5602_s0  ;;  %p5608_p1 = scmp.lt.s32.totalorder %s5602_s0, %s5602_s0 }
  0x42   :  { %p5609_p2 = por %p5608_p1, %p5607_p0 }
  0x44   :  { %p5610_p3 = pnand %p5609_p2, %p5603_p13 }
  0x46   :  { %5613 = shalt.err (!%p5610_p3)
}
  0x47   :  { %58 = dma.hbm_to_vmem [thread:$0]  %s6468_s3, 6144, %s53_s21, [#allocation6], %s5697_s5, %s5697_s5, %s5698_s13  }
  0x48   :  { %s5614_s17 = scalar_lea.hbm %s6472_s7, 8192 }
  0x49   :  { %p5615_p4 = scmp.ne.s32.totalorder %s6472_s7, %s5614_s17  ;;  %p5618_p5 = scmp.lt.u32.totalorder %s5614_s17, %s6472_s7 }
  0x4b   :  { %p5620_p6 = pnand %p5618_p5, %p5615_p4 }
  0x4d   :  { %5623 = shalt.err (!%p5620_p6)
}
  0x4e   :  { %s5624_s25 = scalar_lea.vmem %s81_s23, 8192  ;;  %p5629_p8 = scmp.lt.s32.totalorder %s81_s23, %s81_s23 }
  0x4f   :  { %p5625_p7 = scmp.ne.s32.totalorder %s81_s23, %s5624_s25  ;;  %p5630_p9 = scmp.lt.s32.totalorder %s5624_s25, %s5624_s25 }
  0x51   :  { %p5631_p10 = por %p5630_p9, %p5629_p8 }
  0x53   :  { %p5632_p11 = pnand %p5631_p10, %p5625_p7 }
  0x55   :  { %5635 = shalt.err (!%p5632_p11)
}
  0x56   :  { %86 = dma.hbm_to_vmem [thread:$0]  %s6472_s7, 8192, %s81_s23, [#allocation9], %s5697_s5, %s5697_s5, %s5698_s13  }
  0x57   :  { %s5701_s27 = smov [#allocation11]   ;;  %s5636_s12 = scalar_lea.hbm %s6474_s9, 8192 }
  0x58   :  { %s94_s28 = sshll.u32 %s5701_s27, 4  ;;  %p5637_p12 = scmp.ne.s32.totalorder %s6474_s9, %s5636_s12  ;;  %s95_s28 = int_to_ptr.vmem [resolvable:$true] %s94_s28 }
  0x59   :  { %p5640_p13 = scmp.lt.u32.totalorder %s5636_s12, %s6474_s9 }
  0x5b   :  { %p5642_p0 = pnand %p5640_p13, %p5637_p12 }
  0x5d   :  { %5645 = shalt.err (!%p5642_p0)
}
  0x5e   :  { %s5646_s16 = scalar_lea.vmem %s95_s28, 8192  ;;  %p5651_p2 = scmp.lt.s32.totalorder %s95_s28, %s95_s28 }
  0x5f   :  { %p5647_p1 = scmp.ne.s32.totalorder %s95_s28, %s5646_s16  ;;  %p5652_p3 = scmp.lt.s32.totalorder %s5646_s16, %s5646_s16 }
  0x61   :  { %p5653_p4 = por %p5652_p3, %p5651_p2 }
  0x63   :  { %p5654_p5 = pnand %p5653_p4, %p5647_p1 }
  0x65   :  { %5657 = shalt.err (!%p5654_p5)
}
  0x66   :  { %100 = dma.hbm_to_vmem [thread:$0]  %s6474_s9, 8192, %s95_s28, [#allocation12], %s5694_s1, %s5694_s1, %s5695_s18  }
  0x67   :  { %5680 = dma.done.wait [#allocation3], 512  }
  0x68   :  { %5681 = vsyncadd [#allocation3], 4294966784 }
  0x69   :  { %5682 = dma.done.wait [#allocation6], 8064  }
  0x6a   :  { %5683 = vsyncadd [#allocation6], 4294959232 }
  0x6b   :  { %5684 = dma.done.wait [#allocation9], 32768  }
  0x6c   :  { %5685 = vsyncadd [#allocation9], 4294934528 }
  0x6d   :  { %5686 = dma.done.wait [#allocation12], 8192  }
  0x6e   :  { %5687 = vsyncadd [#allocation12], 4294959104  ;;  %v126_v0 = vlaneseq  ;;  %v4949_v4 = vld [vmem:[#allocation5] sm:$0xff]   ;;  %v4950_v6 = vld [vmem:[#allocation5 + $0x8] sm:$0xff]   ;;  %vm207_vm1 = vcmask 1040384   ;;  %vm295_vm2 = vcmask 654336  }
  0x6f   :  { %4883 = vmatprep.subr.bf16.mxu0 %v4949_v4  ;;  %v4951_v9 = vld [vmem:[#allocation5 + $0x10] sm:$0xff]   ;;  %v4954_v10 = vld [vmem:[#allocation5 + $0x28] sm:$0xff]   ;;  %v122_v11 = vld [vmem:[#allocation2] sm:$0xff]  ;;  %v6478_v14 = vmov 0.0   ;;  %vm224_vm5 = vcmask 1046528   ;;  %vm625_vm9 = vcmask 1041408  }
  0x70   :  { %v5853_v1 = vshrl.u32 %v126_v0, 7  ;;  %4884 = vmatpush3.bf16.msra.mxu0 %v4949_v4  ;;  %v123_v12 = vld [vmem:[#allocation2 + $0x8] sm:$0xff]  ;;  %4869 = vmatprep.subr.bf16.mxu1 %v4954_v10  ;;  %v208_v16 = vrot.slane %v122_v11, 7  ;;  %v4952_v19 = vld [vmem:[#allocation5 + $0x18] sm:$0xff]   ;;  %v4956_v24 = vld [vmem:[#allocation5 + $0x30] sm:$0xff]   ;;  %v225_v34 = vrot.slane %v122_v11, 1 }
  0x71   :  { %4885 = vmatprep.subr.bf16.mxu0 %v4950_v6  ;;  %v209_v17 = vrot.slane %v123_v12, 7  ;;  %4870 = vmatpush3.bf16.msra.mxu1 %v4954_v10  ;;  %v253_v20 = vpack.c.bf16 %v123_v12, %v122_v11  ;;  %v226_v23 = vrot.slane %v123_v12, 1  ;;  %v5872_v25 = vld [vmem:[#allocation2 + $0x10] sm:$0xff]  ;;  %v125_v26 = vld [vmem:[#allocation2 + $0x18] sm:$0xff]  ;;  %v4953_v28 = vld [vmem:[#allocation5 + $0x20] sm:$0xff]   ;;  %vm848_vm11 = vcmask 1041409  }
  0x72   :  { %v129_v2 = vadd.s32 16, %v5853_v1  ;;  %v5857_v3 = vadd.s32 8, %v5853_v1  ;;  %v135_v5 = vand.u32 15, %v5853_v1  ;;  %v219_v22 = vsel %vm207_vm1, 0.0, %v208_v16  ;;  %4871 = vmatprep.subr.bf16.mxu1 %v4956_v24  ;;  %v4958_v37 = vld [vmem:[#allocation5 + $0x38] sm:$0xff]   ;;  %v4960_v40 = vld [vmem:[#allocation5 + $0x40] sm:$0xff]  }
  0x73   :  { %v210_v21 = vsel %vm207_vm1, %v208_v16, %v209_v17  ;;  %v211_v30 = vrot.slane %v5872_v25, 7  ;;  %4879 = vmatprep.mubr.msk.bf16.mxu1 %vm295_vm2, %v253_v20  ;;  %v213_v32 = vrot.slane %v125_v26, 7  ;;  %v228_v33 = vrot.slane %v5872_v25, 1  ;;  %v4955_v43 = vld [vmem:[#allocation5 + $0x50] sm:$0xff]   ;;  %v4962_v45 = vld [vmem:[#allocation5 + $0x48] sm:$0xff]   ;;  %v4957_v47 = vld [vmem:[#allocation5 + $0x58] sm:$0xff]  }
  0x74   :  { %v149_v7 = vand.u32 15, %v129_v2  ;;  %v142_v8 = vand.u32 15, %v5857_v3  ;;  %vm179_vm0 = vcmp.ne.s32.totalorder %v135_v5, 0  ;;  %4886 = vmatpush3.bf16.msra.mxu0 %v4950_v6  ;;  %v227_v44 = vsel %vm224_vm5, %v225_v34, %v226_v23  ;;  %v4959_v50 = vld [vmem:[#allocation5 + $0x60] sm:$0xff]   ;;  %v4961_v53 = vld [vmem:[#allocation5 + $0x68] sm:$0xff]   ;;  %v4963_v55 = vld [vmem:[#allocation5 + $0x70] sm:$0xff]  }
  0x75   :  { %v4444_v15 = vsel %vm179_vm0, 1.0, %v6478_v14  ;;  %4887 = vmatprep.subr.bf16.mxu0 %v4951_v9  ;;  %v212_v36 = vsel %vm207_vm1, %v209_v17, %v211_v30  ;;  %4872 = vmatpush3.bf16.msra.mxu1 %v4956_v24  ;;  %v229_v38 = vsel %vm224_vm5, %v226_v23, %v228_v33  ;;  %v214_v41 = vsel %vm207_vm1, %v211_v30, %v213_v32  ;;  %v4966_v61 = vld [vmem:[#allocation7 + $0x4] ss:$8 sps:$4 sm:$0xff]   ;;  %v4964_v62 = vld [vmem:[#allocation7] ss:$8 sps:$4 sm:$0xff]  }
  0x76   :  { %vm5861_vm3 = vcmp.ne.s32.totalorder %v149_v7, 0  ;;  %vm5866_vm4 = vcmp.ne.s32.totalorder %v142_v8, 15  ;;  %v220_v29 = vmul.f32 %v4444_v15, %v219_v22  ;;  %4873 = vmatprep.subr.bf16.mxu1 %v4958_v37  ;;  %v130_v49 = vadd.s32 24, %v5853_v1  ;;  %v4969_v63 = vld [vmem:[#allocation7 + $0x84] ss:$8 sps:$4 sm:$0xff]  }
  0x77   :  { %v4445_v27 = vsel %vm5861_vm3, 1.0, %v6478_v14  ;;  %v4446_v31 = vsel %vm5866_vm4, 1.0, %v6478_v14  ;;  %v254_v51 = vpack.c.bf16 %v125_v26, %v5872_v25  ;;  %v230_v54 = vrot.slane %v125_v26, 1  ;;  %v4967_v0 = vld [vmem:[#allocation7 + $0x80] ss:$8 sps:$4 sm:$0xff]  }
  0x78   :  { %4888 = vmatpush3.bf16.msra.mxu0 %v4951_v9  ;;  %v241_v35 = vpack.c.bf16 %v210_v21, %v220_v29  ;;  %v222_v39 = vmul.f32 %v4445_v27, %v212_v36  ;;  %v238_v42 = vmul.f32 %v4446_v31, %v229_v38  ;;  %v156_v52 = vand.u32 15, %v130_v49  ;;  %v4972_v2 = vld [vmem:[#allocation7 + $0x14] ss:$8 sps:$4 sm:$0xff]   ;;  %v4970_v4 = vld [vmem:[#allocation7 + $0x10] ss:$8 sps:$4 sm:$0xff]  }
  0x79   :  { %4889 = vmatprep.subr.bf16.mxu0 %v4952_v19  ;;  %4874 = vmatpush3.bf16.msra.mxu1 %v4958_v37  ;;  %v236_v57 = vsel %vm224_vm5, %v230_v54, 0.0  ;;  %v231_v59 = vsel %vm224_vm5, %v228_v33, %v230_v54  ;;  %v4975_v5 = vld [vmem:[#allocation7 + $0x94] ss:$8 sps:$4 sm:$0xff]   ;;  %v4973_v6 = vld [vmem:[#allocation7 + $0x90] ss:$8 sps:$4 sm:$0xff]   ;;  %v6477_v33 = vmov 0  }
  0x7a   :  { %4893 = vmatprep.mubr.msk.bf16.mxu0 %vm295_vm2, %v241_v35  ;;  %4875 = vmatprep.subr.bf16.mxu1 %v4960_v40  ;;  %v242_v46 = vpack.c.bf16 %v214_v41, %v222_v39  ;;  %v436_v48 = vpack.c.bf16 %v238_v42, %v227_v44  ;;  %vm194_vm6 = vcmp.ne.s32.totalorder %v156_v52, 15  ;;  %v4978_v7 = vld [vmem:[#allocation7 + $0x24] ss:$8 sps:$4 sm:$0xff]   ;;  %v4976_v8 = vld [vmem:[#allocation7 + $0x20] ss:$8 sps:$4 sm:$0xff]   ;;  %v781_v41 = vand.u32 7, %v5853_v1 }
  0x7b   :  { %v4447_v56 = vsel %vm194_vm6, 1.0, %v6478_v14  ;;  %v4981_v9 = vld [vmem:[#allocation7 + $0xa4] ss:$8 sps:$4 sm:$0xff]   ;;  %v4979_v10 = vld [vmem:[#allocation7 + $0xa0] ss:$8 sps:$4 sm:$0xff]   ;;  %vm830_vm12 = vcmask 1042434  }
  0x7c   :  { %4890 = vmatpush3.bf16.msra.mxu0 %v4952_v19  ;;  %v240_v58 = vmul.f32 %v4447_v56, %v236_v57  ;;  %v4984_v11 = vld [vmem:[#allocation7 + $0x34] ss:$8 sps:$4 sm:$0xff]   ;;  %v4982_v12 = vld [vmem:[#allocation7 + $0x30] ss:$8 sps:$4 sm:$0xff]   ;;  %v4990_v16 = vld [vmem:[#allocation7 + $0x44] ss:$8 sps:$4 sm:$0xff]  }
  0x7d   :  { %4891 = vmatprep.subr.bf16.mxu0 %v4953_v28  ;;  %4876 = vmatpush3.bf16.msra.mxu1 %v4960_v40  ;;  %v4987_v13 = vld [vmem:[#allocation7 + $0xb4] ss:$8 sps:$4 sm:$0xff]   ;;  %v4985_v15 = vld [vmem:[#allocation7 + $0xb0] ss:$8 sps:$4 sm:$0xff]   ;;  %v4988_v17 = vld [vmem:[#allocation7 + $0x40] ss:$8 sps:$4 sm:$0xff]  }
  0x7e   :  { %4877 = vmatprep.subr.bf16.mxu1 %v4962_v45  ;;  %v437_v60 = vpack.c.bf16 %v240_v58, %v231_v59  ;;  %v4993_v18 = vld [vmem:[#allocation7 + $0xc4] ss:$8 sps:$4 sm:$0xff]   ;;  %v4991_v19 = vld [vmem:[#allocation7 + $0xc0] ss:$8 sps:$4 sm:$0xff]   ;;  %v4996_v20 = vld [vmem:[#allocation7 + $0x54] ss:$8 sps:$4 sm:$0xff]  }
  0x7f   :  { %v4994_v21 = vld [vmem:[#allocation7 + $0x50] ss:$8 sps:$4 sm:$0xff]   ;;  %v4999_v22 = vld [vmem:[#allocation7 + $0xd4] ss:$8 sps:$4 sm:$0xff]   ;;  %v5000_v24 = vld [vmem:[#allocation7 + $0x60] ss:$8 sps:$4 sm:$0xff]  }
  0x80   :  { %4892 = vmatpush3.bf16.msra.mxu0 %v4953_v28  ;;  %v4997_v23 = vld [vmem:[#allocation7 + $0xd0] ss:$8 sps:$4 sm:$0xff]   ;;  %v5002_v25 = vld [vmem:[#allocation7 + $0x64] ss:$8 sps:$4 sm:$0xff]   ;;  %v5003_v26 = vld [vmem:[#allocation7 + $0xe0] ss:$8 sps:$4 sm:$0xff]  }
  0x81   :  { %4897 = vmatprep.subr.bf16.mxu0 %v4955_v43  ;;  %4878 = vmatpush3.bf16.msra.mxu1 %v4962_v45  ;;  %v5005_v27 = vld [vmem:[#allocation7 + $0xe4] ss:$8 sps:$4 sm:$0xff]   ;;  %v5008_v28 = vld [vmem:[#allocation7 + $0x74] ss:$8 sps:$4 sm:$0xff]   ;;  %v5006_v30 = vld [vmem:[#allocation7 + $0x70] ss:$8 sps:$4 sm:$0xff]  }
  0x82   :  { %1213 = vmatprep.subr.bf16.mxu1 %v4966_v61  ;;  %v5011_v29 = vld [vmem:[#allocation7 + $0xf4] ss:$8 sps:$4 sm:$0xff]   ;;  %v5009_v31 = vld [vmem:[#allocation7 + $0xf0] ss:$8 sps:$4 sm:$0xff]   ;;  %v5014_v32 = vld [vmem:[#allocation7 + $0x104] ss:$8 sps:$4 sm:$0xff]  }
  0x83   :  { %4894 = vmatmul.mubr.msk.bf16.vlgmr.msra.gmra.mrb[0].mxu0 %vm295_vm2, %v242_v46  ;;  %v5704_v38 = vmov 1983009808   ;;  %vm801_vm7 = vcmp.ne.s32.totalorder %v781_v41, 0  ;;  %vm807_vm10 = vcmp.ne.s32.totalorder %v781_v41, 7  ;;  %vm833_vm13 = vcmask 1043459  }
  0x84   :  { %4898 = vmatpush3.bf16.msra.mxu0 %v4955_v43  ;;  %4907 = vmatprep.mubr.msk.bf16.mxu0 %vm295_vm2, %v436_v48  ;;  %v543_v39 = vunpack.c.l.s4 %v5704_v38  ;;  %v788_v43 = vand.u32 7, %v5857_v3  ;;  %v5921_v61 = vsel %vm807_vm10, 1.0, %v6478_v14  ;;  %v5934_v38 = vld [vmem:[%s6467_s2] ss:$0 sm:$0xff]  ;;  %vm836_vm14 = vcmask 1044484  }
  0x85   :  { %4899 = vmatprep.subr.bf16.mxu0 %v4957_v47  ;;  %4880 = vmatmul.mubr.msk.bf16.vlgmr.msra.gmra.mrb[0].mxu1 %vm295_vm2, %v254_v51  ;;  %vm839_vm15 = vcmask 1045509   ;;  %vm842_vm0 = vcmask 1046534  }
  0x86   :  { %1214 = vmatpush1.bf16.msra.mxu1 %v4964_v62  ;;  %1245 = vmatprep.mubr.bf16.mxu1 %v6477_v33  ;;  %v544_v40 = vunpack.c.0.s8 %v543_v39  ;;  %vm802_vm8 = vcmp.ne.s32.totalorder %v788_v43, 0  ;;  %vm6077_vm3 = vcmp.ne.s32.totalorder %v788_v43, 7 }
  0x87   :  { %1215 = vmatprep.subr.bf16.mxu1 %v4972_v2  ;;  %v5916_v57 = vsel %vm802_vm8, 1.0, %v6478_v14 }
  0x88   :  { %4900 = vmatpush3.bf16.msra.mxu0 %v4957_v47  ;;  %v5901_v42 = vsub.s32 %v544_v40, %v5853_v1 }
  0x89   :  { %4901 = vmatprep.subr.bf16.mxu0 %v4959_v50 }
  0x8a   :  { %1216 = vmatpush1.bf16.msra.mxu1 %v4970_v4 }
  0x8b   :  { %1217 = vmatprep.subr.bf16.mxu1 %v4978_v7 }
  0x8c   :  { %4902 = vmatpush3.bf16.msra.mxu0 %v4959_v50 }
  0x8d   :  { %4903 = vmatprep.subr.bf16.mxu0 %v4961_v53 }
  0x8e   :  { %1218 = vmatpush1.bf16.msra.mxu1 %v4976_v8 }
  0x8f   :  { %1219 = vmatprep.subr.bf16.mxu1 %v4984_v11 }
  0x90   :  { %4904 = vmatpush3.bf16.msra.mxu0 %v4961_v53  ;;  %v5910_v53 = vsel %vm801_vm7, 1.0, %v6478_v14 }
  0x91   :  { %4905 = vmatprep.subr.bf16.mxu0 %v4963_v55 }
  0x92   :  { %1220 = vmatpush1.bf16.msra.mxu1 %v4982_v12 }
  0x93   :  { %1221 = vmatprep.subr.bf16.mxu1 %v4990_v16 }
  0x94   :  { %4906 = vmatpush3.bf16.msra.mxu0 %v4963_v55 }
  0x95   :  { %1090 = vmatprep.subr.bf16.mxu0 %v4969_v63 }
  0x96   :  { %1222 = vmatpush1.bf16.msra.mxu1 %v4988_v17 }
  0x97   :  { %4908 = vmatmul.mubr.msk.bf16.vlgmr.msra.gmra.mrb[0].mxu0 %vm295_vm2, %v437_v60  ;;  %1223 = vmatprep.subr.bf16.mxu1 %v4996_v20  ;;  %vm845_vm2 = vcmask 1047559  }
  0x98   :  { %1091 = vmatpush1.bf16.msra.mxu0 %v4967_v0  ;;  %1122 = vmatprep.mubr.bf16.mxu0 %v6477_v33 }
  0x99   :  { %1092 = vmatprep.subr.bf16.mxu0 %v4975_v5 }
  0x9a   :  { %1224 = vmatpush1.bf16.msra.mxu1 %v4994_v21 }
  0x9b   :  { %1225 = vmatprep.subr.bf16.mxu1 %v5002_v25 }
  0x9c   :  { %1093 = vmatpush1.bf16.msra.mxu0 %v4973_v6 }
  0x9d   :  { %1094 = vmatprep.subr.bf16.mxu0 %v4981_v9 }
  0x9e   :  { %1226 = vmatpush1.bf16.msra.mxu1 %v5000_v24 }
  0x9f   :  { %1227 = vmatprep.subr.bf16.mxu1 %v5008_v28 }
  0xa0   :  { %1095 = vmatpush1.bf16.msra.mxu0 %v4979_v10 }
  0xa1   :  { %1096 = vmatprep.subr.bf16.mxu0 %v4987_v13 }
  0xa2   :  { %1228 = vmatpush1.bf16.msra.mxu1 %v5006_v30 }
  0xa3   :  { %1353 = vmatprep.subr.bf16.mxu1 %v5014_v32 }
  0xa4   :  { %1097 = vmatpush1.bf16.msra.mxu0 %v4985_v15 }
  0xa5   :  { %1098 = vmatprep.subr.bf16.mxu0 %v4993_v18 }
  0xa8   :  { %1099 = vmatpush1.bf16.msra.mxu0 %v4991_v19 }
  0xa9   :  { %1100 = vmatprep.subr.bf16.mxu0 %v4999_v22 }
  0xac   :  { %1101 = vmatpush1.bf16.msra.mxu0 %v4997_v23 }
  0xad   :  { %1102 = vmatprep.subr.bf16.mxu0 %v5005_v27 }
  0xb0   :  { %1103 = vmatpush1.bf16.msra.mxu0 %v5003_v26 }
  0xb1   :  { %1104 = vmatprep.subr.bf16.mxu0 %v5011_v29 }
  0xb4   :  { %1105 = vmatpush1.bf16.msra.mxu0 %v5009_v31 }
 0x158   :  { %v4881_v34 = vpop.f32.mrb[0].mxu1 }
 0x159   :  { %v336_v35 = vpop.f32.mrb[1].mxu1 }
 0x15a   :  { %v4882_v36 = vpop.f32.mrb[2].mxu1 }
 0x15b   :  { %v339_v37 = vpop.f32.mrb[3].mxu1 }
 0x16a   :  { %v4909_v44 = vpop.f32.mrb[0].mxu0 }
 0x16b   :  { %v4911_v45 = vadd.f32 %v4909_v44, %v4881_v34  ;;  %v518_v46 = vpop.f32.mrb[1].mxu0 }
 0x16c   :  { %v4912_v47 = vadd.f32 %v518_v46, %v336_v35  ;;  %v4910_v48 = vpop.f32.mrb[2].mxu0 }
 0x16d   :  { %v575_v49 = vcombine.high %v4911_v45, %v4911_v45  ;;  %v582_v50 = vrot.slane %v4911_v45, %v5901_v42  ;;  %v5907_v51 = vadd.f32 %v4910_v48, %v4882_v36  ;;  %v521_v52 = vpop.f32.mrb[3].mxu0 }
 0x16e   :  { %v541_v54 = vcombine.high %v4912_v47, %v4912_v47  ;;  %v548_v55 = vrot.slane %v4912_v47, %v5901_v42  ;;  %v5913_v56 = vadd.f32 %v521_v52, %v339_v37 }
 0x16f   :  { %v589_v58 = vrot.slane %v575_v49, %v5901_v42  ;;  %v590_v59 = vcombine.high %v582_v50, %v582_v50  ;;  %v682_v60 = vsel %vm625_vm9, %v582_v50, -inf }
 0x170   :  { %v683_v62 = vrot.slane %v682_v60, 4  ;;  %v555_v63 = vrot.slane %v541_v54, %v5901_v42  ;;  %v556_v0 = vcombine.high %v548_v55, %v548_v55  ;;  %v626_v2 = vsel %vm625_vm9, %v548_v55, -inf }
 0x171   :  { %v591_v4 = vcombine.high %v589_v58, %v589_v58  ;;  %v689_v5 = vsel %vm625_vm9, %v590_v59, -inf  ;;  %v696_v6 = vsel %vm625_vm9, %v589_v58, -inf  ;;  %v627_v7 = vrot.slane %v626_v2, 4 }
 0x172   :  { %v684_v8 = vmax.f32 %v682_v60, %v683_v62  ;;  %v690_v9 = vrot.slane %v689_v5, 4  ;;  %v697_v10 = vrot.slane %v696_v6, 4  ;;  %v557_v11 = vcombine.high %v555_v63, %v555_v63 }
 0x173   :  { %v703_v12 = vsel %vm625_vm9, %v591_v4, -inf  ;;  %v628_v13 = vmax.f32 %v626_v2, %v627_v7  ;;  %v633_v15 = vsel %vm625_vm9, %v556_v0, -inf  ;;  %v640_v16 = vsel %vm625_vm9, %v555_v63, -inf }
 0x174   :  { %v685_v17 = vrot.slane %v684_v8, 2  ;;  %v691_v18 = vmax.f32 %v689_v5, %v690_v9  ;;  %v698_v19 = vmax.f32 %v696_v6, %v697_v10  ;;  %v704_v20 = vrot.slane %v703_v12, 4 }
 0x175   :  { %v629_v21 = vrot.slane %v628_v13, 2  ;;  %v634_v22 = vrot.slane %v633_v15, 4  ;;  %v641_v23 = vrot.slane %v640_v16, 4  ;;  %v647_v24 = vsel %vm625_vm9, %v557_v11, -inf }
 0x176   :  { %v686_v25 = vmax.f32 %v684_v8, %v685_v17  ;;  %v692_v26 = vrot.slane %v691_v18, 2  ;;  %v699_v27 = vrot.slane %v698_v19, 2  ;;  %v705_v28 = vmax.f32 %v703_v12, %v704_v20 }
 0x177   :  { %v630_v29 = vmax.f32 %v628_v13, %v629_v21  ;;  %v635_v30 = vmax.f32 %v633_v15, %v634_v22  ;;  %v642_v31 = vmax.f32 %v640_v16, %v641_v23  ;;  %v648_v32 = vrot.slane %v647_v24, 4 }
 0x178   :  { %v687_v34 = vrot.slane %v686_v25, 1  ;;  %v693_v35 = vmax.f32 %v691_v18, %v692_v26  ;;  %v700_v36 = vmax.f32 %v698_v19, %v699_v27  ;;  %v706_v37 = vrot.slane %v705_v28, 2 }
 0x179   :  { %v631_v39 = vrot.slane %v630_v29, 1  ;;  %v636_v40 = vrot.slane %v635_v30, 2  ;;  %v643_v41 = vrot.slane %v642_v31, 2  ;;  %v649_v44 = vmax.f32 %v647_v24, %v648_v32 }
 0x17a   :  { %v688_v45 = vmax.f32 %v686_v25, %v687_v34  ;;  %v694_v46 = vrot.slane %v693_v35, 1  ;;  %v701_v47 = vrot.slane %v700_v36, 1  ;;  %v707_v48 = vmax.f32 %v705_v28, %v706_v37 }
 0x17b   :  { %v632_v49 = vmax.f32 %v630_v29, %v631_v39  ;;  %v637_v50 = vmax.f32 %v635_v30, %v636_v40  ;;  %v644_v52 = vmax.f32 %v642_v31, %v643_v41  ;;  %v650_v54 = vrot.slane %v649_v44, 2 }
 0x17c   :  { %v695_v55 = vmax.f32 %v693_v35, %v694_v46  ;;  %v702_v58 = vmax.f32 %v700_v36, %v701_v47  ;;  %v708_v59 = vrot.slane %v707_v48, 1  ;;  %v753_v60 = vadd.f32 %v5934_v38, %v688_v45 }
 0x17d   :  { %v638_v62 = vrot.slane %v637_v50, 1  ;;  %v645_v63 = vrot.slane %v644_v52, 1  ;;  %v651_v0 = vmax.f32 %v649_v44, %v650_v54  ;;  %v745_v2 = vadd.f32 %v5934_v38, %v632_v49 }
 0x17e   :  { %v709_v4 = vmax.f32 %v707_v48, %v708_v59  ;;  %v754_v5 = vadd.f32 %v5934_v38, %v695_v55  ;;  %v755_v6 = vadd.f32 %v5934_v38, %v702_v58  ;;  %v5940_v7 = vmax.f32 %v753_v60, 0.0 }
 0x17f   :  { %v639_v8 = vmax.f32 %v637_v50, %v638_v62  ;;  %v646_v9 = vmax.f32 %v644_v52, %v645_v63  ;;  %v652_v10 = vrot.slane %v651_v0, 1  ;;  %v592_v11 = vcombine.high %v5907_v51, %v5907_v51 }
 0x180   :  { %v756_v12 = vadd.f32 %v5934_v38, %v709_v4  ;;  %v5945_v13 = vmax.f32 %v754_v5, 0.0  ;;  %v5947_v15 = vmax.f32 %v755_v6, 0.0  ;;  %v761_v16 = vmax.f32 %v745_v2, 0.0 }
 0x181   :  { %v924_v17 = vpack.c.bf16 %v5940_v7, %v5940_v7  ;;  %v653_v18 = vmax.f32 %v651_v0, %v652_v10  ;;  %v746_v19 = vadd.f32 %v5934_v38, %v639_v8  ;;  %v747_v20 = vadd.f32 %v5934_v38, %v646_v9 }
 0x182   :  { %v5953_v21 = vmax.f32 %v756_v12, 0.0  ;;  %v847_v22 = vrot.slane %v5940_v7, 7  ;;  %v882_v24 = vrot.slane %v5947_v15, 7  ;;  %v925_v26 = vpack.c.bf16 %v5945_v13, %v5945_v13 }
 0x183   :  { %v926_v27 = vpack.c.bf16 %v5947_v15, %v5947_v15  ;;  %v748_v28 = vadd.f32 %v5934_v38, %v653_v18  ;;  %v972_v32 = vunpack.c.l.b16 %v924_v17  ;;  %v762_v36 = vmax.f32 %v746_v19, 0.0 }
 0x184   :  { %v5967_v30 = vsel %vm848_vm11, %v882_v24, %v5945_v13  ;;  %v927_v31 = vpack.c.bf16 %v5953_v21, %v5953_v21  ;;  %v973_v34 = vunpack.c.l.b16 %v925_v26  ;;  %v5973_v37 = vmax.f32 %v747_v20, 0.0 }
 0x185   :  { %v5971_v35 = vunpack.c.l.b16 %v926_v27  ;;  %v5978_v41 = vmax.f32 %v748_v28, 0.0  ;;  %v828_v44 = vrot.slane %v761_v16, 7  ;;  %v829_v47 = vrot.slane %v762_v36, 6 }
 0x186   :  { %v5976_v40 = vunpack.c.l.b16 %v927_v31  ;;  %v994_v45 = vrot.slane %v973_v34, 7  ;;  %v916_v48 = vpack.c.bf16 %v761_v16, %v761_v16  ;;  %v832_v50 = vrot.slane %v5973_v37, 5 }
 0x187   :  { %v996_v46 = vrot.slane %v5971_v35, 6  ;;  %v835_v52 = vrot.slane %v5978_v41, 4  ;;  %v868_v54 = vrot.slane %v5973_v37, 7  ;;  %v870_v58 = vrot.slane %v5978_v41, 6 }
 0x188   :  { %v998_v49 = vrot.slane %v5976_v40, 5  ;;  %v5986_v55 = vsel %vm848_vm11, %v994_v45, %v972_v32  ;;  %v917_v59 = vpack.c.bf16 %v762_v36, %v762_v36  ;;  %v918_v60 = vpack.c.bf16 %v5973_v37, %v5973_v37 }
 0x189   :  { %v5992_v62 = vsel %vm830_vm12, %v829_v47, %v828_v44  ;;  %v869_v63 = vsel %vm848_vm11, %v868_v54, %v762_v36  ;;  %v919_v0 = vpack.c.bf16 %v5978_v41, %v5978_v41  ;;  %v599_v2 = vrot.slane %v5907_v51, %v5901_v42 }
 0x18a   :  { %v5999_v4 = vunpack.c.l.b16 %v916_v48  ;;  %v6001_v5 = vunpack.c.l.b16 %v917_v59  ;;  %v6003_v6 = vunpack.c.l.b16 %v918_v60  ;;  %v606_v8 = vrot.slane %v592_v11, %v5901_v42 }
 0x18b   :  { %v6006_v9 = vunpack.c.l.b16 %v919_v0  ;;  %v607_v10 = vcombine.high %v599_v2, %v599_v2  ;;  %v710_v12 = vsel %vm625_vm9, %v599_v2, -inf  ;;  %v558_v16 = vcombine.high %v5913_v56, %v5913_v56 }
 0x18c   :  { %v6012_v17 = vsel %vm830_vm12, %v870_v58, %v869_v63  ;;  %v980_v51 = vrot.slane %v6001_v5, 7  ;;  %v608_v18 = vcombine.high %v606_v8, %v606_v8  ;;  %v711_v19 = vrot.slane %v710_v12, 4 }
 0x18d   :  { %v982_v20 = vrot.slane %v6003_v6, 6  ;;  %v717_v24 = vsel %vm625_vm9, %v607_v10, -inf  ;;  %v724_v11 = vsel %vm625_vm9, %v606_v8, -inf  ;;  %v565_v26 = vrot.slane %v5913_v56, %v5901_v42 }
 0x18e   :  { %v984_v27 = vrot.slane %v6006_v9, 5  ;;  %v712_v28 = vmax.f32 %v710_v12, %v711_v19  ;;  %v718_v31 = vrot.slane %v717_v24, 4  ;;  %v725_v32 = vrot.slane %v724_v11, 4 }
 0x18f   :  { %v731_v34 = vsel %vm625_vm9, %v608_v18, -inf  ;;  %v572_v36 = vrot.slane %v558_v16, %v5901_v42  ;;  %v573_v44 = vcombine.high %v565_v26, %v565_v26  ;;  %v654_v45 = vsel %vm625_vm9, %v565_v26, -inf }
 0x190   :  { %v713_v47 = vrot.slane %v712_v28, 2  ;;  %v719_v48 = vmax.f32 %v717_v24, %v718_v31  ;;  %v726_v54 = vmax.f32 %v724_v11, %v725_v32  ;;  %v732_v58 = vrot.slane %v731_v34, 4 }
 0x191   :  { %v574_v59 = vcombine.high %v572_v36, %v572_v36  ;;  %v655_v60 = vrot.slane %v654_v45, 4  ;;  %v661_v56 = vsel %vm625_vm9, %v573_v44, -inf  ;;  %v668_v63 = vsel %vm625_vm9, %v572_v36, -inf }
 0x192   :  { %v714_v0 = vmax.f32 %v712_v28, %v713_v47  ;;  %v720_v2 = vrot.slane %v719_v48, 2  ;;  %v727_v8 = vrot.slane %v726_v54, 2  ;;  %v733_v10 = vmax.f32 %v731_v34, %v732_v58 }
 0x193   :  { %v656_v12 = vmax.f32 %v654_v45, %v655_v60  ;;  %v662_v18 = vrot.slane %v661_v56, 4  ;;  %v669_v16 = vrot.slane %v668_v63, 4  ;;  %v675_v19 = vsel %vm625_vm9, %v574_v59, -inf }
 0x194   :  { %v715_v26 = vrot.slane %v714_v0, 1  ;;  %v721_v33 = vmax.f32 %v719_v48, %v720_v2  ;;  %v728_v24 = vmax.f32 %v726_v54, %v727_v8  ;;  %v734_v11 = vrot.slane %v733_v10, 2 }
 0x195   :  { %v657_v31 = vrot.slane %v656_v12, 2  ;;  %v663_v32 = vmax.f32 %v661_v56, %v662_v18  ;;  %v670_v14 = vmax.f32 %v668_v63, %v669_v16  ;;  %v676_v39 = vrot.slane %v675_v19, 4 }
 0x196   :  { %v716_v44 = vmax.f32 %v714_v0, %v715_v26  ;;  %v722_v29 = vrot.slane %v721_v33, 1  ;;  %v729_v36 = vrot.slane %v728_v24, 1  ;;  %v735_v28 = vmax.f32 %v733_v10, %v734_v11 }
 0x197   :  { %v658_v47 = vmax.f32 %v656_v12, %v657_v31  ;;  %v664_v25 = vrot.slane %v663_v32, 2  ;;  %v671_v34 = vrot.slane %v670_v14, 2  ;;  %v677_v45 = vmax.f32 %v675_v19, %v676_v39 }
 0x198   :  { %v723_v58 = vmax.f32 %v721_v33, %v722_v29  ;;  %v730_v60 = vmax.f32 %v728_v24, %v729_v36  ;;  %v736_v23 = vrot.slane %v735_v28, 1  ;;  %v757_v59 = vadd.f32 %v5934_v38, %v716_v44 }
 0x199   :  { %v659_v48 = vrot.slane %v658_v47, 1  ;;  %v665_v54 = vmax.f32 %v663_v32, %v664_v25  ;;  %v672_v2 = vmax.f32 %v670_v14, %v671_v34  ;;  %v678_v8 = vrot.slane %v677_v45, 2 }
 0x19a   :  { %v737_v56 = vmax.f32 %v735_v28, %v736_v23  ;;  %v758_v63 = vadd.f32 %v5934_v38, %v723_v58  ;;  %v759_v0 = vadd.f32 %v5934_v38, %v730_v60  ;;  %v6030_v18 = vmax.f32 %v757_v59, 0.0 }
 0x19b   :  { %v660_v10 = vmax.f32 %v658_v47, %v659_v48  ;;  %v666_v12 = vrot.slane %v665_v54, 1  ;;  %v673_v16 = vrot.slane %v672_v2, 1  ;;  %v679_v39 = vmax.f32 %v677_v45, %v678_v8 }
 0x19c   :  { %v981_v33 = vsel %vm848_vm11, %v980_v51, %v5999_v4  ;;  %v760_v25 = vadd.f32 %v5934_v38, %v737_v56  ;;  %v6037_v14 = vmax.f32 %v758_v63, 0.0  ;;  %v6039_v23 = vmax.f32 %v759_v0, 0.0 }
 0x19d   :  { %v856_v29 = vrot.slane %v6030_v18, 3  ;;  %v928_v19 = vpack.c.bf16 %v6030_v18, %v6030_v18  ;;  %v667_v26 = vmax.f32 %v665_v54, %v666_v12  ;;  %v674_v24 = vmax.f32 %v672_v2, %v673_v16 }
 0x19e   :  { %v886_v11 = vrot.slane %v6030_v18, 5  ;;  %v680_v31 = vrot.slane %v679_v39, 1  ;;  %v749_v5 = vadd.f32 %v5934_v38, %v660_v10  ;;  %v6046_v4 = vmax.f32 %v760_v25, 0.0 }
 0x19f   :  { %v976_v51 = vunpack.c.l.b16 %v928_v19  ;;  %v750_v32 = vadd.f32 %v5934_v38, %v667_v26  ;;  %v751_v44 = vadd.f32 %v5934_v38, %v674_v24  ;;  %v929_v36 = vpack.c.bf16 %v6037_v14, %v6037_v14 }
 0x1a0   :  { %v681_v28 = vmax.f32 %v679_v39, %v680_v31  ;;  %v765_v47 = vmax.f32 %v749_v5, 0.0  ;;  %v930_v34 = vpack.c.bf16 %v6039_v23, %v6039_v23  ;;  %v931_v45 = vpack.c.bf16 %v6046_v4, %v6046_v4 }
 0x1a1   :  { %v1000_v58 = vrot.slane %v976_v51, 4  ;;  %v766_v60 = vmax.f32 %v750_v32, 0.0  ;;  %v767_v59 = vmax.f32 %v751_v44, 0.0  ;;  %v977_v48 = vunpack.c.l.b16 %v929_v36 }
 0x1a2   :  { %v752_v54 = vadd.f32 %v5934_v38, %v681_v28  ;;  %v838_v2 = vrot.slane %v765_v47, 3  ;;  %v872_v8 = vrot.slane %v765_v47, 5  ;;  %v920_v56 = vpack.c.bf16 %v765_v47, %v765_v47 }
 0x1a3   :  { %v874_v63 = vrot.slane %v766_v60, 4  ;;  %v876_v0 = vrot.slane %v767_v59, 3  ;;  %v921_v10 = vpack.c.bf16 %v766_v60, %v766_v60  ;;  %v922_v12 = vpack.c.bf16 %v767_v59, %v767_v59 }
 0x1a4   :  { %v768_v16 = vmax.f32 %v752_v54, 0.0  ;;  %v968_v39 = vunpack.c.l.b16 %v920_v56  ;;  %v978_v25 = vunpack.c.l.b16 %v930_v34  ;;  %v979_v19 = vunpack.c.l.b16 %v931_v45 }
 0x1a5   :  { %v969_v26 = vunpack.c.l.b16 %v921_v10  ;;  %v970_v24 = vunpack.c.l.b16 %v922_v12  ;;  %v983_v31 = vsel %vm830_vm12, %v982_v20, %v981_v33  ;;  %v997_v38 = vsel %vm830_vm12, %v996_v46, %v5986_v55 }
 0x1a6   :  { %v849_v5 = vsel %vm848_vm11, %v847_v22, %v768_v16  ;;  %v986_v51 = vrot.slane %v968_v39, 4  ;;  %v923_v32 = vpack.c.bf16 %v768_v16, %v768_v16  ;;  %v985_v44 = vsel %vm833_vm13, %v984_v27, %v983_v31  ;;  %v5021_v22 = vld [vmem:[#allocation7 + $0x130] ss:$8 sps:$4 sm:$0xff]  }
 0x1a7   :  { %v988_v36 = vrot.slane %v969_v26, 3  ;;  %v990_v28 = vrot.slane %v970_v24, 2  ;;  %v999_v6 = vsel %vm833_vm13, %v998_v49, %v997_v38  ;;  %v1002_v20 = vrot.slane %v977_v48, 3 }
 0x1a8   :  { %v971_v35 = vunpack.c.l.b16 %v923_v32  ;;  %v987_v46 = vsel %vm836_vm14, %v986_v51, %v985_v44  ;;  %v1001_v55 = vsel %vm836_vm14, %v1000_v58, %v999_v6  ;;  %v1004_v33 = vrot.slane %v978_v25, 2  ;;  %v5012_v44 = vld [vmem:[#allocation7 + $0x100] ss:$8 sps:$4 sm:$0xff]   ;;  %v5017_v6 = vld [vmem:[#allocation7 + $0x114] ss:$8 sps:$4 sm:$0xff]  }
 0x1a9   :  { %v989_v9 = vsel %vm839_vm15, %v988_v36, %v987_v46  ;;  %v1003_v27 = vsel %vm839_vm15, %v1002_v20, %v1001_v55  ;;  %v1006_v40 = vrot.slane %v979_v19, 1  ;;  %v834_v49 = vsel %vm833_vm13, %v832_v50, %v5992_v62  ;;  %v5015_v20 = vld [vmem:[#allocation7 + $0x110] ss:$8 sps:$4 sm:$0xff]   ;;  %v5018_v55 = vld [vmem:[#allocation7 + $0x120] ss:$8 sps:$4 sm:$0xff]  }
 0x1aa   :  { %v991_v47 = vsel %vm842_vm0, %v990_v28, %v989_v9  ;;  %v992_v34 = vrot.slane %v971_v35, 1  ;;  %v1005_v45 = vsel %vm842_vm0, %v1004_v33, %v1003_v27  ;;  %v837_v3 = vsel %vm836_vm14, %v835_v52, %v834_v49  ;;  %v5020_v35 = vld [vmem:[#allocation7 + $0x124] ss:$8 sps:$4 sm:$0xff]   ;;  %v5023_v33 = vld [vmem:[#allocation7 + $0x134] ss:$8 sps:$4 sm:$0xff]  }
 0x1ab   :  { %v1007_v43 = vsel %vm845_vm2, %v1006_v40, %v1005_v45  ;;  %v840_v58 = vsel %vm839_vm15, %v838_v2, %v837_v3  ;;  %v841_v48 = vrot.slane %v766_v60, 2  ;;  %v844_v54 = vrot.slane %v767_v59, 1  ;;  %v5026_v9 = vld [vmem:[#allocation7 + $0x144] ss:$8 sps:$4 sm:$0xff]   ;;  %v5029_v27 = vld [vmem:[#allocation7 + $0x154] ss:$8 sps:$4 sm:$0xff]  }
 0x1ac   :  { %v993_v56 = vsel %vm845_vm2, %v992_v34, %v991_v47  ;;  %v6486_v37 = vrot.slane %v5945_v13, 6  ;;  %v858_v62 = vrot.slane %v6037_v14, 2  ;;  %v860_v10 = vrot.slane %v6039_v23, 1  ;;  %v5027_v40 = vld [vmem:[#allocation7 + $0x150] ss:$8 sps:$4 sm:$0xff]  }
 0x1ad   :  { %v1008_v12 = vpack.c.b16 %v1007_v43, %v993_v56  ;;  %v843_v41 = vsel %vm842_vm0, %v841_v48, %v840_v58  ;;  %v6487_v52 = vrot.slane %v5947_v15, 5  ;;  %v873_v60 = vsel %vm833_vm13, %v872_v8, %v6012_v17  ;;  %v5032_v49 = vld [vmem:[#allocation7 + $0x164] ss:$8 sps:$4 sm:$0xff]   ;;  %v5030_v47 = vld [vmem:[#allocation7 + $0x160] ss:$8 sps:$4 sm:$0xff]  }
 0x1ae   :  { %v851_v50 = vsel %vm830_vm12, %v6486_v37, %v849_v5  ;;  %v846_v59 = vsel %vm845_vm2, %v844_v54, %v843_v41  ;;  %v6488_v13 = vrot.slane %v5953_v21, 4  ;;  %v875_v25 = vsel %vm836_vm14, %v874_v63, %v873_v60  ;;  %v5035_v34 = vld [vmem:[#allocation7 + $0x174] ss:$8 sps:$4 sm:$0xff]   ;;  %v5033_v45 = vld [vmem:[#allocation7 + $0x170] ss:$8 sps:$4 sm:$0xff]  }
 0x1af   :  { %v853_v39 = vsel %vm833_vm13, %v6487_v52, %v851_v50  ;;  %v878_v19 = vrot.slane %v768_v16, 2  ;;  %1123 = vmatmul.mubr.bf16.vlgmr.msra.gmra.mrb[4].mxu0 %v1008_v12  ;;  %v864_v15 = vsel %vm207_vm1, 0.0, %v846_v59  ;;  %v877_v24 = vsel %vm839_vm15, %v876_v0, %v875_v25  ;;  %v5036_v3 = vld [vmem:[#allocation8 + $0x200] ss:$16 sps:$4 sm:$0xff]   ;;  %v5038_v43 = vld [vmem:[#allocation8 + $0x204] ss:$16 sps:$4 sm:$0xff]  }
 0x1b0   :  { %v855_v2 = vsel %vm836_vm14, %v6488_v13, %v853_v39  ;;  %v880_v17 = vrot.slane %v5940_v7, 1  ;;  %v888_v8 = vrot.slane %v6037_v14, 4  ;;  %v6489_v63 = vrot.slane %v5953_v21, 6  ;;  %v5039_v58 = vld [vmem:[#allocation8 + $0x208] ss:$16 sps:$4 sm:$0xff]   ;;  %2302 = vmatprep.subr.bf16.mxu0 %v5038_v43 }
 0x1b1   :  { %v857_v26 = vsel %vm839_vm15, %v856_v29, %v855_v2  ;;  %v879_v38 = vsel %vm842_vm0, %v878_v19, %v877_v24  ;;  %v890_v7 = vrot.slane %v6039_v23, 3  ;;  %v865_v14 = vmul.f32 %v5910_v53, %v864_v15  ;;  %v5041_v48 = vld [vmem:[#allocation8 + $0x20c] ss:$16 sps:$4 sm:$0xff]   ;;  %v5044_v54 = vld [vmem:[#allocation8 + $0x224] ss:$16 sps:$4 sm:$0xff]   ;;  %2303 = vmatpush1.bf16.msra.mxu0 %v5036_v3 }
 0x1b2   :  { %v859_v31 = vsel %vm842_vm0, %v858_v62, %v857_v26  ;;  %v885_v16 = vsel %vm830_vm12, %v6489_v63, %v5967_v30  ;;  %v881_v29 = vsel %vm845_vm2, %v880_v17, %v879_v38  ;;  %v892_v21 = vrot.slane %v6046_v4, 2  ;;  %v5047_v56 = vld [vmem:[#allocation8 + $0x22c] ss:$16 sps:$4 sm:$0xff]   ;;  %v5042_v37 = vld [vmem:[#allocation8 + $0x220] ss:$16 sps:$4 sm:$0xff]   ;;  %2304 = vmatprep.subr.bf16.mxu0 %v5044_v54 }
 0x1b3   :  { %v861_v5 = vsel %vm845_vm2, %v860_v10, %v859_v31  ;;  %v887_v0 = vsel %vm833_vm13, %v886_v11, %v885_v16  ;;  %v6490_v30 = vmov 0.0   ;;  %v897_v23 = vmul.f32 %v5921_v61, %v881_v29  ;;  %v5024_v61 = vld [vmem:[#allocation7 + $0x140] ss:$8 sps:$4 sm:$0xff]   ;;  %v5050_v62 = vld [vmem:[#allocation8 + $0x244] ss:$16 sps:$4 sm:$0xff]  }
 0x1b4   :  { %v866_v51 = vmul.f32 %v5916_v57, %v861_v5  ;;  %v889_v32 = vsel %vm836_vm14, %v888_v8, %v887_v0  ;;  %v4473_v36 = vsel %vm6077_vm3, 1.0, %v6490_v30  ;;  %v6491_v4 = vmov 0   ;;  %v5045_v50 = vld [vmem:[#allocation8 + $0x228] ss:$16 sps:$4 sm:$0xff]   ;;  %v5053_v10 = vld [vmem:[#allocation8 + $0x24c] ss:$16 sps:$4 sm:$0xff]  }
 0x1b5   :  { %v891_v28 = vsel %vm839_vm15, %v890_v7, %v889_v32  ;;  %2305 = vmatpush1.bf16.msra.mxu0 %v5042_v37  ;;  %v5048_v12 = vld [vmem:[#allocation8 + $0x240] ss:$16 sps:$4 sm:$0xff]   ;;  %v5051_v41 = vld [vmem:[#allocation8 + $0x248] ss:$16 sps:$4 sm:$0xff]   ;;  %v5056_v52 = vld [vmem:[#allocation8 + $0x264] ss:$16 sps:$4 sm:$0xff]  }
 0x1b6   :  { %v899_v18 = vpack.c.bf16 %v866_v51, %v865_v14  ;;  %v893_v11 = vsel %vm842_vm0, %v892_v21, %v891_v28  ;;  %2306 = vmatprep.subr.bf16.mxu0 %v5050_v62  ;;  %v5059_v39 = vld [vmem:[#allocation8 + $0x26c] ss:$16 sps:$4 sm:$0xff]   ;;  %v5054_v60 = vld [vmem:[#allocation8 + $0x260] ss:$16 sps:$4 sm:$0xff]   ;;  %v5057_v59 = vld [vmem:[#allocation8 + $0x268] ss:$16 sps:$4 sm:$0xff]  }
 0x1b7   :  { %v896_v53 = vsel %vm224_vm5, %v893_v11, 0.0  ;;  %v5062_v13 = vld [vmem:[#allocation8 + $0x284] ss:$16 sps:$4 sm:$0xff]   ;;  %v5065_v2 = vld [vmem:[#allocation8 + $0x28c] ss:$16 sps:$4 sm:$0xff]  }
 0x1b8   :  { %1246 = vmatmul.mubr.bf16.vlgmr.msra.gmra.mrb[4].mxu1 %v899_v18  ;;  %v898_v57 = vmul.f32 %v4473_v36, %v896_v53  ;;  %v5060_v25 = vld [vmem:[#allocation8 + $0x280] ss:$16 sps:$4 sm:$0xff]   ;;  %v5063_v19 = vld [vmem:[#allocation8 + $0x288] ss:$16 sps:$4 sm:$0xff]   ;;  %v5068_v26 = vld [vmem:[#allocation8 + $0x2a4] ss:$16 sps:$4 sm:$0xff]  }
 0x1b9   :  { %1354 = vmatpush1.bf16.msra.mxu1 %v5012_v44  ;;  %1385 = vmatprep.mubr.bf16.mxu1 %v6491_v4  ;;  %v5071_v15 = vld [vmem:[#allocation8 + $0x2ac] ss:$16 sps:$4 sm:$0xff]   ;;  %v5066_v24 = vld [vmem:[#allocation8 + $0x2a0] ss:$16 sps:$4 sm:$0xff]   ;;  %v5069_v17 = vld [vmem:[#allocation8 + $0x2a8] ss:$16 sps:$4 sm:$0xff]  }
 0x1ba   :  { %1355 = vmatprep.subr.bf16.mxu1 %v5017_v6  ;;  %v1256_v46 = vpack.c.bf16 %v898_v57, %v897_v23  ;;  %2307 = vmatpush1.bf16.msra.mxu0 %v5048_v12  ;;  %v5074_v8 = vld [vmem:[#allocation8 + $0x2c4] ss:$16 sps:$4 sm:$0xff]   ;;  %v5077_v31 = vld [vmem:[#allocation8 + $0x2cc] ss:$16 sps:$4 sm:$0xff]   ;;  %v5072_v38 = vld [vmem:[#allocation8 + $0x2c0] ss:$16 sps:$4 sm:$0xff]  }
 0x1bb   :  { %2308 = vmatprep.subr.bf16.mxu0 %v5056_v52  ;;  %v5075_v63 = vld [vmem:[#allocation8 + $0x2c8] ss:$16 sps:$4 sm:$0xff]   ;;  %v5080_v16 = vld [vmem:[#allocation8 + $0x2e4] ss:$16 sps:$4 sm:$0xff]   ;;  %v5083_v5 = vld [vmem:[#allocation8 + $0x2ec] ss:$16 sps:$4 sm:$0xff]  }
 0x1bc   :  { %v5078_v29 = vld [vmem:[#allocation8 + $0x2e0] ss:$16 sps:$4 sm:$0xff]   ;;  %v5081_v0 = vld [vmem:[#allocation8 + $0x2e8] ss:$16 sps:$4 sm:$0xff]   ;;  %v5086_v7 = vld [vmem:[#allocation8 + $0x304] ss:$16 sps:$4 sm:$0xff]  }
 0x1bd   :  { %1356 = vmatpush1.bf16.msra.mxu1 %v5015_v20  ;;  %v5089_v14 = vld [vmem:[#allocation8 + $0x30c] ss:$16 sps:$4 sm:$0xff]   ;;  %v5084_v51 = vld [vmem:[#allocation8 + $0x300] ss:$16 sps:$4 sm:$0xff]   ;;  %v5087_v32 = vld [vmem:[#allocation8 + $0x308] ss:$16 sps:$4 sm:$0xff]  }
 0x1be   :  { %1357 = vmatprep.subr.bf16.mxu1 %v5020_v35  ;;  %2309 = vmatpush1.bf16.msra.mxu0 %v5054_v60  ;;  %v5092_v21 = vld [vmem:[#allocation8 + $0x324] ss:$16 sps:$4 sm:$0xff]   ;;  %v5095_v44 = vld [vmem:[#allocation8 + $0x32c] ss:$16 sps:$4 sm:$0xff]   ;;  %v5090_v36 = vld [vmem:[#allocation8 + $0x320] ss:$16 sps:$4 sm:$0xff]  }
 0x1bf   :  { %2310 = vmatprep.subr.bf16.mxu0 %v5062_v13  ;;  %v5093_v28 = vld [vmem:[#allocation8 + $0x328] ss:$16 sps:$4 sm:$0xff]   ;;  %v5098_v18 = vld [vmem:[#allocation8 + $0x344] ss:$16 sps:$4 sm:$0xff]   ;;  %v5101_v6 = vld [vmem:[#allocation8 + $0x34c] ss:$16 sps:$4 sm:$0xff]  }
 0x1c0   :  { %v5096_v11 = vld [vmem:[#allocation8 + $0x340] ss:$16 sps:$4 sm:$0xff]   ;;  %v5099_v23 = vld [vmem:[#allocation8 + $0x348] ss:$16 sps:$4 sm:$0xff]   ;;  %v5104_v53 = vld [vmem:[#allocation8 + $0x364] ss:$16 sps:$4 sm:$0xff]  }
 0x1c1   :  { %1358 = vmatpush1.bf16.msra.mxu1 %v5018_v55  ;;  %v5107_v57 = vld [vmem:[#allocation8 + $0x36c] ss:$16 sps:$4 sm:$0xff]   ;;  %v5102_v20 = vld [vmem:[#allocation8 + $0x360] ss:$16 sps:$4 sm:$0xff]   ;;  %v5105_v4 = vld [vmem:[#allocation8 + $0x368] ss:$16 sps:$4 sm:$0xff]  }
 0x1c2   :  { %1359 = vmatprep.subr.bf16.mxu1 %v5023_v33  ;;  %2311 = vmatpush1.bf16.msra.mxu0 %v5060_v25  ;;  %v5110_v35 = vld [vmem:[#allocation8 + $0x384] ss:$16 sps:$4 sm:$0xff]   ;;  %v5111_v55 = vld [vmem:[#allocation8 + $0x388] ss:$16 sps:$4 sm:$0xff]   ;;  %v5113_v33 = vld [vmem:[#allocation8 + $0x38c] ss:$16 sps:$4 sm:$0xff]  }
 0x1c3   :  { %2312 = vmatprep.subr.bf16.mxu0 %v5068_v26  ;;  %v5131_v3 = vld [vmem:[#allocation8 + $0x3ec] ss:$16 sps:$4 sm:$0xff]   ;;  %v5126_v43 = vld [vmem:[#allocation8 + $0x3e0] ss:$16 sps:$4 sm:$0xff]   ;;  %v6146_v26 = vsub.s32 1, %v5853_v1 }
 0x1c4   :  { %v5137_v54 = vld [vmem:[#allocation8 + $0xc] ss:$16 sps:$4 sm:$0xff]  }
 0x1c5   :  { %1360 = vmatpush1.bf16.msra.mxu1 %v5021_v22  ;;  %v5116_v22 = vld [vmem:[#allocation8 + $0x3a4] ss:$16 sps:$4 sm:$0xff]  }
 0x1c6   :  { %1361 = vmatprep.subr.bf16.mxu1 %v5026_v9  ;;  %2313 = vmatpush1.bf16.msra.mxu0 %v5066_v24  ;;  %v5119_v9 = vld [vmem:[#allocation8 + $0x3ac] ss:$16 sps:$4 sm:$0xff]  }
 0x1c7   :  { %2314 = vmatprep.subr.bf16.mxu0 %v5074_v8 }
 0x1c9   :  { %1362 = vmatpush1.bf16.msra.mxu1 %v5024_v61  ;;  %v5114_v61 = vld [vmem:[#allocation8 + $0x3a0] ss:$16 sps:$4 sm:$0xff]  }
 0x1ca   :  { %1363 = vmatprep.subr.bf16.mxu1 %v5029_v27  ;;  %2315 = vmatpush1.bf16.msra.mxu0 %v5072_v38  ;;  %v5117_v27 = vld [vmem:[#allocation8 + $0x3a8] ss:$16 sps:$4 sm:$0xff]  }
 0x1cb   :  { %2316 = vmatprep.subr.bf16.mxu0 %v5080_v16 }
 0x1cd   :  { %1364 = vmatpush1.bf16.msra.mxu1 %v5027_v40  ;;  %v5122_v40 = vld [vmem:[#allocation8 + $0x3c4] ss:$16 sps:$4 sm:$0xff]  }
 0x1ce   :  { %1365 = vmatprep.subr.bf16.mxu1 %v5032_v49  ;;  %2317 = vmatpush1.bf16.msra.mxu0 %v5078_v29  ;;  %v5125_v49 = vld [vmem:[#allocation8 + $0x3cc] ss:$16 sps:$4 sm:$0xff]  }
 0x1cf   :  { %2318 = vmatprep.subr.bf16.mxu0 %v5086_v7 }
 0x1d1   :  { %1366 = vmatpush1.bf16.msra.mxu1 %v5030_v47  ;;  %v5120_v47 = vld [vmem:[#allocation8 + $0x3c0] ss:$16 sps:$4 sm:$0xff]  }
 0x1d2   :  { %1367 = vmatprep.subr.bf16.mxu1 %v5035_v34  ;;  %2319 = vmatpush1.bf16.msra.mxu0 %v5084_v51  ;;  %v5123_v34 = vld [vmem:[#allocation8 + $0x3c8] ss:$16 sps:$4 sm:$0xff]  }
 0x1d3   :  { %2320 = vmatprep.subr.bf16.mxu0 %v5092_v21 }
 0x1d5   :  { %1368 = vmatpush1.bf16.msra.mxu1 %v5033_v45  ;;  %v5128_v45 = vld [vmem:[#allocation8 + $0x3e4] ss:$16 sps:$4 sm:$0xff]  }
 0x1d6   :  { %2343 = vmatprep.subr.bf16.mxu1 %v5041_v48  ;;  %2321 = vmatpush1.bf16.msra.mxu0 %v5090_v36  ;;  %v5134_v48 = vld [vmem:[#allocation8 + $0x4] ss:$16 sps:$4 sm:$0xff]  }
 0x1d7   :  { %2322 = vmatprep.subr.bf16.mxu0 %v5098_v18 }
 0x1d8   :  { %1386 = vmatmul.mubr.bf16.vlgmr.msra.gmra.mrb[4].mxu1 %v1256_v46  ;;  %v5108_v46 = vld [vmem:[#allocation8 + $0x380] ss:$16 sps:$4 sm:$0xff]  }
 0x1d9   :  { %2344 = vmatpush1.bf16.msra.mxu1 %v5039_v58  ;;  %v5129_v58 = vld [vmem:[#allocation8 + $0x3e8] ss:$16 sps:$4 sm:$0xff]  }
 0x1da   :  { %2345 = vmatprep.subr.bf16.mxu1 %v5047_v56  ;;  %2323 = vmatpush1.bf16.msra.mxu0 %v5096_v11 }
 0x1db   :  { %2324 = vmatprep.subr.bf16.mxu0 %v5104_v53 }
 0x1dd   :  { %2346 = vmatpush1.bf16.msra.mxu1 %v5045_v50 }
 0x1de   :  { %2347 = vmatprep.subr.bf16.mxu1 %v5053_v10  ;;  %2325 = vmatpush1.bf16.msra.mxu0 %v5102_v20 }
 0x1df   :  { %2326 = vmatprep.subr.bf16.mxu0 %v5110_v35 }
 0x1e1   :  { %2348 = vmatpush1.bf16.msra.mxu1 %v5051_v41 }
 0x1e2   :  { %2349 = vmatprep.subr.bf16.mxu1 %v5059_v39  ;;  %2327 = vmatpush1.bf16.msra.mxu0 %v5108_v46 }
 0x1e3   :  { %2328 = vmatprep.subr.bf16.mxu0 %v5116_v22 }
 0x1e5   :  { %2350 = vmatpush1.bf16.msra.mxu1 %v5057_v59 }
 0x1e6   :  { %2351 = vmatprep.subr.bf16.mxu1 %v5065_v2  ;;  %2329 = vmatpush1.bf16.msra.mxu0 %v5114_v61 }
 0x1e7   :  { %2330 = vmatprep.subr.bf16.mxu0 %v5122_v40 }
 0x1e9   :  { %2352 = vmatpush1.bf16.msra.mxu1 %v5063_v19  ;;  %v6143_v19 = vsub.s32 0, %v5853_v1 }
 0x1ea   :  { %2353 = vmatprep.subr.bf16.mxu1 %v5071_v15  ;;  %2331 = vmatpush1.bf16.msra.mxu0 %v5120_v47 }
 0x1eb   :  { %2332 = vmatprep.subr.bf16.mxu0 %v5128_v45 }
 0x1ed   :  { %2354 = vmatpush1.bf16.msra.mxu1 %v5069_v17  ;;  %v1632_v17 = vld [vmem:[%s6469_s4] sm:$0x3] }
 0x1ee   :  { %2355 = vmatprep.subr.bf16.mxu1 %v5077_v31  ;;  %2333 = vmatpush1.bf16.msra.mxu0 %v5126_v43  ;;  %v6156_v29 = vrot.slane %v1632_v17, %v6143_v19 }
 0x1ef   :  { %2704 = vmatprep.subr.bf16.mxu0 %v5134_v48 }
 0x1f1   :  { %2356 = vmatpush1.bf16.msra.mxu1 %v5075_v63 }
 0x1f2   :  { %2357 = vmatprep.subr.bf16.mxu1 %v5083_v5 }
 0x1f5   :  { %2358 = vmatpush1.bf16.msra.mxu1 %v5081_v0  ;;  %v6159_v0 = vrot.slane %v1632_v17, %v6146_v26 }
 0x1f6   :  { %2359 = vmatprep.subr.bf16.mxu1 %v5089_v14  ;;  %v1680_v14 = vand.u32 3, %v5853_v1 }
 0x1f8   :  { %vm6299_vm4 = vcmp.ne.s32.totalorder %v1680_v14, 0  ;;  %vm1691_vm6 = vcmp.ne.s32.totalorder %v1680_v14, 3  ;;  %v5228_v14 = vld [vmem:[#allocation8 + $0x400] ss:$16 sps:$4 sm:$0xff]  }
 0x1f9   :  { %2360 = vmatpush1.bf16.msra.mxu1 %v5087_v32 }
 0x1fa   :  { %2361 = vmatprep.subr.bf16.mxu1 %v5095_v44 }
 0x1fd   :  { %2362 = vmatpush1.bf16.msra.mxu1 %v5093_v28 }
 0x1fe   :  { %2363 = vmatprep.subr.bf16.mxu1 %v5101_v6 }
 0x201   :  { %2364 = vmatpush1.bf16.msra.mxu1 %v5099_v23 }
 0x202   :  { %2365 = vmatprep.subr.bf16.mxu1 %v5107_v57 }
 0x205   :  { %2366 = vmatpush1.bf16.msra.mxu1 %v5105_v4 }
 0x206   :  { %2367 = vmatprep.subr.bf16.mxu1 %v5113_v33 }
 0x209   :  { %2368 = vmatpush1.bf16.msra.mxu1 %v5111_v55 }
 0x20a   :  { %2369 = vmatprep.subr.bf16.mxu1 %v5119_v9 }
 0x20d   :  { %2370 = vmatpush1.bf16.msra.mxu1 %v5117_v27 }
 0x20e   :  { %2371 = vmatprep.subr.bf16.mxu1 %v5125_v49 }
 0x211   :  { %2372 = vmatpush1.bf16.msra.mxu1 %v5123_v34 }
 0x212   :  { %2373 = vmatprep.subr.bf16.mxu1 %v5131_v3 }
 0x215   :  { %2374 = vmatpush1.bf16.msra.mxu1 %v5129_v58 }
 0x216   :  { %2745 = vmatprep.subr.bf16.mxu1 %v5137_v54 }
 0x282   :  { %v1124_v56 = vpop.f32.mrb[4].mxu0 }
 0x283   :  { %v1126_v37 = vpop.f32.mrb[5].mxu0 }
 0x284   :  { %v1128_v50 = vpop.f32.mrb[6].mxu0 }
 0x285   :  { %v1130_v62 = vpop.f32.mrb[7].mxu0 }
 0x2ab   :  { %v1387_v10 = vpop.f32.mrb[4].mxu1 }
 0x2ac   :  { %v4915_v12 = vadd.f32 %v1387_v10, %v1124_v56  ;;  %v1389_v41 = vpop.f32.mrb[5].mxu1 }
 0x2ad   :  { %v4916_v52 = vadd.f32 %v1389_v41, %v1126_v37  ;;  %v1391_v39 = vpop.f32.mrb[6].mxu1 }
 0x2ae   :  { %v4917_v60 = vadd.f32 %v1391_v39, %v1128_v50  ;;  %v1393_v59 = vpop.f32.mrb[7].mxu1 }
 0x2af   :  { %v1404_v13 = vcombine.low %v4915_v12, %v4916_v52  ;;  %v1405_v2 = vcombine.high %v4915_v12, %v4916_v52  ;;  %v4918_v25 = vadd.f32 %v1393_v59, %v1130_v62 }
 0x2b1   :  { %v1412_v15 = vrot.slane %v1404_v13, %v5901_v42  ;;  %v1419_v24 = vrot.slane %v1405_v2, %v5901_v42  ;;  %v1422_v8 = vcombine.low %v4917_v60, %v4918_v25  ;;  %v1423_v31 = vcombine.high %v4917_v60, %v4918_v25 }
 0x2b3   :  { %v1420_v38 = vcombine.high %v1412_v15, %v1412_v15  ;;  %v1421_v63 = vcombine.high %v1419_v24, %v1419_v24  ;;  %v1446_v16 = vrot.slane %v1412_v15, %v5901_v42  ;;  %v1462_v5 = vrot.slane %v1419_v24, %v5901_v42 }
 0x2b4   :  { %v6162_v7 = vrot.slane %v1422_v8, %v5901_v42  ;;  %v6170_v18 = vrot.slane %v1423_v31, %v5901_v42 }
 0x2b5   :  { %v1447_v51 = vcombine.high %v1446_v16, %v1446_v16  ;;  %v1454_v32 = vrot.slane %v1420_v38, %v5901_v42  ;;  %v1463_v21 = vcombine.high %v1462_v5, %v1462_v5  ;;  %v1470_v44 = vrot.slane %v1421_v63, %v5901_v42 }
 0x2b6   :  { %v1520_v36 = vsel %vm625_vm9, %v1446_v16, -inf  ;;  %v1548_v28 = vsel %vm625_vm9, %v1462_v5, -inf  ;;  %v1438_v6 = vcombine.high %v6162_v7, %v6162_v7 }
 0x2b7   :  { %v1455_v11 = vcombine.high %v1454_v32, %v1454_v32  ;;  %v1471_v23 = vcombine.high %v1470_v44, %v1470_v44  ;;  %v1521_v53 = vrot.slane %v1520_v36, 4  ;;  %v1527_v57 = vsel %vm625_vm9, %v1447_v51, -inf }
 0x2b8   :  { %v1528_v20 = vrot.slane %v1527_v57, 4  ;;  %v1534_v4 = vsel %vm625_vm9, %v1454_v32, -inf  ;;  %v1549_v35 = vrot.slane %v1548_v28, 4  ;;  %v1555_v46 = vsel %vm625_vm9, %v1463_v21, -inf }
 0x2b9   :  { %v1522_v55 = vmax.f32 %v1520_v36, %v1521_v53  ;;  %v1535_v33 = vrot.slane %v1534_v4, 4  ;;  %v1541_v22 = vsel %vm625_vm9, %v1455_v11, -inf  ;;  %v1556_v9 = vrot.slane %v1555_v46, 4 }
 0x2ba   :  { %v1529_v61 = vmax.f32 %v1527_v57, %v1528_v20  ;;  %v1542_v27 = vrot.slane %v1541_v22, 4  ;;  %v1550_v40 = vmax.f32 %v1548_v28, %v1549_v35  ;;  %v1562_v49 = vsel %vm625_vm9, %v1470_v44, -inf }
 0x2bb   :  { %v1523_v47 = vrot.slane %v1522_v55, 2  ;;  %v1536_v34 = vmax.f32 %v1534_v4, %v1535_v33  ;;  %v1557_v45 = vmax.f32 %v1555_v46, %v1556_v9  ;;  %v1563_v3 = vrot.slane %v1562_v49, 4 }
 0x2bc   :  { %v1530_v43 = vrot.slane %v1529_v61, 2  ;;  %v1543_v58 = vmax.f32 %v1541_v22, %v1542_v27  ;;  %v1551_v48 = vrot.slane %v1550_v40, 2  ;;  %v1569_v54 = vsel %vm625_vm9, %v1471_v23, -inf }
 0x2bd   :  { %v1524_v56 = vmax.f32 %v1522_v55, %v1523_v47  ;;  %v1537_v37 = vrot.slane %v1536_v34, 2  ;;  %v1558_v50 = vrot.slane %v1557_v45, 2  ;;  %v1564_v62 = vmax.f32 %v1562_v49, %v1563_v3 }
 0x2be   :  { %v1531_v10 = vmax.f32 %v1529_v61, %v1530_v43  ;;  %v1544_v12 = vrot.slane %v1543_v58, 2  ;;  %v1552_v41 = vmax.f32 %v1550_v40, %v1551_v48  ;;  %v1570_v52 = vrot.slane %v1569_v54, 4 }
 0x2bf   :  { %v1525_v39 = vrot.slane %v1524_v56, 1  ;;  %v1538_v60 = vmax.f32 %v1536_v34, %v1537_v37  ;;  %v1559_v59 = vmax.f32 %v1557_v45, %v1558_v50  ;;  %v1565_v13 = vrot.slane %v1564_v62, 2 }
 0x2c0   :  { %v1532_v2 = vrot.slane %v1531_v10, 1  ;;  %v1545_v25 = vmax.f32 %v1543_v58, %v1544_v12  ;;  %v1553_v15 = vrot.slane %v1552_v41, 1  ;;  %v1571_v24 = vmax.f32 %v1569_v54, %v1570_v52 }
 0x2c1   :  { %v1526_v17 = vmax.f32 %v1524_v56, %v1525_v39  ;;  %v1539_v8 = vrot.slane %v1538_v60, 1  ;;  %v1560_v31 = vrot.slane %v1559_v59, 1  ;;  %v1566_v38 = vmax.f32 %v1564_v62, %v1565_v13 }
 0x2c2   :  { %v1533_v63 = vmax.f32 %v1531_v10, %v1532_v2  ;;  %v1546_v16 = vrot.slane %v1545_v25, 1  ;;  %v1554_v5 = vmax.f32 %v1552_v41, %v1553_v15  ;;  %v1572_v51 = vrot.slane %v1571_v24, 2 }
 0x2c3   :  { %v1540_v32 = vmax.f32 %v1538_v60, %v1539_v8  ;;  %v1561_v21 = vmax.f32 %v1559_v59, %v1560_v31  ;;  %v1567_v44 = vrot.slane %v1566_v38, 1  ;;  %v1644_v36 = vadd.f32 %v6156_v29, %v1526_v17 }
 0x2c4   :  { %v1547_v28 = vmax.f32 %v1545_v25, %v1546_v16  ;;  %v1573_v11 = vmax.f32 %v1571_v24, %v1572_v51  ;;  %v1645_v23 = vadd.f32 %v6159_v0, %v1533_v63  ;;  %v1648_v53 = vadd.f32 %v6156_v29, %v1554_v5 }
 0x2c5   :  { %v1568_v57 = vmax.f32 %v1566_v38, %v1567_v44  ;;  %v1646_v20 = vadd.f32 %v6156_v29, %v1540_v32  ;;  %v1649_v4 = vadd.f32 %v6159_v0, %v1561_v21  ;;  %v6185_v35 = vmax.f32 %v1644_v36, 0.0 }
 0x2c6   :  { %v1574_v46 = vrot.slane %v1573_v11, 1  ;;  %v1647_v55 = vadd.f32 %v6159_v0, %v1547_v28  ;;  %v6188_v33 = vmax.f32 %v1645_v23, 0.0  ;;  %v6190_v22 = vmax.f32 %v1648_v53, 0.0 }
 0x2c7   :  { %v1650_v9 = vadd.f32 %v6156_v29, %v1568_v57  ;;  %v6193_v61 = vmax.f32 %v1646_v20, 0.0  ;;  %v6195_v27 = vmax.f32 %v1649_v4, 0.0  ;;  %v1439_v40 = vcombine.high %v6170_v18, %v6170_v18 }
 0x2c8   :  { %v1575_v49 = vmax.f32 %v1573_v11, %v1574_v46  ;;  %v6199_v47 = vmax.f32 %v1647_v55, 0.0  ;;  %v1708_v34 = vrot.slane %v6185_v35, 7  ;;  %v1711_v45 = vrot.slane %v6190_v22, 5 }
 0x2c9   :  { %v6203_v3 = vmax.f32 %v1650_v9, 0.0  ;;  %v1709_v43 = vrot.slane %v6193_v61, 6  ;;  %v1721_v58 = vrot.slane %v6188_v33, 7  ;;  %v1838_v48 = vpack.c.bf16 %v6185_v35, %v6185_v35 }
 0x2ca   :  { %v1651_v54 = vadd.f32 %v6159_v0, %v1575_v49  ;;  %v1839_v56 = vpack.c.bf16 %v6188_v33, %v6188_v33  ;;  %v1840_v37 = vpack.c.bf16 %v6193_v61, %v6193_v61  ;;  %v1842_v50 = vpack.c.bf16 %v6190_v22, %v6190_v22 }
 0x2cb   :  { %v6216_v62 = vunpack.c.l.b16 %v1838_v48  ;;  %v1478_v10 = vrot.slane %v6162_v7, %v5901_v42  ;;  %v1486_v12 = vrot.slane %v1438_v6, %v5901_v42  ;;  %v1494_v41 = vrot.slane %v6170_v18, %v5901_v42 }
 0x2cc   :  { %v6226_v52 = vmax.f32 %v1651_v54, 0.0  ;;  %v6228_v39 = vunpack.c.l.b16 %v1839_v56  ;;  %v6230_v60 = vunpack.c.l.b16 %v1840_v37  ;;  %v6232_v59 = vunpack.c.l.b16 %v1842_v50 }
 0x2cd   :  { %v1479_v13 = vcombine.high %v1478_v10, %v1478_v10  ;;  %v1487_v2 = vcombine.high %v1486_v12, %v1486_v12  ;;  %v1495_v25 = vcombine.high %v1494_v41, %v1494_v41  ;;  %v1502_v15 = vrot.slane %v1439_v40, %v5901_v42 }
 0x2ce   :  { %v1950_v24 = vrot.slane %v6230_v60, 7  ;;  %v1952_v7 = vrot.slane %v6232_v59, 6  ;;  %v1576_v6 = vsel %vm625_vm9, %v1478_v10, -inf  ;;  %v1590_v18 = vsel %vm625_vm9, %v1486_v12, -inf }
 0x2cf   :  { %v1503_v17 = vcombine.high %v1502_v15, %v1502_v15  ;;  %v1577_v8 = vrot.slane %v1576_v6, 4  ;;  %v1583_v31 = vsel %vm625_vm9, %v1479_v13, -inf  ;;  %v1591_v38 = vrot.slane %v1590_v18, 4 }
 0x2d0   :  { %v1584_v63 = vrot.slane %v1583_v31, 4  ;;  %v1597_v16 = vsel %vm625_vm9, %v1487_v2, -inf  ;;  %v1604_v5 = vsel %vm625_vm9, %v1494_v41, -inf  ;;  %v1611_v51 = vsel %vm625_vm9, %v1495_v25, -inf }
 0x2d1   :  { %v1578_v32 = vmax.f32 %v1576_v6, %v1577_v8  ;;  %v1592_v21 = vmax.f32 %v1590_v18, %v1591_v38  ;;  %v1598_v44 = vrot.slane %v1597_v16, 4  ;;  %v1605_v36 = vrot.slane %v1604_v5, 4 }
 0x2d2   :  { %v1585_v28 = vmax.f32 %v1583_v31, %v1584_v63  ;;  %v1612_v11 = vrot.slane %v1611_v51, 4  ;;  %v1618_v23 = vsel %vm625_vm9, %v1502_v15, -inf  ;;  %v1625_v53 = vsel %vm625_vm9, %v1503_v17, -inf }
 0x2d3   :  { %v1579_v57 = vrot.slane %v1578_v32, 2  ;;  %v1593_v20 = vrot.slane %v1592_v21, 2  ;;  %v1599_v4 = vmax.f32 %v1597_v16, %v1598_v44  ;;  %v1606_v46 = vmax.f32 %v1604_v5, %v1605_v36 }
 0x2d4   :  { %v1586_v55 = vrot.slane %v1585_v28, 2  ;;  %v1613_v9 = vmax.f32 %v1611_v51, %v1612_v11  ;;  %v1619_v40 = vrot.slane %v1618_v23, 4  ;;  %v1626_v49 = vrot.slane %v1625_v53, 4 }
 0x2d5   :  { %v1580_v48 = vmax.f32 %v1578_v32, %v1579_v57  ;;  %v1594_v54 = vmax.f32 %v1592_v21, %v1593_v20  ;;  %v1600_v56 = vrot.slane %v1599_v4, 2  ;;  %v1607_v37 = vrot.slane %v1606_v46, 2 }
 0x2d6   :  { %v1587_v50 = vmax.f32 %v1585_v28, %v1586_v55  ;;  %v1614_v10 = vrot.slane %v1613_v9, 2  ;;  %v1620_v12 = vmax.f32 %v1618_v23, %v1619_v40  ;;  %v1627_v41 = vmax.f32 %v1625_v53, %v1626_v49 }
 0x2d7   :  { %v1581_v13 = vrot.slane %v1580_v48, 1  ;;  %v1595_v2 = vrot.slane %v1594_v54, 1  ;;  %v1601_v25 = vmax.f32 %v1599_v4, %v1600_v56  ;;  %v1608_v15 = vmax.f32 %v1606_v46, %v1607_v37 }
 0x2d8   :  { %v1588_v6 = vrot.slane %v1587_v50, 1  ;;  %v1615_v18 = vmax.f32 %v1613_v9, %v1614_v10  ;;  %v1621_v17 = vrot.slane %v1620_v12, 2  ;;  %v1628_v8 = vrot.slane %v1627_v41, 2 }
 0x2d9   :  { %v1582_v31 = vmax.f32 %v1580_v48, %v1581_v13  ;;  %v1596_v38 = vmax.f32 %v1594_v54, %v1595_v2  ;;  %v1602_v63 = vrot.slane %v1601_v25, 1  ;;  %v1609_v16 = vrot.slane %v1608_v15, 1 }
 0x2da   :  { %v1589_v5 = vmax.f32 %v1587_v50, %v1588_v6  ;;  %v1616_v51 = vrot.slane %v1615_v18, 1  ;;  %v1622_v32 = vmax.f32 %v1620_v12, %v1621_v17  ;;  %v1629_v21 = vmax.f32 %v1627_v41, %v1628_v8 }
 0x2db   :  { %v1603_v44 = vmax.f32 %v1601_v25, %v1602_v63  ;;  %v1610_v36 = vmax.f32 %v1608_v15, %v1609_v16  ;;  %v1652_v28 = vadd.f32 %v6156_v29, %v1582_v31  ;;  %v1654_v11 = vadd.f32 %v6156_v29, %v1596_v38 }
 0x2dc   :  { %v1617_v23 = vmax.f32 %v1615_v18, %v1616_v51  ;;  %v1623_v53 = vrot.slane %v1622_v32, 1  ;;  %v1653_v57 = vadd.f32 %v6159_v0, %v1589_v5  ;;  %v1630_v20 = vrot.slane %v1629_v21, 1 }
 0x2dd   :  { %v1656_v4 = vadd.f32 %v6156_v29, %v1610_v36  ;;  %v6249_v46 = vmax.f32 %v1652_v28, 0.0  ;;  %v6251_v55 = vmax.f32 %v1654_v11, 0.0  ;;  %v1655_v9 = vadd.f32 %v6159_v0, %v1603_v44 }
 0x2de   :  { %v1624_v40 = vmax.f32 %v1622_v32, %v1623_v53  ;;  %v6254_v49 = vmax.f32 %v1653_v57, 0.0  ;;  %v1631_v48 = vmax.f32 %v1629_v21, %v1630_v20  ;;  %v1657_v54 = vadd.f32 %v6159_v0, %v1617_v23 }
 0x2df   :  { %v6257_v56 = vmax.f32 %v1656_v4, 0.0  ;;  %v6259_v37 = vmax.f32 %v1655_v9, 0.0  ;;  %v1841_v50 = vpack.c.bf16 %v6199_v47, %v6199_v47  ;;  %v1843_v10 = vpack.c.bf16 %v6195_v27, %v6195_v27 }
 0x2e0   :  { %v1659_v12 = vadd.f32 %v6159_v0, %v1631_v48  ;;  %v6266_v41 = vmax.f32 %v1657_v54, 0.0  ;;  %v1845_v13 = vpack.c.bf16 %v6226_v52, %v6226_v52  ;;  %v1847_v2 = vpack.c.bf16 %v6254_v49, %v6254_v49 }
 0x2e1   :  { %v1849_v25 = vpack.c.bf16 %v6259_v37, %v6259_v37  ;;  %v1937_v15 = vunpack.c.l.b16 %v1841_v50  ;;  %v1939_v6 = vunpack.c.l.b16 %v1843_v10  ;;  %v1658_v18 = vadd.f32 %v6156_v29, %v1624_v40 }
 0x2e2   :  { %v6275_v17 = vmax.f32 %v1659_v12, 0.0  ;;  %v1851_v0 = vpack.c.bf16 %v6266_v41, %v6266_v41  ;;  %v1941_v8 = vunpack.c.l.b16 %v1845_v13  ;;  %v1943_v31 = vunpack.c.l.b16 %v1847_v2 }
 0x2e3   :  { %v1945_v38 = vunpack.c.l.b16 %v1849_v25  ;;  %v1964_v63 = vrot.slane %v1937_v15, 7  ;;  %v1966_v16 = vrot.slane %v1939_v6, 6  ;;  %v6279_v5 = vmax.f32 %v1658_v18, 0.0 }
 0x2e4   :  { %v1853_v51 = vpack.c.bf16 %v6275_v17, %v6275_v17  ;;  %v1947_v32 = vunpack.c.l.b16 %v1851_v0  ;;  %v1968_v21 = vrot.slane %v1941_v8, 5  ;;  %v1970_v44 = vrot.slane %v1943_v31, 4 }
 0x2e5   :  { %v1965_v29 = vsel %vm848_vm11, %v1964_v63, %v6228_v39  ;;  %v1972_v36 = vrot.slane %v1945_v38, 3  ;;  %v1844_v28 = vpack.c.bf16 %v6203_v3, %v6203_v3  ;;  %v1846_v11 = vpack.c.bf16 %v6249_v46, %v6249_v46 }
 0x2e6   :  { %v1949_v23 = vunpack.c.l.b16 %v1853_v51  ;;  %v1967_v53 = vsel %vm830_vm12, %v1966_v16, %v1965_v29  ;;  %v1974_v57 = vrot.slane %v1947_v32, 2  ;;  %v1848_v20 = vpack.c.bf16 %v6251_v55, %v6251_v55 }
 0x2e7   :  { %v1969_v4 = vsel %vm833_vm13, %v1968_v21, %v1967_v53  ;;  %v1850_v9 = vpack.c.bf16 %v6257_v56, %v6257_v56  ;;  %v1852_v39 = vpack.c.bf16 %v6279_v5, %v6279_v5  ;;  %v1940_v40 = vunpack.c.l.b16 %v1844_v28  ;;  %v5132_v28 = vld [vmem:[#allocation8] ss:$16 sps:$4 sm:$0xff]  }
 0x2e8   :  { %v1971_v54 = vsel %vm836_vm14, %v1970_v44, %v1969_v4  ;;  %v1976_v50 = vrot.slane %v1949_v23, 1  ;;  %v1942_v10 = vunpack.c.l.b16 %v1846_v11  ;;  %v1944_v12 = vunpack.c.l.b16 %v1848_v20  ;;  %v5135_v11 = vld [vmem:[#allocation8 + $0x8] ss:$16 sps:$4 sm:$0xff]  }
 0x2e9   :  { %v1973_v13 = vsel %vm839_vm15, %v1972_v36, %v1971_v54  ;;  %v1946_v2 = vunpack.c.l.b16 %v1850_v9  ;;  %v1948_v25 = vunpack.c.l.b16 %v1852_v39  ;;  %v1951_v15 = vsel %vm848_vm11, %v1950_v24, %v6216_v62  ;;  %v5140_v54 = vld [vmem:[#allocation8 + $0x24] ss:$16 sps:$4 sm:$0xff]  }
 0x2ea   :  { %v1742_v6 = vrot.slane %v6190_v22, 7  ;;  %v1975_v18 = vsel %vm842_vm0, %v1974_v57, %v1973_v13  ;;  %v1953_v0 = vsel %vm830_vm12, %v1952_v7, %v1951_v15  ;;  %v1954_v8 = vrot.slane %v1940_v40, 5 }
 0x2eb   :  { %v1977_v31 = vsel %vm845_vm2, %v1976_v50, %v1975_v18  ;;  %v1956_v38 = vrot.slane %v1942_v10, 4  ;;  %v1958_v63 = vrot.slane %v1944_v12, 3  ;;  %v1960_v16 = vrot.slane %v1946_v2, 2  ;;  %v5143_v50 = vld [vmem:[#allocation8 + $0x2c] ss:$16 sps:$4 sm:$0xff]  }
 0x2ec   :  { %v1979_v51 = vpack.c.b16 %v1977_v31, %v1977_v31  ;;  %v1955_v32 = vsel %vm833_vm13, %v1954_v8, %v1953_v0  ;;  %v1710_v62 = vsel %vm830_vm12, %v1709_v43, %v1708_v34  ;;  %v1713_v60 = vrot.slane %v6203_v3, 4  ;;  %v5138_v18 = vld [vmem:[#allocation8 + $0x20] ss:$16 sps:$4 sm:$0xff]   ;;  %v5141_v0 = vld [vmem:[#allocation8 + $0x28] ss:$16 sps:$4 sm:$0xff]  }
 0x2ed   :  { %v1957_v59 = vsel %vm836_vm14, %v1956_v38, %v1955_v32  ;;  %v1962_v24 = vrot.slane %v1948_v25, 1  ;;  %v1712_v7 = vsel %vm833_vm13, %v1711_v45, %v1710_v62  ;;  %v1715_v21 = vrot.slane %v6249_v46, 3  ;;  %v5146_v31 = vld [vmem:[#allocation8 + $0x44] ss:$16 sps:$4 sm:$0xff]   ;;  %v5149_v38 = vld [vmem:[#allocation8 + $0x4c] ss:$16 sps:$4 sm:$0xff]  }
 0x2ee   :  { %2334 = vmatprep.mubr.bf16.mxu0 %v1979_v51  ;;  %2375 = vmatprep.mubr.bf16.mxu1 %v1979_v51  ;;  %v1959_v44 = vsel %vm839_vm15, %v1958_v63, %v1957_v59  ;;  %v1714_v35 = vsel %vm836_vm14, %v1713_v60, %v1712_v7  ;;  %v1717_v29 = vrot.slane %v6251_v55, 2  ;;  %v1722_v34 = vrot.slane %v6199_v47, 6 }
 0x2ef   :  { %v1961_v43 = vsel %vm842_vm0, %v1960_v16, %v1959_v44  ;;  %v1716_v36 = vsel %vm839_vm15, %v1715_v21, %v1714_v35  ;;  %v1719_v22 = vrot.slane %v6257_v56, 1  ;;  %v1724_v45 = vrot.slane %v6195_v27, 5  ;;  %v5155_v21 = vld [vmem:[#allocation8 + $0x6c] ss:$16 sps:$4 sm:$0xff]  }
 0x2f0   :  { %v1963_v23 = vsel %vm845_vm2, %v1962_v24, %v1961_v43  ;;  %v1718_v53 = vsel %vm842_vm0, %v1717_v29, %v1716_v36  ;;  %v1723_v57 = vsel %vm830_vm12, %v1722_v34, %v1721_v58  ;;  %v1726_v20 = vrot.slane %v6226_v52, 4  ;;  %v5150_v43 = vld [vmem:[#allocation8 + $0x60] ss:$16 sps:$4 sm:$0xff]   ;;  %v5153_v36 = vld [vmem:[#allocation8 + $0x68] ss:$16 sps:$4 sm:$0xff]  }
 0x2f1   :  { %v1978_v4 = vpack.c.b16 %v1963_v23, %v1963_v23  ;;  %v6342_v9 = vsel %vm845_vm2, %v1719_v22, %v1718_v53  ;;  %v1725_v39 = vsel %vm833_vm13, %v1724_v45, %v1723_v57  ;;  %v1728_v40 = vrot.slane %v6254_v49, 3  ;;  %v5158_v45 = vld [vmem:[#allocation8 + $0x84] ss:$16 sps:$4 sm:$0xff]   ;;  %v5167_v23 = vld [vmem:[#allocation8 + $0xac] ss:$16 sps:$4 sm:$0xff]  }
 0x2f2   :  { %v6349_v10 = vsel %vm6299_vm4, 1.0, %v6490_v30  ;;  %v1727_v33 = vsel %vm836_vm14, %v1726_v20, %v1725_v39  ;;  %v1730_v58 = vrot.slane %v6259_v37, 2  ;;  %v1743_v12 = vsel %vm848_vm11, %v1742_v6, %v6193_v61  ;;  %v5162_v53 = vld [vmem:[#allocation8 + $0xa0] ss:$16 sps:$4 sm:$0xff]   ;;  %v5165_v57 = vld [vmem:[#allocation8 + $0xa8] ss:$16 sps:$4 sm:$0xff]  }
 0x2f3   :  { %2335 = vmatmul.mubr.bf16.vlgmr.msra.gmra.mrb[8].mxu0 %v1978_v4  ;;  %2376 = vmatmul.mubr.bf16.vlgmr.msra.gmra.mrb[8].mxu1 %v1978_v4  ;;  %v1729_v13 = vsel %vm839_vm15, %v1728_v40, %v1727_v33  ;;  %v1732_v2 = vrot.slane %v6266_v41, 1  ;;  %v1744_v25 = vrot.slane %v6203_v3, 6  ;;  %v1746_v15 = vrot.slane %v6249_v46, 5  ;;  %v5170_v20 = vld [vmem:[#allocation8 + $0xc4] ss:$16 sps:$4 sm:$0xff]  }
 0x2f4   :  { %2705 = vmatpush1.bf16.msra.mxu0 %v5132_v28  ;;  %2746 = vmatpush1.bf16.msra.mxu1 %v5135_v11  ;;  %v1731_v48 = vsel %vm842_vm0, %v1730_v58, %v1729_v13  ;;  %v1748_v8 = vrot.slane %v6251_v55, 4  ;;  %v1750_v61 = vrot.slane %v6257_v56, 3  ;;  %v1752_v46 = vrot.slane %v6279_v5, 2  ;;  %v5147_v5 = vld [vmem:[#allocation8 + $0x48] ss:$16 sps:$4 sm:$0xff]  }
 0x2f5   :  { %v1733_v6 = vsel %vm845_vm2, %v1732_v2, %v1731_v48  ;;  %2706 = vmatprep.subr.bf16.mxu0 %v5140_v54  ;;  %2747 = vmatprep.subr.bf16.mxu1 %v5143_v50  ;;  %v1745_v3 = vsel %vm830_vm12, %v1744_v25, %v1743_v12  ;;  %v1754_v63 = vrot.slane %v6195_v27, 7  ;;  %v1756_v55 = vrot.slane %v6226_v52, 6  ;;  %v5144_v27 = vld [vmem:[#allocation8 + $0x40] ss:$16 sps:$4 sm:$0xff]   ;;  %v5161_v28 = vld [vmem:[#allocation8 + $0x8c] ss:$16 sps:$4 sm:$0xff]  }
 0x2f6   :  { %v1737_v16 = vsel %vm207_vm1, 0.0, %v1733_v6  ;;  %v1747_v51 = vsel %vm833_vm13, %v1746_v15, %v1745_v3  ;;  %v1758_v56 = vrot.slane %v6254_v49, 5  ;;  %v1760_v59 = vrot.slane %v6259_v37, 4  ;;  %v5152_v49 = vld [vmem:[#allocation8 + $0x64] ss:$16 sps:$4 sm:$0xff]  }
 0x2f7   :  { %v1739_v32 = vmul.f32 %v6349_v10, %v1737_v16  ;;  %v1749_v62 = vsel %vm836_vm14, %v1748_v8, %v1747_v51  ;;  %v1755_v60 = vsel %vm848_vm11, %v1754_v63, %v6199_v47  ;;  %v1762_v37 = vrot.slane %v6266_v41, 3  ;;  %v5156_v41 = vld [vmem:[#allocation8 + $0x80] ss:$16 sps:$4 sm:$0xff]   ;;  %v5159_v11 = vld [vmem:[#allocation8 + $0x88] ss:$16 sps:$4 sm:$0xff]  }
 0x2f8   :  { %2707 = vmatpush1.bf16.msra.mxu0 %v5138_v18  ;;  %2748 = vmatpush1.bf16.msra.mxu1 %v5141_v0  ;;  %v1751_v24 = vsel %vm839_vm15, %v1750_v61, %v1749_v62  ;;  %v1757_v7 = vsel %vm830_vm12, %v1756_v55, %v1755_v60  ;;  %v1764_v29 = vrot.slane %v6275_v17, 2  ;;  %v5164_v17 = vld [vmem:[#allocation8 + $0xa4] ss:$16 sps:$4 sm:$0xff]   ;;  %v5173_v4 = vld [vmem:[#allocation8 + $0xcc] ss:$16 sps:$4 sm:$0xff]  }
 0x2f9   :  { %v1773_v52 = vpack.c.bf16 %v1739_v32, %v1739_v32  ;;  %2708 = vmatprep.subr.bf16.mxu0 %v5146_v31  ;;  %2749 = vmatprep.subr.bf16.mxu1 %v5149_v38  ;;  %v6378_v44 = vsel %vm842_vm0, %v1752_v46, %v1751_v24  ;;  %v1759_v47 = vsel %vm833_vm13, %v1758_v56, %v1757_v7  ;;  %v5168_v39 = vld [vmem:[#allocation8 + $0xc0] ss:$16 sps:$4 sm:$0xff]   ;;  %v5171_v40 = vld [vmem:[#allocation8 + $0xc8] ss:$16 sps:$4 sm:$0xff]   ;;  %v5176_v54 = vld [vmem:[#allocation8 + $0xe4] ss:$16 sps:$4 sm:$0xff]  }
 0x2fa   :  { %v1761_v35 = vsel %vm836_vm14, %v1760_v59, %v1759_v47  ;;  %v5179_v50 = vld [vmem:[#allocation8 + $0xec] ss:$16 sps:$4 sm:$0xff]   ;;  %v5174_v33 = vld [vmem:[#allocation8 + $0xe0] ss:$16 sps:$4 sm:$0xff]   ;;  %v5177_v58 = vld [vmem:[#allocation8 + $0xe8] ss:$16 sps:$4 sm:$0xff]  }
 0x2fb   :  { %2736 = vmatprep.mubr.bf16.mxu0 %v1773_v52  ;;  %2777 = vmatprep.mubr.bf16.mxu1 %v1773_v52  ;;  %v1763_v34 = vsel %vm839_vm15, %v1762_v37, %v1761_v35  ;;  %v5182_v12 = vld [vmem:[#allocation8 + $0x104] ss:$16 sps:$4 sm:$0xff]   ;;  %v5185_v13 = vld [vmem:[#allocation8 + $0x10c] ss:$16 sps:$4 sm:$0xff]   ;;  %v5180_v2 = vld [vmem:[#allocation8 + $0x100] ss:$16 sps:$4 sm:$0xff]  }
 0x2fc   :  { %2709 = vmatpush1.bf16.msra.mxu0 %v5144_v27  ;;  %2750 = vmatpush1.bf16.msra.mxu1 %v5147_v5  ;;  %v6386_v22 = vsel %vm842_vm0, %v1764_v29, %v1763_v34  ;;  %v5183_v25 = vld [vmem:[#allocation8 + $0x108] ss:$16 sps:$4 sm:$0xff]   ;;  %v5188_v15 = vld [vmem:[#allocation8 + $0x124] ss:$16 sps:$4 sm:$0xff]   ;;  %v5191_v48 = vld [vmem:[#allocation8 + $0x12c] ss:$16 sps:$4 sm:$0xff]  }
 0x2fd   :  { %2710 = vmatprep.subr.bf16.mxu0 %v5152_v49  ;;  %2751 = vmatprep.subr.bf16.mxu1 %v5155_v21  ;;  %v5186_v18 = vld [vmem:[#allocation8 + $0x120] ss:$16 sps:$4 sm:$0xff]   ;;  %v5189_v0 = vld [vmem:[#allocation8 + $0x128] ss:$16 sps:$4 sm:$0xff]   ;;  %v5194_v8 = vld [vmem:[#allocation8 + $0x144] ss:$16 sps:$4 sm:$0xff]  }
 0x2fe   :  { %v5197_v61 = vld [vmem:[#allocation8 + $0x14c] ss:$16 sps:$4 sm:$0xff]   ;;  %v5192_v6 = vld [vmem:[#allocation8 + $0x140] ss:$16 sps:$4 sm:$0xff]   ;;  %v5195_v31 = vld [vmem:[#allocation8 + $0x148] ss:$16 sps:$4 sm:$0xff]  }
 0x2ff   :  { %v5200_v38 = vld [vmem:[#allocation8 + $0x164] ss:$16 sps:$4 sm:$0xff]   ;;  %v5203_v3 = vld [vmem:[#allocation8 + $0x16c] ss:$16 sps:$4 sm:$0xff]   ;;  %v5198_v46 = vld [vmem:[#allocation8 + $0x160] ss:$16 sps:$4 sm:$0xff]  }
 0x300   :  { %2711 = vmatpush1.bf16.msra.mxu0 %v5150_v43  ;;  %2752 = vmatpush1.bf16.msra.mxu1 %v5153_v36  ;;  %v5201_v63 = vld [vmem:[#allocation8 + $0x168] ss:$16 sps:$4 sm:$0xff]   ;;  %v5206_v16 = vld [vmem:[#allocation8 + $0x184] ss:$16 sps:$4 sm:$0xff]   ;;  %v5209_v51 = vld [vmem:[#allocation8 + $0x18c] ss:$16 sps:$4 sm:$0xff]  }
 0x301   :  { %2712 = vmatprep.subr.bf16.mxu0 %v5158_v45  ;;  %2753 = vmatprep.subr.bf16.mxu1 %v5161_v28  ;;  %v5204_v55 = vld [vmem:[#allocation8 + $0x180] ss:$16 sps:$4 sm:$0xff]   ;;  %v5207_v56 = vld [vmem:[#allocation8 + $0x188] ss:$16 sps:$4 sm:$0xff]   ;;  %v5212_v32 = vld [vmem:[#allocation8 + $0x1a4] ss:$16 sps:$4 sm:$0xff]  }
 0x302   :  { %v5215_v62 = vld [vmem:[#allocation8 + $0x1ac] ss:$16 sps:$4 sm:$0xff]   ;;  %v5210_v60 = vld [vmem:[#allocation8 + $0x1a0] ss:$16 sps:$4 sm:$0xff]   ;;  %v5213_v59 = vld [vmem:[#allocation8 + $0x1a8] ss:$16 sps:$4 sm:$0xff]  }
 0x303   :  { %v5218_v27 = vld [vmem:[#allocation8 + $0x1c4] ss:$16 sps:$4 sm:$0xff]   ;;  %v5221_v5 = vld [vmem:[#allocation8 + $0x1cc] ss:$16 sps:$4 sm:$0xff]   ;;  %v5216_v24 = vld [vmem:[#allocation8 + $0x1c0] ss:$16 sps:$4 sm:$0xff]  }
 0x304   :  { %2713 = vmatpush1.bf16.msra.mxu0 %v5156_v41  ;;  %2754 = vmatpush1.bf16.msra.mxu1 %v5159_v11  ;;  %v5219_v7 = vld [vmem:[#allocation8 + $0x1c8] ss:$16 sps:$4 sm:$0xff]   ;;  %v5224_v52 = vld [vmem:[#allocation8 + $0x1e4] ss:$16 sps:$4 sm:$0xff]   ;;  %v5227_v49 = vld [vmem:[#allocation8 + $0x1ec] ss:$16 sps:$4 sm:$0xff]  }
 0x305   :  { %2714 = vmatprep.subr.bf16.mxu0 %v5164_v17  ;;  %2755 = vmatprep.subr.bf16.mxu1 %v5167_v23  ;;  %v1736_v21 = vsel %vm207_vm1, 0.0, %v6342_v9  ;;  %v1769_v47 = vsel %vm224_vm5, %v6386_v22, 0.0  ;;  %v5222_v37 = vld [vmem:[#allocation8 + $0x1e0] ss:$16 sps:$4 sm:$0xff]   ;;  %v5225_v35 = vld [vmem:[#allocation8 + $0x1e8] ss:$16 sps:$4 sm:$0xff]  }
 0x306   :  { %v1738_v29 = vmul.f32 %v6349_v10, %v1736_v21  ;;  %v5230_v34 = vld [vmem:[#allocation8 + $0x404] ss:$16 sps:$4 sm:$0xff]   ;;  %v5233_v43 = vld [vmem:[#allocation8 + $0x40c] ss:$16 sps:$4 sm:$0xff]   ;;  %v6396_v36 = vsel %vm1691_vm6, 1.0, %v6490_v30  ;;  %vm3308_vm1 = vcmask 1043456  }
 0x307   :  { %v1771_v9 = vmul.f32 %v6396_v36, %v1769_v47  ;;  %v5231_v22 = vld [vmem:[#allocation8 + $0x408] ss:$16 sps:$4 sm:$0xff]   ;;  %v5236_v41 = vld [vmem:[#allocation8 + $0x424] ss:$16 sps:$4 sm:$0xff]   ;;  %v5239_v11 = vld [vmem:[#allocation8 + $0x42c] ss:$16 sps:$4 sm:$0xff]  }
 0x308   :  { %2715 = vmatpush1.bf16.msra.mxu0 %v5162_v53  ;;  %2756 = vmatpush1.bf16.msra.mxu1 %v5165_v57  ;;  %v1772_v45 = vpack.c.bf16 %v1738_v29, %v1738_v29  ;;  %v5234_v10 = vld [vmem:[#allocation8 + $0x420] ss:$16 sps:$4 sm:$0xff]   ;;  %v5237_v30 = vld [vmem:[#allocation8 + $0x428] ss:$16 sps:$4 sm:$0xff]   ;;  %v5242_v17 = vld [vmem:[#allocation8 + $0x444] ss:$16 sps:$4 sm:$0xff]  }
 0x309   :  { %2716 = vmatprep.subr.bf16.mxu0 %v5170_v20  ;;  %2757 = vmatprep.subr.bf16.mxu1 %v5173_v4  ;;  %v2787_v28 = vpack.c.bf16 %v1771_v9, %v1771_v9  ;;  %v5245_v23 = vld [vmem:[#allocation8 + $0x44c] ss:$16 sps:$4 sm:$0xff]   ;;  %v5240_v53 = vld [vmem:[#allocation8 + $0x440] ss:$16 sps:$4 sm:$0xff]   ;;  %v5243_v57 = vld [vmem:[#allocation8 + $0x448] ss:$16 sps:$4 sm:$0xff]  }
 0x30a   :  { %v5248_v20 = vld [vmem:[#allocation8 + $0x464] ss:$16 sps:$4 sm:$0xff]   ;;  %v5251_v4 = vld [vmem:[#allocation8 + $0x46c] ss:$16 sps:$4 sm:$0xff]   ;;  %v5300_v21 = vld [vmem:[#allocation8 + $0x580] ss:$16 sps:$4 sm:$0xff]  }
 0x30b   :  { %v5303_v47 = vld [vmem:[#allocation8 + $0x588] ss:$16 sps:$4 sm:$0xff]   ;;  %v5306_v29 = vld [vmem:[#allocation8 + $0x5a0] ss:$16 sps:$4 sm:$0xff]   ;;  %v5317_v9 = vld [vmem:[#allocation8 + $0x5cc] ss:$16 sps:$4 sm:$0xff]  }
 0x30c   :  { %2717 = vmatpush1.bf16.msra.mxu0 %v5168_v39  ;;  %2758 = vmatpush1.bf16.msra.mxu1 %v5171_v40  ;;  %v5246_v39 = vld [vmem:[#allocation8 + $0x460] ss:$16 sps:$4 sm:$0xff]   ;;  %v5249_v40 = vld [vmem:[#allocation8 + $0x468] ss:$16 sps:$4 sm:$0xff]  }
 0x30d   :  { %2718 = vmatprep.subr.bf16.mxu0 %v5176_v54  ;;  %2759 = vmatprep.subr.bf16.mxu1 %v5179_v50  ;;  %v5254_v54 = vld [vmem:[#allocation8 + $0x484] ss:$16 sps:$4 sm:$0xff]   ;;  %v5257_v50 = vld [vmem:[#allocation8 + $0x48c] ss:$16 sps:$4 sm:$0xff]  }
 0x310   :  { %2719 = vmatpush1.bf16.msra.mxu0 %v5174_v33  ;;  %2760 = vmatpush1.bf16.msra.mxu1 %v5177_v58  ;;  %v5252_v33 = vld [vmem:[#allocation8 + $0x480] ss:$16 sps:$4 sm:$0xff]   ;;  %v5255_v58 = vld [vmem:[#allocation8 + $0x488] ss:$16 sps:$4 sm:$0xff]  }
 0x311   :  { %2720 = vmatprep.subr.bf16.mxu0 %v5182_v12  ;;  %2761 = vmatprep.subr.bf16.mxu1 %v5185_v13  ;;  %v5260_v12 = vld [vmem:[#allocation8 + $0x4a4] ss:$16 sps:$4 sm:$0xff]   ;;  %v5263_v13 = vld [vmem:[#allocation8 + $0x4ac] ss:$16 sps:$4 sm:$0xff]  }
 0x314   :  { %2721 = vmatpush1.bf16.msra.mxu0 %v5180_v2  ;;  %2762 = vmatpush1.bf16.msra.mxu1 %v5183_v25  ;;  %v5258_v2 = vld [vmem:[#allocation8 + $0x4a0] ss:$16 sps:$4 sm:$0xff]   ;;  %v5261_v25 = vld [vmem:[#allocation8 + $0x4a8] ss:$16 sps:$4 sm:$0xff]  }
 0x315   :  { %2722 = vmatprep.subr.bf16.mxu0 %v5188_v15  ;;  %2763 = vmatprep.subr.bf16.mxu1 %v5191_v48  ;;  %v5266_v15 = vld [vmem:[#allocation8 + $0x4c4] ss:$16 sps:$4 sm:$0xff]   ;;  %v5269_v48 = vld [vmem:[#allocation8 + $0x4cc] ss:$16 sps:$4 sm:$0xff]  }
 0x318   :  { %2723 = vmatpush1.bf16.msra.mxu0 %v5186_v18  ;;  %2764 = vmatpush1.bf16.msra.mxu1 %v5189_v0  ;;  %v5264_v18 = vld [vmem:[#allocation8 + $0x4c0] ss:$16 sps:$4 sm:$0xff]   ;;  %v5267_v0 = vld [vmem:[#allocation8 + $0x4c8] ss:$16 sps:$4 sm:$0xff]  }
 0x319   :  { %2724 = vmatprep.subr.bf16.mxu0 %v5194_v8  ;;  %2765 = vmatprep.subr.bf16.mxu1 %v5197_v61  ;;  %v5272_v8 = vld [vmem:[#allocation8 + $0x4e4] ss:$16 sps:$4 sm:$0xff]   ;;  %v5275_v61 = vld [vmem:[#allocation8 + $0x4ec] ss:$16 sps:$4 sm:$0xff]  }
 0x31c   :  { %2725 = vmatpush1.bf16.msra.mxu0 %v5192_v6  ;;  %2766 = vmatpush1.bf16.msra.mxu1 %v5195_v31  ;;  %v5270_v6 = vld [vmem:[#allocation8 + $0x4e0] ss:$16 sps:$4 sm:$0xff]   ;;  %v5273_v31 = vld [vmem:[#allocation8 + $0x4e8] ss:$16 sps:$4 sm:$0xff]  }
 0x31d   :  { %2726 = vmatprep.subr.bf16.mxu0 %v5200_v38  ;;  %2767 = vmatprep.subr.bf16.mxu1 %v5203_v3  ;;  %v5278_v38 = vld [vmem:[#allocation8 + $0x504] ss:$16 sps:$4 sm:$0xff]   ;;  %v5281_v3 = vld [vmem:[#allocation8 + $0x50c] ss:$16 sps:$4 sm:$0xff]  }
 0x320   :  { %2727 = vmatpush1.bf16.msra.mxu0 %v5198_v46  ;;  %2768 = vmatpush1.bf16.msra.mxu1 %v5201_v63  ;;  %v5276_v46 = vld [vmem:[#allocation8 + $0x500] ss:$16 sps:$4 sm:$0xff]   ;;  %v5279_v63 = vld [vmem:[#allocation8 + $0x508] ss:$16 sps:$4 sm:$0xff]  }
 0x321   :  { %2728 = vmatprep.subr.bf16.mxu0 %v5206_v16  ;;  %2769 = vmatprep.subr.bf16.mxu1 %v5209_v51  ;;  %v5284_v16 = vld [vmem:[#allocation8 + $0x524] ss:$16 sps:$4 sm:$0xff]   ;;  %v5287_v51 = vld [vmem:[#allocation8 + $0x52c] ss:$16 sps:$4 sm:$0xff]  }
 0x324   :  { %2729 = vmatpush1.bf16.msra.mxu0 %v5204_v55  ;;  %2770 = vmatpush1.bf16.msra.mxu1 %v5207_v56  ;;  %v5282_v55 = vld [vmem:[#allocation8 + $0x520] ss:$16 sps:$4 sm:$0xff]   ;;  %v5285_v56 = vld [vmem:[#allocation8 + $0x528] ss:$16 sps:$4 sm:$0xff]  }
 0x325   :  { %2730 = vmatprep.subr.bf16.mxu0 %v5212_v32  ;;  %2771 = vmatprep.subr.bf16.mxu1 %v5215_v62  ;;  %v5290_v32 = vld [vmem:[#allocation8 + $0x544] ss:$16 sps:$4 sm:$0xff]   ;;  %v5293_v62 = vld [vmem:[#allocation8 + $0x54c] ss:$16 sps:$4 sm:$0xff]  }
 0x328   :  { %2731 = vmatpush1.bf16.msra.mxu0 %v5210_v60  ;;  %2772 = vmatpush1.bf16.msra.mxu1 %v5213_v59  ;;  %v5288_v60 = vld [vmem:[#allocation8 + $0x540] ss:$16 sps:$4 sm:$0xff]   ;;  %v5291_v59 = vld [vmem:[#allocation8 + $0x548] ss:$16 sps:$4 sm:$0xff]  }
 0x329   :  { %2732 = vmatprep.subr.bf16.mxu0 %v5218_v27  ;;  %2773 = vmatprep.subr.bf16.mxu1 %v5221_v5  ;;  %v5296_v27 = vld [vmem:[#allocation8 + $0x564] ss:$16 sps:$4 sm:$0xff]   ;;  %v5299_v5 = vld [vmem:[#allocation8 + $0x56c] ss:$16 sps:$4 sm:$0xff]  }
 0x32c   :  { %2733 = vmatpush1.bf16.msra.mxu0 %v5216_v24  ;;  %2774 = vmatpush1.bf16.msra.mxu1 %v5219_v7  ;;  %v5294_v24 = vld [vmem:[#allocation8 + $0x560] ss:$16 sps:$4 sm:$0xff]   ;;  %v5297_v7 = vld [vmem:[#allocation8 + $0x568] ss:$16 sps:$4 sm:$0xff]  }
 0x32d   :  { %2734 = vmatprep.subr.bf16.mxu0 %v5224_v52  ;;  %2775 = vmatprep.subr.bf16.mxu1 %v5227_v49  ;;  %v5302_v52 = vld [vmem:[#allocation8 + $0x584] ss:$16 sps:$4 sm:$0xff]   ;;  %v5305_v49 = vld [vmem:[#allocation8 + $0x58c] ss:$16 sps:$4 sm:$0xff]  }
 0x330   :  { %2735 = vmatpush1.bf16.msra.mxu0 %v5222_v37  ;;  %2776 = vmatpush1.bf16.msra.mxu1 %v5225_v35  ;;  %v5308_v37 = vld [vmem:[#allocation8 + $0x5a4] ss:$16 sps:$4 sm:$0xff]   ;;  %v5311_v35 = vld [vmem:[#allocation8 + $0x5ac] ss:$16 sps:$4 sm:$0xff]  }
 0x331   :  { %3172 = vmatprep.subr.bf16.mxu0 %v5230_v34  ;;  %3213 = vmatprep.subr.bf16.mxu1 %v5233_v43  ;;  %v5309_v34 = vld [vmem:[#allocation8 + $0x5a8] ss:$16 sps:$4 sm:$0xff]   ;;  %v5314_v43 = vld [vmem:[#allocation8 + $0x5c4] ss:$16 sps:$4 sm:$0xff]  }
 0x333   :  { %2737 = vmatmul.mubr.bf16.vlgmr.msra.gmra.mrb[12].mxu0 %v1772_v45  ;;  %2778 = vmatmul.mubr.bf16.vlgmr.msra.gmra.mrb[12].mxu1 %v1772_v45  ;;  %v5315_v45 = vld [vmem:[#allocation8 + $0x5c8] ss:$16 sps:$4 sm:$0xff]  }
 0x334   :  { %3173 = vmatpush1.bf16.msra.mxu0 %v5228_v14  ;;  %3204 = vmatprep.mubr.bf16.mxu0 %v2787_v28  ;;  %v5312_v14 = vld [vmem:[#allocation8 + $0x5c0] ss:$16 sps:$4 sm:$0xff]  }
 0x335   :  { %3214 = vmatpush1.bf16.msra.mxu1 %v5231_v22  ;;  %3245 = vmatprep.mubr.bf16.mxu1 %v2787_v28  ;;  %v5320_v22 = vld [vmem:[#allocation8 + $0x5e4] ss:$16 sps:$4 sm:$0xff]   ;;  %v1768_v28 = vsel %vm224_vm5, %v6378_v44, 0.0  ;;  %v5327_v44 = vld [vmem:[#allocation10 + $0x10] ss:$8 sps:$4 sm:$0xff]  }
 0x336   :  { %3174 = vmatprep.subr.bf16.mxu0 %v5236_v41  ;;  %3215 = vmatprep.subr.bf16.mxu1 %v5239_v11  ;;  %v5323_v41 = vld [vmem:[#allocation8 + $0x5ec] ss:$16 sps:$4 sm:$0xff]   ;;  %v5318_v11 = vld [vmem:[#allocation8 + $0x5e0] ss:$16 sps:$4 sm:$0xff]  }
 0x338   :  { %3175 = vmatpush1.bf16.msra.mxu0 %v5234_v10  ;;  %v1770_v10 = vmul.f32 %v6396_v36, %v1768_v28  ;;  %v5335_v36 = vld [vmem:[#allocation10 + $0x34] ss:$8 sps:$4 sm:$0xff]  }
 0x339   :  { %3216 = vmatpush1.bf16.msra.mxu1 %v5237_v30  ;;  %3176 = vmatprep.subr.bf16.mxu0 %v5242_v17  ;;  %v5321_v30 = vld [vmem:[#allocation8 + $0x5e8] ss:$16 sps:$4 sm:$0xff]   ;;  %v5422_v28 = vld [vmem:[#allocation11 + $0x4] ss:$16 sps:$4 sm:$0xff]  }
 0x33a   :  { %3217 = vmatprep.subr.bf16.mxu1 %v5245_v23  ;;  %v2786_v17 = vpack.c.bf16 %v1770_v10, %v1770_v10  ;;  %v5324_v23 = vld [vmem:[#allocation10] ss:$8 sps:$4 sm:$0xff]   ;;  %v5428_v10 = vld [vmem:[#allocation11 + $0x44] ss:$16 sps:$4 sm:$0xff]  }
 0x33c   :  { %3177 = vmatpush1.bf16.msra.mxu0 %v5240_v53  ;;  %v5326_v53 = vld [vmem:[#allocation10 + $0x4] ss:$8 sps:$4 sm:$0xff]  }
 0x33d   :  { %3218 = vmatpush1.bf16.msra.mxu1 %v5243_v57  ;;  %3178 = vmatprep.subr.bf16.mxu0 %v5248_v20  ;;  %v5329_v57 = vld [vmem:[#allocation10 + $0x14] ss:$8 sps:$4 sm:$0xff]   ;;  %v5332_v20 = vld [vmem:[#allocation10 + $0x24] ss:$8 sps:$4 sm:$0xff]  }
 0x33e   :  { %3219 = vmatprep.subr.bf16.mxu1 %v5251_v4  ;;  %v5330_v4 = vld [vmem:[#allocation10 + $0x20] ss:$8 sps:$4 sm:$0xff]  }
 0x340   :  { %3179 = vmatpush1.bf16.msra.mxu0 %v5246_v39  ;;  %v5333_v39 = vld [vmem:[#allocation10 + $0x30] ss:$8 sps:$4 sm:$0xff]  }
 0x341   :  { %3220 = vmatpush1.bf16.msra.mxu1 %v5249_v40  ;;  %3180 = vmatprep.subr.bf16.mxu0 %v5254_v54  ;;  %v5338_v40 = vld [vmem:[#allocation10 + $0x44] ss:$8 sps:$4 sm:$0xff]   ;;  %v5336_v54 = vld [vmem:[#allocation10 + $0x40] ss:$8 sps:$4 sm:$0xff]  }
 0x342   :  { %3221 = vmatprep.subr.bf16.mxu1 %v5257_v50  ;;  %v5341_v50 = vld [vmem:[#allocation10 + $0x54] ss:$8 sps:$4 sm:$0xff]  }
 0x344   :  { %3181 = vmatpush1.bf16.msra.mxu0 %v5252_v33  ;;  %v5339_v33 = vld [vmem:[#allocation10 + $0x50] ss:$8 sps:$4 sm:$0xff]  }
 0x345   :  { %3222 = vmatpush1.bf16.msra.mxu1 %v5255_v58  ;;  %3182 = vmatprep.subr.bf16.mxu0 %v5260_v12  ;;  %v5344_v58 = vld [vmem:[#allocation10 + $0x64] ss:$8 sps:$4 sm:$0xff]   ;;  %v5342_v12 = vld [vmem:[#allocation10 + $0x60] ss:$8 sps:$4 sm:$0xff]  }
 0x346   :  { %3223 = vmatprep.subr.bf16.mxu1 %v5263_v13  ;;  %v5347_v13 = vld [vmem:[#allocation10 + $0x74] ss:$8 sps:$4 sm:$0xff]  }
 0x348   :  { %3183 = vmatpush1.bf16.msra.mxu0 %v5258_v2  ;;  %v5345_v2 = vld [vmem:[#allocation10 + $0x70] ss:$8 sps:$4 sm:$0xff]  }
 0x349   :  { %3224 = vmatpush1.bf16.msra.mxu1 %v5261_v25  ;;  %3184 = vmatprep.subr.bf16.mxu0 %v5266_v15 }
 0x34a   :  { %3225 = vmatprep.subr.bf16.mxu1 %v5269_v48 }
 0x34c   :  { %3185 = vmatpush1.bf16.msra.mxu0 %v5264_v18 }
 0x34d   :  { %3226 = vmatpush1.bf16.msra.mxu1 %v5267_v0  ;;  %3186 = vmatprep.subr.bf16.mxu0 %v5272_v8 }
 0x34e   :  { %3227 = vmatprep.subr.bf16.mxu1 %v5275_v61 }
 0x350   :  { %3187 = vmatpush1.bf16.msra.mxu0 %v5270_v6 }
 0x351   :  { %3228 = vmatpush1.bf16.msra.mxu1 %v5273_v31  ;;  %3188 = vmatprep.subr.bf16.mxu0 %v5278_v38  ;;  %v5348_v31 = vld [vmem:[#allocation10 + $0x80] ss:$8 sps:$4 sm:$0xff]   ;;  %v5350_v38 = vld [vmem:[#allocation10 + $0x84] ss:$8 sps:$4 sm:$0xff]  }
 0x352   :  { %3229 = vmatprep.subr.bf16.mxu1 %v5281_v3  ;;  %v5351_v3 = vld [vmem:[#allocation10 + $0x90] ss:$8 sps:$4 sm:$0xff]  }
 0x354   :  { %3189 = vmatpush1.bf16.msra.mxu0 %v5276_v46  ;;  %v5353_v46 = vld [vmem:[#allocation10 + $0x94] ss:$8 sps:$4 sm:$0xff]  }
 0x355   :  { %3230 = vmatpush1.bf16.msra.mxu1 %v5279_v63  ;;  %3190 = vmatprep.subr.bf16.mxu0 %v5284_v16  ;;  %v5356_v63 = vld [vmem:[#allocation10 + $0xa4] ss:$8 sps:$4 sm:$0xff]   ;;  %v5354_v16 = vld [vmem:[#allocation10 + $0xa0] ss:$8 sps:$4 sm:$0xff]  }
 0x356   :  { %3231 = vmatprep.subr.bf16.mxu1 %v5287_v51  ;;  %v5359_v51 = vld [vmem:[#allocation10 + $0xb4] ss:$8 sps:$4 sm:$0xff]  }
 0x358   :  { %3191 = vmatpush1.bf16.msra.mxu0 %v5282_v55  ;;  %v5357_v55 = vld [vmem:[#allocation10 + $0xb0] ss:$8 sps:$4 sm:$0xff]  }
 0x359   :  { %3232 = vmatpush1.bf16.msra.mxu1 %v5285_v56  ;;  %3192 = vmatprep.subr.bf16.mxu0 %v5290_v32  ;;  %v5362_v56 = vld [vmem:[#allocation10 + $0xc4] ss:$8 sps:$4 sm:$0xff]   ;;  %v5360_v32 = vld [vmem:[#allocation10 + $0xc0] ss:$8 sps:$4 sm:$0xff]  }
 0x35a   :  { %3233 = vmatprep.subr.bf16.mxu1 %v5293_v62  ;;  %v5365_v62 = vld [vmem:[#allocation10 + $0xd4] ss:$8 sps:$4 sm:$0xff]  }
 0x35c   :  { %3193 = vmatpush1.bf16.msra.mxu0 %v5288_v60  ;;  %v5363_v60 = vld [vmem:[#allocation10 + $0xd0] ss:$8 sps:$4 sm:$0xff]  }
 0x35d   :  { %3234 = vmatpush1.bf16.msra.mxu1 %v5291_v59  ;;  %3194 = vmatprep.subr.bf16.mxu0 %v5296_v27  ;;  %v5368_v59 = vld [vmem:[#allocation10 + $0xe4] ss:$8 sps:$4 sm:$0xff]   ;;  %v5366_v27 = vld [vmem:[#allocation10 + $0xe0] ss:$8 sps:$4 sm:$0xff]  }
 0x35e   :  { %3235 = vmatprep.subr.bf16.mxu1 %v5299_v5  ;;  %v5371_v5 = vld [vmem:[#allocation10 + $0xf4] ss:$8 sps:$4 sm:$0xff]  }
 0x360   :  { %3195 = vmatpush1.bf16.msra.mxu0 %v5294_v24  ;;  %v5369_v24 = vld [vmem:[#allocation10 + $0xf0] ss:$8 sps:$4 sm:$0xff]  }
 0x361   :  { %3236 = vmatpush1.bf16.msra.mxu1 %v5297_v7  ;;  %3196 = vmatprep.subr.bf16.mxu0 %v5302_v52  ;;  %v5374_v7 = vld [vmem:[#allocation10 + $0x104] ss:$8 sps:$4 sm:$0xff]  }
 0x362   :  { %3237 = vmatprep.subr.bf16.mxu1 %v5305_v49 }
 0x364   :  { %3197 = vmatpush1.bf16.msra.mxu0 %v5300_v21 }
 0x365   :  { %3238 = vmatpush1.bf16.msra.mxu1 %v5303_v47  ;;  %3198 = vmatprep.subr.bf16.mxu0 %v5308_v37 }
 0x366   :  { %3239 = vmatprep.subr.bf16.mxu1 %v5311_v35 }
 0x368   :  { %3199 = vmatpush1.bf16.msra.mxu0 %v5306_v29 }
 0x369   :  { %3240 = vmatpush1.bf16.msra.mxu1 %v5309_v34  ;;  %3200 = vmatprep.subr.bf16.mxu0 %v5314_v43 }
 0x36a   :  { %3241 = vmatprep.subr.bf16.mxu1 %v5317_v9 }
 0x36c   :  { %3201 = vmatpush1.bf16.msra.mxu0 %v5312_v14 }
 0x36d   :  { %3242 = vmatpush1.bf16.msra.mxu1 %v5315_v45  ;;  %3202 = vmatprep.subr.bf16.mxu0 %v5320_v22  ;;  %v5420_v22 = vld [vmem:[#allocation11] ss:$16 sps:$4 sm:$0xff]  }
 0x36e   :  { %3243 = vmatprep.subr.bf16.mxu1 %v5323_v41  ;;  %v5425_v41 = vld [vmem:[#allocation11 + $0x24] ss:$16 sps:$4 sm:$0xff]  }
 0x370   :  { %3203 = vmatpush1.bf16.msra.mxu0 %v5318_v11  ;;  %v5423_v11 = vld [vmem:[#allocation11 + $0x20] ss:$16 sps:$4 sm:$0xff]  }
 0x371   :  { %3244 = vmatpush1.bf16.msra.mxu1 %v5321_v30  ;;  %3806 = vmatprep.subr.bf16.mxu0 %v5326_v53  ;;  %v5426_v30 = vld [vmem:[#allocation11 + $0x40] ss:$16 sps:$4 sm:$0xff]   ;;  %v5434_v53 = vld [vmem:[#allocation11 + $0x84] ss:$16 sps:$4 sm:$0xff]  }
 0x372   :  { %4298 = vmatprep.subr.bf16.mxu1 %v5422_v28 }
 0x373   :  { %3205 = vmatmul.mubr.bf16.vlgmr.msra.gmra.mrb[16].mxu0 %v2786_v17 }
 0x374   :  { %3246 = vmatmul.mubr.bf16.vlgmr.msra.gmra.mrb[16].mxu1 %v2786_v17  ;;  %3807 = vmatpush1.bf16.msra.mxu0 %v5324_v23  ;;  %v5431_v17 = vld [vmem:[#allocation11 + $0x64] ss:$16 sps:$4 sm:$0xff]   ;;  %v5429_v23 = vld [vmem:[#allocation11 + $0x60] ss:$16 sps:$4 sm:$0xff]  }
 0x375   :  { %3808 = vmatprep.subr.bf16.mxu0 %v5329_v57  ;;  %4299 = vmatpush1.bf16.msra.mxu1 %v5420_v22  ;;  %v5432_v57 = vld [vmem:[#allocation11 + $0x80] ss:$16 sps:$4 sm:$0xff]  }
 0x376   :  { %4300 = vmatprep.subr.bf16.mxu1 %v5425_v41 }
 0x378   :  { %3809 = vmatpush1.bf16.msra.mxu0 %v5327_v44  ;;  %v5437_v44 = vld [vmem:[#allocation11 + $0xa4] ss:$16 sps:$4 sm:$0xff]  }
 0x379   :  { %3810 = vmatprep.subr.bf16.mxu0 %v5332_v20  ;;  %4301 = vmatpush1.bf16.msra.mxu1 %v5423_v11  ;;  %v5435_v20 = vld [vmem:[#allocation11 + $0xa0] ss:$16 sps:$4 sm:$0xff]  }
 0x37a   :  { %4302 = vmatprep.subr.bf16.mxu1 %v5428_v10 }
 0x37c   :  { %3811 = vmatpush1.bf16.msra.mxu0 %v5330_v4  ;;  %v5440_v4 = vld [vmem:[#allocation11 + $0xc4] ss:$16 sps:$4 sm:$0xff]  }
 0x37d   :  { %3812 = vmatprep.subr.bf16.mxu0 %v5335_v36  ;;  %4303 = vmatpush1.bf16.msra.mxu1 %v5426_v30  ;;  %v5438_v36 = vld [vmem:[#allocation11 + $0xc0] ss:$16 sps:$4 sm:$0xff]  }
 0x37e   :  { %4304 = vmatprep.subr.bf16.mxu1 %v5431_v17 }
 0x380   :  { %3813 = vmatpush1.bf16.msra.mxu0 %v5333_v39  ;;  %v5443_v39 = vld [vmem:[#allocation11 + $0xe4] ss:$16 sps:$4 sm:$0xff]  }
 0x381   :  { %3814 = vmatprep.subr.bf16.mxu0 %v5338_v40  ;;  %4305 = vmatpush1.bf16.msra.mxu1 %v5429_v23  ;;  %v3258_v40 = vld [vmem:[%s6471_s6] sm:$0xf] }
 0x382   :  { %4306 = vmatprep.subr.bf16.mxu1 %v5434_v53 }
 0x384   :  { %3815 = vmatpush1.bf16.msra.mxu0 %v5336_v54  ;;  %v3270_v54 = vsub.s32 2, %v5853_v1 }
 0x385   :  { %3816 = vmatprep.subr.bf16.mxu0 %v5341_v50  ;;  %4307 = vmatpush1.bf16.msra.mxu1 %v5432_v57  ;;  %v5441_v50 = vld [vmem:[#allocation11 + $0xe0] ss:$16 sps:$4 sm:$0xff]  }
 0x386   :  { %4308 = vmatprep.subr.bf16.mxu1 %v5437_v44  ;;  %v5453_v44 = vld [vmem:[#allocation11 + $0x160] ss:$16 sps:$4 sm:$0xff]  }
 0x388   :  { %3817 = vmatpush1.bf16.msra.mxu0 %v5339_v33  ;;  %v3274_v33 = vsub.s32 3, %v5853_v1 }
 0x389   :  { %3818 = vmatprep.subr.bf16.mxu0 %v5344_v58  ;;  %4309 = vmatpush1.bf16.msra.mxu1 %v5435_v20  ;;  %v5446_v58 = vld [vmem:[#allocation11 + $0x104] ss:$16 sps:$4 sm:$0xff]  }
 0x38a   :  { %4310 = vmatprep.subr.bf16.mxu1 %v5440_v4 }
 0x38c   :  { %3819 = vmatpush1.bf16.msra.mxu0 %v5342_v12  ;;  %v3263_v12 = vrot.slane %v3258_v40, %v6143_v19 }
 0x38d   :  { %3820 = vmatprep.subr.bf16.mxu0 %v5347_v13  ;;  %4311 = vmatpush1.bf16.msra.mxu1 %v5438_v36 }
 0x38e   :  { %4312 = vmatprep.subr.bf16.mxu1 %v5443_v39 }
 0x390   :  { %3821 = vmatpush1.bf16.msra.mxu0 %v5345_v2  ;;  %v3271_v2 = vrot.slane %v3258_v40, %v3270_v54 }
 0x391   :  { %3822 = vmatprep.subr.bf16.mxu0 %v5350_v38  ;;  %4313 = vmatpush1.bf16.msra.mxu1 %v5441_v50 }
 0x392   :  { %4314 = vmatprep.subr.bf16.mxu1 %v5446_v58 }
 0x394   :  { %3823 = vmatpush1.bf16.msra.mxu0 %v5348_v31 }
 0x395   :  { %3824 = vmatprep.subr.bf16.mxu0 %v5353_v46 }
 0x398   :  { %3825 = vmatpush1.bf16.msra.mxu0 %v5351_v3 }
 0x399   :  { %3826 = vmatprep.subr.bf16.mxu0 %v5356_v63 }
 0x39c   :  { %3827 = vmatpush1.bf16.msra.mxu0 %v5354_v16 }
 0x39d   :  { %3828 = vmatprep.subr.bf16.mxu0 %v5359_v51 }
 0x3a0   :  { %3829 = vmatpush1.bf16.msra.mxu0 %v5357_v55 }
 0x3a1   :  { %3830 = vmatprep.subr.bf16.mxu0 %v5362_v56 }
 0x3a4   :  { %3831 = vmatpush1.bf16.msra.mxu0 %v5360_v32 }
 0x3a5   :  { %3832 = vmatprep.subr.bf16.mxu0 %v5365_v62  ;;  %v5447_v62 = vld [vmem:[#allocation11 + $0x120] ss:$16 sps:$4 sm:$0xff]  }
 0x3a8   :  { %3833 = vmatpush1.bf16.msra.mxu0 %v5363_v60 }
 0x3a9   :  { %3834 = vmatprep.subr.bf16.mxu0 %v5368_v59 }
 0x3ac   :  { %3835 = vmatpush1.bf16.msra.mxu0 %v5366_v27  ;;  %v5452_v27 = vld [vmem:[#allocation11 + $0x144] ss:$16 sps:$4 sm:$0xff]  }
 0x3ad   :  { %3836 = vmatprep.subr.bf16.mxu0 %v5371_v5 }
 0x3b0   :  { %3837 = vmatpush1.bf16.msra.mxu0 %v5369_v24 }
 0x3b1   :  { %3847 = vmatprep.subr.bf16.mxu0 %v5374_v7 }
 0x3c6   :  { %v2336_v25 = vpop.f32.mrb[8].mxu0  ;;  %v2377_v15 = vpop.f32.mrb[8].mxu1 }
 0x3c7   :  { %v2338_v48 = vpop.f32.mrb[9].mxu0  ;;  %v2379_v18 = vpop.f32.mrb[9].mxu1 }
 0x3c8   :  { %v2340_v0 = vpop.f32.mrb[10].mxu0  ;;  %v2381_v8 = vpop.f32.mrb[10].mxu1 }
 0x3c9   :  { %v2341_v61 = vpop.f32.mrb[11].mxu0  ;;  %v2382_v6 = vpop.f32.mrb[11].mxu1  ;;  %v3275_v8 = vrot.slane %v3258_v40, %v3274_v33 }
 0x3ca   :  { %v5449_v61 = vld [vmem:[#allocation11 + $0x124] ss:$16 sps:$4 sm:$0xff]  }
 0x406   :  { %v2738_v52 = vpop.f32.mrb[12].mxu0  ;;  %v2779_v49 = vpop.f32.mrb[12].mxu1 }
 0x407   :  { %v2739_v21 = vadd.f32 %v2738_v52, %v2336_v25  ;;  %v2780_v47 = vadd.f32 %v2779_v49, %v2377_v15  ;;  %v2740_v37 = vpop.f32.mrb[13].mxu0  ;;  %v2781_v35 = vpop.f32.mrb[13].mxu1  ;;  %v3267_v25 = vrot.slane %v3258_v40, %v6146_v26  ;;  %v5444_v15 = vld [vmem:[#allocation11 + $0x100] ss:$16 sps:$4 sm:$0xff]   ;;  %v5458_v40 = vld [vmem:[#allocation11 + $0x184] ss:$16 sps:$4 sm:$0xff]  }
 0x408   :  { %v2741_v29 = vadd.f32 %v2740_v37, %v2338_v48  ;;  %v2782_v34 = vadd.f32 %v2781_v35, %v2379_v18  ;;  %v2742_v43 = vpop.f32.mrb[14].mxu0  ;;  %v2783_v9 = vpop.f32.mrb[14].mxu1  ;;  %4315 = vmatpush1.bf16.msra.mxu1 %v5444_v15  ;;  %v5450_v37 = vld [vmem:[#allocation11 + $0x140] ss:$16 sps:$4 sm:$0xff]  }
 0x409   :  { %v2743_v14 = vpop.f32.mrb[15].mxu0  ;;  %v2784_v45 = vpop.f32.mrb[15].mxu1  ;;  %4316 = vmatprep.subr.bf16.mxu1 %v5449_v61  ;;  %v5455_v9 = vld [vmem:[#allocation11 + $0x164] ss:$16 sps:$4 sm:$0xff]  }
 0x40c   :  { %4317 = vmatpush1.bf16.msra.mxu1 %v5447_v62 }
 0x40d   :  { %4318 = vmatprep.subr.bf16.mxu1 %v5452_v27 }
 0x410   :  { %4319 = vmatpush1.bf16.msra.mxu1 %v5450_v37 }
 0x411   :  { %4320 = vmatprep.subr.bf16.mxu1 %v5455_v9 }
 0x414   :  { %4321 = vmatpush1.bf16.msra.mxu1 %v5453_v44 }
 0x415   :  { %4322 = vmatprep.subr.bf16.mxu1 %v5458_v40 }
 0x446   :  { %v3206_v13 = vpop.f32.mrb[16].mxu0 }
 0x447   :  { %v3254_v48 = vadd.f32 %v3206_v13, %v2739_v21  ;;  %v3247_v18 = vpop.f32.mrb[16].mxu1  ;;  %v3208_v0 = vpop.f32.mrb[17].mxu0 }
 0x448   :  { %v3256_v6 = vadd.f32 %v3247_v18, %v2780_v47  ;;  %v3255_v31 = vadd.f32 %v3208_v0, %v2741_v29  ;;  %v3249_v38 = vpop.f32.mrb[17].mxu1  ;;  %v3210_v3 = vpop.f32.mrb[18].mxu0 }
 0x449   :  { %v3280_v46 = vadd.f32 %v3263_v12, %v3254_v48  ;;  %v3257_v63 = vadd.f32 %v3249_v38, %v2782_v34  ;;  %v3251_v16 = vpop.f32.mrb[18].mxu1  ;;  %v3211_v51 = vpop.f32.mrb[19].mxu0 }
 0x44a   :  { %v3282_v55 = vadd.f32 %v3271_v2, %v3256_v6  ;;  %v3281_v56 = vadd.f32 %v3267_v25, %v3255_v31  ;;  %v3252_v32 = vpop.f32.mrb[19].mxu1  ;;  %v5456_v6 = vld [vmem:[#allocation11 + $0x180] ss:$16 sps:$4 sm:$0xff]  }
 0x44b   :  { %v3284_v60 = vmax.f32 %v3280_v46, 0.0  ;;  %v3283_v59 = vadd.f32 %v3275_v8, %v3257_v63  ;;  %v5461_v63 = vld [vmem:[#allocation11 + $0x1a4] ss:$16 sps:$4 sm:$0xff]   ;;  %4323 = vmatpush1.bf16.msra.mxu1 %v5456_v6 }
 0x44c   :  { %v3286_v5 = vmax.f32 %v3282_v55, 0.0  ;;  %v3285_v24 = vmax.f32 %v3281_v56, 0.0  ;;  %4324 = vmatprep.subr.bf16.mxu1 %v5461_v63  ;;  %v5377_v6 = vld [vmem:[#allocation10 + $0x114] ss:$8 sps:$4 sm:$0xff]  }
 0x44d   :  { %v3287_v7 = vmax.f32 %v3283_v59, 0.0 }
 0x44e   :  { %v3292_v52 = vcombine.low %v3284_v60, %v3285_v24  ;;  %v3293_v49 = vcombine.high %v3284_v60, %v3285_v24  ;;  %v4716_v21 = vcombine.low %v3285_v24, %v3285_v24  ;;  %v4718_v47 = vcombine.high %v3285_v24, %v3285_v24 }
 0x44f   :  { %v3294_v35 = vcombine.low %v3286_v5, %v3287_v7  ;;  %v3295_v29 = vcombine.high %v3286_v5, %v3287_v7  ;;  %v4717_v34 = vcombine.low %v3287_v7, %v3287_v7  ;;  %v4719_v43 = vcombine.high %v3287_v7, %v3287_v7 }
 0x450   :  { %v3309_v14 = vsel %vm3308_vm1, %v3292_v52, 0.0  ;;  %v3316_v45 = vsel %vm3308_vm1, %v4716_v21, 0.0  ;;  %v3337_v22 = vsel %vm3308_vm1, %v3293_v49, 0.0  ;;  %v3344_v28 = vsel %vm3308_vm1, %v4718_v47, 0.0  ;;  %v5459_v52 = vld [vmem:[#allocation11 + $0x1a0] ss:$16 sps:$4 sm:$0xff]  }
 0x451   :  { %v3310_v41 = vrot.slane %v3309_v14, 4  ;;  %v3317_v11 = vrot.slane %v3316_v45, 4  ;;  %v3338_v10 = vrot.slane %v3337_v22, 4  ;;  %v3345_v30 = vrot.slane %v3344_v28, 4  ;;  %4325 = vmatpush1.bf16.msra.mxu1 %v5459_v52  ;;  %v5393_v52 = vld [vmem:[#allocation10 + $0x170] ss:$8 sps:$4 sm:$0xff]  }
 0x452   :  { %v3323_v17 = vsel %vm3308_vm1, %v3294_v35, 0.0  ;;  %v3330_v23 = vsel %vm3308_vm1, %v4717_v34, 0.0  ;;  %v3351_v53 = vsel %vm3308_vm1, %v3295_v29, 0.0  ;;  %v3358_v57 = vsel %vm3308_vm1, %v4719_v43, 0.0 }
 0x453   :  { %v3311_v20 = vadd.f32 %v3310_v41, %v3309_v14  ;;  %v3318_v4 = vadd.f32 %v3317_v11, %v3316_v45  ;;  %v3339_v36 = vadd.f32 %v3338_v10, %v3337_v22  ;;  %v3346_v39 = vadd.f32 %v3345_v30, %v3344_v28 }
 0x454   :  { %v3324_v50 = vrot.slane %v3323_v17, 4  ;;  %v3331_v58 = vrot.slane %v3330_v23, 4  ;;  %v3352_v12 = vrot.slane %v3351_v53, 4  ;;  %v3359_v13 = vrot.slane %v3358_v57, 4 }
 0x455   :  { %v3312_v2 = vrot.slane %v3311_v20, 2  ;;  %v3340_v25 = vrot.slane %v3339_v36, 2  ;;  %v3319_v15 = vrot.slane %v3318_v4, 2  ;;  %v3347_v48 = vrot.slane %v3346_v39, 2 }
 0x456   :  { %v3325_v18 = vadd.f32 %v3324_v50, %v3323_v17  ;;  %v3332_v0 = vadd.f32 %v3331_v58, %v3330_v23  ;;  %v3353_v8 = vadd.f32 %v3352_v12, %v3351_v53  ;;  %v3360_v61 = vadd.f32 %v3359_v13, %v3358_v57 }
 0x457   :  { %v3320_v31 = vadd.f32 %v3319_v15, %v3318_v4  ;;  %v3348_v38 = vadd.f32 %v3347_v48, %v3346_v39  ;;  %v3313_v3 = vadd.f32 %v3312_v2, %v3311_v20  ;;  %v3341_v46 = vadd.f32 %v3340_v25, %v3339_v36 }
 0x458   :  { %v3326_v16 = vrot.slane %v3325_v18, 2  ;;  %v3354_v51 = vrot.slane %v3353_v8, 2  ;;  %v3333_v55 = vrot.slane %v3332_v0, 2  ;;  %v3361_v56 = vrot.slane %v3360_v61, 2 }
 0x459   :  { %v3321_v32 = vrot.slane %v3320_v31, 1  ;;  %v3349_v62 = vrot.slane %v3348_v38, 1  ;;  %v3314_v60 = vrot.slane %v3313_v3, 1  ;;  %v3342_v59 = vrot.slane %v3341_v46, 1 }
 0x45a   :  { %v3334_v27 = vadd.f32 %v3333_v55, %v3332_v0  ;;  %v3362_v5 = vadd.f32 %v3361_v56, %v3360_v61  ;;  %v3327_v24 = vadd.f32 %v3326_v16, %v3325_v18  ;;  %v3355_v7 = vadd.f32 %v3354_v51, %v3353_v8  ;;  %v5372_v18 = vld [vmem:[#allocation10 + $0x100] ss:$8 sps:$4 sm:$0xff]   ;;  %v5375_v16 = vld [vmem:[#allocation10 + $0x110] ss:$8 sps:$4 sm:$0xff]   ;;  %v5380_v51 = vld [vmem:[#allocation10 + $0x124] ss:$8 sps:$4 sm:$0xff]  }
 0x45b   :  { %v3322_v49 = vadd.f32 %v3321_v32, %v3320_v31  ;;  %v3350_v21 = vadd.f32 %v3349_v62, %v3348_v38  ;;  %v3315_v47 = vadd.f32 %v3314_v60, %v3313_v3  ;;  %v3343_v37 = vadd.f32 %v3342_v59, %v3341_v46  ;;  %v5378_v55 = vld [vmem:[#allocation10 + $0x120] ss:$8 sps:$4 sm:$0xff]   ;;  %v5383_v56 = vld [vmem:[#allocation10 + $0x134] ss:$8 sps:$4 sm:$0xff]   ;;  %v5381_v32 = vld [vmem:[#allocation10 + $0x130] ss:$8 sps:$4 sm:$0xff]  }
 0x45c   :  { %v3335_v35 = vrot.slane %v3334_v27, 1  ;;  %v3363_v29 = vrot.slane %v3362_v5, 1  ;;  %v3328_v34 = vrot.slane %v3327_v24, 1  ;;  %v3356_v43 = vrot.slane %v3355_v7, 1  ;;  %v5386_v62 = vld [vmem:[#allocation10 + $0x144] ss:$8 sps:$4 sm:$0xff]  }
 0x45d   :  { %v3367_v9 = vmul.f32 0.25, %v3322_v49  ;;  %v3371_v14 = vmul.f32 0.25, %v3350_v21  ;;  %v3366_v45 = vmul.f32 0.25, %v3315_v47  ;;  %v3370_v22 = vmul.f32 0.25, %v3343_v37  ;;  %v5384_v60 = vld [vmem:[#allocation10 + $0x140] ss:$8 sps:$4 sm:$0xff]  }
 0x45e   :  { %v3336_v28 = vadd.f32 %v3335_v35, %v3334_v27  ;;  %v3364_v41 = vadd.f32 %v3363_v29, %v3362_v5  ;;  %v3329_v11 = vadd.f32 %v3328_v34, %v3327_v24  ;;  %v3357_v10 = vadd.f32 %v3356_v43, %v3355_v7  ;;  %v5389_v59 = vld [vmem:[#allocation10 + $0x154] ss:$8 sps:$4 sm:$0xff]   ;;  %v5387_v27 = vld [vmem:[#allocation10 + $0x150] ss:$8 sps:$4 sm:$0xff]   ;;  %v5392_v5 = vld [vmem:[#allocation10 + $0x164] ss:$8 sps:$4 sm:$0xff]  }
 0x45f   :  { %v3375_v30 = vpack.c.bf16 %v3367_v9, %v3367_v9  ;;  %v3379_v17 = vpack.c.bf16 %v3371_v14, %v3371_v14  ;;  %v3374_v23 = vpack.c.bf16 %v3366_v45, %v3366_v45  ;;  %v3378_v53 = vpack.c.bf16 %v3370_v22, %v3370_v22  ;;  %v5390_v24 = vld [vmem:[#allocation10 + $0x160] ss:$8 sps:$4 sm:$0xff]   ;;  %v5395_v7 = vld [vmem:[#allocation10 + $0x174] ss:$8 sps:$4 sm:$0xff]   ;;  %v5398_v49 = vld [vmem:[#allocation10 + $0x184] ss:$8 sps:$4 sm:$0xff]  }
 0x460   :  { %v3369_v57 = vmul.f32 0.25, %v3336_v28  ;;  %v3373_v44 = vmul.f32 0.25, %v3364_v41  ;;  %v3368_v20 = vmul.f32 0.25, %v3329_v11  ;;  %v3372_v4 = vmul.f32 0.25, %v3357_v10  ;;  %v5396_v21 = vld [vmem:[#allocation10 + $0x180] ss:$8 sps:$4 sm:$0xff]  }
 0x461   :  { %v3467_v36 = vunpack.c.l.b16 %v3375_v30  ;;  %v3471_v39 = vunpack.c.l.b16 %v3379_v17  ;;  %v3466_v40 = vunpack.c.l.b16 %v3374_v23  ;;  %v3470_v50 = vunpack.c.l.b16 %v3378_v53  ;;  %v5401_v47 = vld [vmem:[#allocation10 + $0x194] ss:$8 sps:$4 sm:$0xff]   ;;  %v5399_v37 = vld [vmem:[#allocation10 + $0x190] ss:$8 sps:$4 sm:$0xff]   ;;  %v5404_v35 = vld [vmem:[#allocation10 + $0x1a4] ss:$8 sps:$4 sm:$0xff]  }
 0x462   :  { %v3377_v58 = vpack.c.bf16 %v3369_v57, %v3369_v57  ;;  %v3381_v12 = vpack.c.bf16 %v3373_v44, %v3373_v44  ;;  %v3376_v13 = vpack.c.bf16 %v3368_v20, %v3368_v20  ;;  %v3380_v2 = vpack.c.bf16 %v3372_v4, %v3372_v4  ;;  %v5402_v29 = vld [vmem:[#allocation10 + $0x1a0] ss:$8 sps:$4 sm:$0xff]   ;;  %v5407_v34 = vld [vmem:[#allocation10 + $0x1b4] ss:$8 sps:$4 sm:$0xff]   ;;  %v5405_v43 = vld [vmem:[#allocation10 + $0x1b0] ss:$8 sps:$4 sm:$0xff]  }
 0x463   :  { %v3475_v25 = vsel %vm848_vm11, %v3471_v39, %v3467_v36  ;;  %v3474_v15 = vsel %vm848_vm11, %v3470_v50, %v3466_v40  ;;  %v5410_v9 = vld [vmem:[#allocation10 + $0x1c4] ss:$8 sps:$4 sm:$0xff]   ;;  %v5408_v14 = vld [vmem:[#allocation10 + $0x1c0] ss:$8 sps:$4 sm:$0xff]   ;;  %v5413_v45 = vld [vmem:[#allocation10 + $0x1d4] ss:$8 sps:$4 sm:$0xff]  }
 0x464   :  { %v3479_v48 = vpack.c.b16 %v3475_v25, %v3475_v25  ;;  %v3478_v0 = vpack.c.b16 %v3474_v15, %v3474_v15  ;;  %v3469_v8 = vunpack.c.l.b16 %v3377_v58  ;;  %v3473_v61 = vunpack.c.l.b16 %v3381_v12  ;;  %v5411_v22 = vld [vmem:[#allocation10 + $0x1d0] ss:$8 sps:$4 sm:$0xff]   ;;  %v5416_v28 = vld [vmem:[#allocation10 + $0x1e4] ss:$8 sps:$4 sm:$0xff]   ;;  %v5414_v41 = vld [vmem:[#allocation10 + $0x1e0] ss:$8 sps:$4 sm:$0xff]  }
 0x465   :  { %v3468_v31 = vunpack.c.l.b16 %v3376_v13  ;;  %v3472_v38 = vunpack.c.l.b16 %v3380_v2  ;;  %v5419_v11 = vld [vmem:[#allocation10 + $0x1f4] ss:$8 sps:$4 sm:$0xff]   ;;  %v5417_v10 = vld [vmem:[#allocation10 + $0x1f0] ss:$8 sps:$4 sm:$0xff]   ;;  %v3446_v20 = vld [vmem:[%s6473_s8] sm:$0x3] }
 0x466   :  { %3838 = vmatprep.mubr.bf16.mxu0 %v3479_v48  ;;  %v3477_v3 = vsel %vm848_vm11, %v3473_v61, %v3469_v8  ;;  %v5462_v17 = vld [vmem:[#allocation11 + $0x1c0] ss:$16 sps:$4 sm:$0xff]   ;;  %v5464_v23 = vld [vmem:[#allocation11 + $0x1c4] ss:$16 sps:$4 sm:$0xff]   ;;  %v5470_v44 = vld [vmem:[#allocation11 + $0xc] ss:$16 sps:$4 sm:$0xff]   ;;  %v3451_v4 = vrot.slane %v3446_v20, %v6143_v19  ;;  %v3455_v36 = vrot.slane %v3446_v20, %v6146_v26 }
 0x467   :  { %3839 = vmatmul.mubr.bf16.vlgmr.msra.gmra.mrb[20].mxu0 %v3478_v0  ;;  %v3481_v46 = vpack.c.b16 %v3477_v3, %v3477_v3  ;;  %v6425_v63 = vsel %vm848_vm11, %v3472_v38, %v3468_v31  ;;  %v5467_v53 = vld [vmem:[#allocation11 + $0x1e4] ss:$16 sps:$4 sm:$0xff]   ;;  %4326 = vmatprep.subr.bf16.mxu1 %v5464_v23  ;;  %v5465_v57 = vld [vmem:[#allocation11 + $0x1e0] ss:$16 sps:$4 sm:$0xff]   ;;  %v5468_v48 = vld [vmem:[#allocation11 + $0x8] ss:$16 sps:$4 sm:$0xff]  }
 0x468   :  { %3848 = vmatpush1.bf16.msra.mxu0 %v5372_v18  ;;  %v3480_v30 = vpack.c.b16 %v6425_v63, %v6425_v63  ;;  %4327 = vmatpush1.bf16.msra.mxu1 %v5462_v17  ;;  %v5473_v0 = vld [vmem:[#allocation11 + $0x2c] ss:$16 sps:$4 sm:$0xff]   ;;  %v5471_v8 = vld [vmem:[#allocation11 + $0x28] ss:$16 sps:$4 sm:$0xff]  }
 0x469   :  { %3879 = vmatprep.mubr.bf16.mxu0 %v3481_v46  ;;  %3849 = vmatprep.subr.bf16.mxu0 %v5377_v6  ;;  %v5476_v61 = vld [vmem:[#allocation11 + $0x4c] ss:$16 sps:$4 sm:$0xff]   ;;  %v5474_v6 = vld [vmem:[#allocation11 + $0x48] ss:$16 sps:$4 sm:$0xff]  }
 0x46a   :  { %4328 = vmatprep.subr.bf16.mxu1 %v5467_v53  ;;  %v5479_v31 = vld [vmem:[#allocation11 + $0x6c] ss:$16 sps:$4 sm:$0xff]   ;;  %v5477_v38 = vld [vmem:[#allocation11 + $0x68] ss:$16 sps:$4 sm:$0xff]  }
 0x46b   :  { %v5482_v3 = vld [vmem:[#allocation11 + $0x8c] ss:$16 sps:$4 sm:$0xff]   ;;  %v5480_v46 = vld [vmem:[#allocation11 + $0x88] ss:$16 sps:$4 sm:$0xff]  }
 0x46c   :  { %3850 = vmatpush1.bf16.msra.mxu0 %v5375_v16  ;;  %4329 = vmatpush1.bf16.msra.mxu1 %v5465_v57  ;;  %v5485_v63 = vld [vmem:[#allocation11 + $0xac] ss:$16 sps:$4 sm:$0xff]   ;;  %v5483_v16 = vld [vmem:[#allocation11 + $0xa8] ss:$16 sps:$4 sm:$0xff]  }
 0x46d   :  { %3851 = vmatprep.subr.bf16.mxu0 %v5380_v51  ;;  %4339 = vmatprep.subr.bf16.mxu1 %v5470_v44  ;;  %v5488_v51 = vld [vmem:[#allocation11 + $0xcc] ss:$16 sps:$4 sm:$0xff]  }
 0x470   :  { %3852 = vmatpush1.bf16.msra.mxu0 %v5378_v55  ;;  %v5486_v55 = vld [vmem:[#allocation11 + $0xc8] ss:$16 sps:$4 sm:$0xff]  }
 0x471   :  { %3853 = vmatprep.subr.bf16.mxu0 %v5383_v56  ;;  %v5491_v56 = vld [vmem:[#allocation11 + $0xec] ss:$16 sps:$4 sm:$0xff]  }
 0x474   :  { %3854 = vmatpush1.bf16.msra.mxu0 %v5381_v32  ;;  %v5489_v32 = vld [vmem:[#allocation11 + $0xe8] ss:$16 sps:$4 sm:$0xff]  }
 0x475   :  { %3855 = vmatprep.subr.bf16.mxu0 %v5386_v62  ;;  %v5494_v62 = vld [vmem:[#allocation11 + $0x10c] ss:$16 sps:$4 sm:$0xff]  }
 0x478   :  { %3856 = vmatpush1.bf16.msra.mxu0 %v5384_v60  ;;  %v5492_v60 = vld [vmem:[#allocation11 + $0x108] ss:$16 sps:$4 sm:$0xff]  }
 0x479   :  { %3857 = vmatprep.subr.bf16.mxu0 %v5389_v59  ;;  %v5497_v59 = vld [vmem:[#allocation11 + $0x12c] ss:$16 sps:$4 sm:$0xff]  }
 0x47c   :  { %3858 = vmatpush1.bf16.msra.mxu0 %v5387_v27  ;;  %v5495_v27 = vld [vmem:[#allocation11 + $0x128] ss:$16 sps:$4 sm:$0xff]  }
 0x47d   :  { %3859 = vmatprep.subr.bf16.mxu0 %v5392_v5  ;;  %v5500_v5 = vld [vmem:[#allocation11 + $0x14c] ss:$16 sps:$4 sm:$0xff]  }
 0x480   :  { %3860 = vmatpush1.bf16.msra.mxu0 %v5390_v24  ;;  %v5498_v24 = vld [vmem:[#allocation11 + $0x148] ss:$16 sps:$4 sm:$0xff]  }
 0x481   :  { %3861 = vmatprep.subr.bf16.mxu0 %v5395_v7  ;;  %v5503_v7 = vld [vmem:[#allocation11 + $0x16c] ss:$16 sps:$4 sm:$0xff]  }
 0x484   :  { %3862 = vmatpush1.bf16.msra.mxu0 %v5393_v52  ;;  %v5501_v52 = vld [vmem:[#allocation11 + $0x168] ss:$16 sps:$4 sm:$0xff]  }
 0x485   :  { %3863 = vmatprep.subr.bf16.mxu0 %v5398_v49  ;;  %v5506_v49 = vld [vmem:[#allocation11 + $0x18c] ss:$16 sps:$4 sm:$0xff]  }
 0x488   :  { %3864 = vmatpush1.bf16.msra.mxu0 %v5396_v21  ;;  %v5504_v21 = vld [vmem:[#allocation11 + $0x188] ss:$16 sps:$4 sm:$0xff]  }
 0x489   :  { %3865 = vmatprep.subr.bf16.mxu0 %v5401_v47  ;;  %v5509_v47 = vld [vmem:[#allocation11 + $0x1ac] ss:$16 sps:$4 sm:$0xff]  }
 0x48c   :  { %3866 = vmatpush1.bf16.msra.mxu0 %v5399_v37  ;;  %v5507_v37 = vld [vmem:[#allocation11 + $0x1a8] ss:$16 sps:$4 sm:$0xff]  }
 0x48d   :  { %3867 = vmatprep.subr.bf16.mxu0 %v5404_v35  ;;  %v5512_v35 = vld [vmem:[#allocation11 + $0x1cc] ss:$16 sps:$4 sm:$0xff]  }
 0x490   :  { %3868 = vmatpush1.bf16.msra.mxu0 %v5402_v29  ;;  %v5510_v29 = vld [vmem:[#allocation11 + $0x1c8] ss:$16 sps:$4 sm:$0xff]  }
 0x491   :  { %3869 = vmatprep.subr.bf16.mxu0 %v5407_v34  ;;  %v5515_v34 = vld [vmem:[#allocation11 + $0x1ec] ss:$16 sps:$4 sm:$0xff]  }
 0x494   :  { %3870 = vmatpush1.bf16.msra.mxu0 %v5405_v43  ;;  %v5513_v43 = vld [vmem:[#allocation11 + $0x1e8] ss:$16 sps:$4 sm:$0xff]  }
 0x495   :  { %3871 = vmatprep.subr.bf16.mxu0 %v5410_v9 }
 0x498   :  { %3872 = vmatpush1.bf16.msra.mxu0 %v5408_v14 }
 0x499   :  { %3873 = vmatprep.subr.bf16.mxu0 %v5413_v45 }
 0x49c   :  { %3874 = vmatpush1.bf16.msra.mxu0 %v5411_v22 }
 0x49d   :  { %3875 = vmatprep.subr.bf16.mxu0 %v5416_v28  ;;  %v3956_v28 = vld [vmem:[%s6475_s10] sm:$0xf]  ;;  %s5705_s10 = smov [#allocation13]  }
 0x49e   :  { %v3969_v17 = vrot.slane %v3956_v28, %v3270_v54  ;;  %v3973_v23 = vrot.slane %v3956_v28, %v3274_v33  ;;  %s4432_s19 = sshll.u32 %s5705_s10, 4  ;;  %s4433_s19 = int_to_ptr.vmem [resolvable:$true] %s4432_s19 }
 0x49f   :  { %s5658_s20 = scalar_lea.vmem %s4433_s19, 128  ;;  %p5663_p7 = scmp.lt.s32.totalorder %s4433_s19, %s4433_s19 }
 0x4a0   :  { %3876 = vmatpush1.bf16.msra.mxu0 %v5414_v41  ;;  %v3961_v41 = vrot.slane %v3956_v28, %v6143_v19  ;;  %p5659_p6 = scmp.ne.s32.totalorder %s4433_s19, %s5658_s20  ;;  %p5664_p8 = scmp.lt.s32.totalorder %s5658_s20, %s5658_s20 }
 0x4a1   :  { %3877 = vmatprep.subr.bf16.mxu0 %v5419_v11  ;;  %v3965_v11 = vrot.slane %v3956_v28, %v6146_v26 }
 0x4a2   :  { %p5665_p9 = por %p5664_p8, %p5663_p7 }
 0x4a4   :  { %3878 = vmatpush1.bf16.msra.mxu0 %v5417_v10  ;;  %p5666_p10 = pnand %p5665_p9, %p5659_p6 }
 0x4a7   :  { %3880 = vmatmul.mubr.bf16.vlgmr.msra.gmra.mrb[20].mxu0 %v3480_v30 }
 0x57a   :  { %v3881_v39 = vpop.f32.mrb[20].mxu0 }
 0x57b   :  { %v4919_v40 = vadd.f32 %v3881_v39, %v3451_v4  ;;  %v3883_v50 = vpop.f32.mrb[21].mxu0 }
 0x57c   :  { %v4920_v58 = vadd.f32 %v3883_v50, %v3455_v36  ;;  %v3885_v12 = vpop.f32.mrb[22].mxu0 }
 0x57d   :  { %v3888_v13 = vmax.f32 %v4919_v40, 0.0  ;;  %v3886_v2 = vpop.f32.mrb[23].mxu0 }
 0x57e   :  { %v3889_v25 = vmax.f32 %v4920_v58, 0.0 }
 0x57f   :  { %v6434_v18 = vpack.c.bf16 %v3888_v13, %v3888_v13 }
 0x580   :  { %v3891_v15 = vpack.c.bf16 %v3889_v25, %v3889_v25 }
 0x582   :  { %4330 = vmatprep.mubr.bf16.mxu1 %v3891_v15 }
 0x583   :  { %4331 = vmatmul.mubr.bf16.vlgmr.msra.gmra.mrb[20].mxu1 %v6434_v18 }
 0x584   :  { %4340 = vmatpush1.bf16.msra.mxu1 %v5468_v48  ;;  %4371 = vmatprep.mubr.bf16.mxu1 %v3891_v15 }
 0x585   :  { %4341 = vmatprep.subr.bf16.mxu1 %v5473_v0 }
 0x588   :  { %4342 = vmatpush1.bf16.msra.mxu1 %v5471_v8 }
 0x589   :  { %4343 = vmatprep.subr.bf16.mxu1 %v5476_v61 }
 0x58c   :  { %4344 = vmatpush1.bf16.msra.mxu1 %v5474_v6 }
 0x58d   :  { %4345 = vmatprep.subr.bf16.mxu1 %v5479_v31 }
 0x590   :  { %4346 = vmatpush1.bf16.msra.mxu1 %v5477_v38 }
 0x591   :  { %4347 = vmatprep.subr.bf16.mxu1 %v5482_v3 }
 0x594   :  { %4348 = vmatpush1.bf16.msra.mxu1 %v5480_v46 }
 0x595   :  { %4349 = vmatprep.subr.bf16.mxu1 %v5485_v63 }
 0x598   :  { %4350 = vmatpush1.bf16.msra.mxu1 %v5483_v16 }
 0x599   :  { %4351 = vmatprep.subr.bf16.mxu1 %v5488_v51 }
 0x59c   :  { %4352 = vmatpush1.bf16.msra.mxu1 %v5486_v55 }
 0x59d   :  { %4353 = vmatprep.subr.bf16.mxu1 %v5491_v56 }
 0x5a0   :  { %4354 = vmatpush1.bf16.msra.mxu1 %v5489_v32 }
 0x5a1   :  { %4355 = vmatprep.subr.bf16.mxu1 %v5494_v62 }
 0x5a4   :  { %4356 = vmatpush1.bf16.msra.mxu1 %v5492_v60 }
 0x5a5   :  { %4357 = vmatprep.subr.bf16.mxu1 %v5497_v59 }
 0x5a8   :  { %4358 = vmatpush1.bf16.msra.mxu1 %v5495_v27 }
 0x5a9   :  { %4359 = vmatprep.subr.bf16.mxu1 %v5500_v5 }
 0x5ac   :  { %4360 = vmatpush1.bf16.msra.mxu1 %v5498_v24 }
 0x5ad   :  { %4361 = vmatprep.subr.bf16.mxu1 %v5503_v7 }
 0x5b0   :  { %4362 = vmatpush1.bf16.msra.mxu1 %v5501_v52 }
 0x5b1   :  { %4363 = vmatprep.subr.bf16.mxu1 %v5506_v49 }
 0x5b4   :  { %4364 = vmatpush1.bf16.msra.mxu1 %v5504_v21 }
 0x5b5   :  { %4365 = vmatprep.subr.bf16.mxu1 %v5509_v47 }
 0x5b8   :  { %4366 = vmatpush1.bf16.msra.mxu1 %v5507_v37 }
 0x5b9   :  { %4367 = vmatprep.subr.bf16.mxu1 %v5512_v35 }
 0x5bc   :  { %4368 = vmatpush1.bf16.msra.mxu1 %v5510_v29 }
 0x5bd   :  { %4369 = vmatprep.subr.bf16.mxu1 %v5515_v34 }
 0x5c0   :  { %4370 = vmatpush1.bf16.msra.mxu1 %v5513_v43 }
 0x5c3   :  { %4372 = vmatmul.mubr.bf16.vlgmr.msra.gmra.mrb[24].mxu1 %v6434_v18 }
 0x656   :  { %v4332_v9 = vpop.f32.mrb[20].mxu1 }
 0x657   :  { %v4334_v14 = vpop.f32.mrb[21].mxu1  ;;  %v4333_v10 = vadd.f32 %v4332_v9, %v3961_v41 }
 0x658   :  { %v4336_v45 = vpop.f32.mrb[22].mxu1  ;;  %v4335_v30 = vadd.f32 %v4334_v14, %v3965_v11 }
 0x659   :  { %v4337_v22 = vpop.f32.mrb[23].mxu1  ;;  %5516 = vtanh.f32 %v4333_v10 }
 0x65a   :  { %5518 = vtanh.f32 %v4335_v30 }
 0x663   :  { %v5517_v19 = vpop.eup %5516 }
 0x664   :  { %v5519_v26 = vpop.eup %5518  ;;  %v4384_v39 = vmul.f32 %v5517_v19, %v5517_v19 }
 0x665   :  { %v4385_v40 = vmul.f32 %v5519_v26, %v5519_v26 }
 0x666   :  { %v4388_v50 = vsel %vm625_vm9, %v4384_v39, 0.0 }
 0x667   :  { %v4389_v58 = vsel %vm625_vm9, %v4385_v40, 0.0 }
 0x668   :  { %v4390_v13 = vadd.f32 %v4389_v58, %v4388_v50 }
 0x696   :  { %v4373_v53 = vpop.f32.mrb[24].mxu1 }
 0x697   :  { %v4374_v57 = vadd.f32 %v4373_v53, %v3969_v17  ;;  %v4375_v44 = vpop.f32.mrb[25].mxu1 }
 0x698   :  { %v4376_v20 = vadd.f32 %v4375_v44, %v3973_v23  ;;  %v4377_v4 = vpop.f32.mrb[26].mxu1 }
 0x699   :  { %5520 = vtanh.f32 %v4374_v57  ;;  %v4378_v36 = vpop.f32.mrb[27].mxu1 }
 0x69a   :  { %5522 = vtanh.f32 %v4376_v20 }
 0x6a3   :  { %v5521_v54 = vpop.eup %5520 }
 0x6a4   :  { %v5523_v12 = vpop.eup %5522  ;;  %v4386_v1 = vmul.f32 %v5521_v54, %v5521_v54 }
 0x6a5   :  { %v4387_v33 = vmul.f32 %v5523_v12, %v5523_v12 }
 0x6a6   :  { %v4391_v2 = vsel %vm625_vm9, %v4386_v1, 0.0 }
 0x6a7   :  { %v4392_v25 = vadd.f32 %v4391_v2, %v4390_v13  ;;  %v4393_v15 = vsel %vm625_vm9, %v4387_v33, 0.0 }
 0x6a9   :  { %v4394_v48 = vadd.f32 %v4393_v15, %v4392_v25 }
 0x6ab   :  { %4395 = vadd.xlane.f32.xlu0 %v4394_v48 }
 0x738   :  { %v4396_v18 = vpop.xlane.xlu0 %4395 }
 0x739   :  { %v4397_v0 = vmax.f32 %v4396_v18, 1e-24 }
 0x73b   :  { %5524 = vrsqrt.f32 %v4397_v0 }
 0x745   :  { %v5525_v8 = vpop.eup %5524 }
 0x746   :  { %v4399_v61 = vmul.f32 %v5525_v8, %v5517_v19  ;;  %v4400_v6 = vmul.f32 %v5525_v8, %v5519_v26  ;;  %v4401_v31 = vmul.f32 %v5525_v8, %v5521_v54  ;;  %v4402_v38 = vmul.f32 %v5525_v8, %v5523_v12 }
 0x748   :  { %v4407_v3 = vcombine.low %v4399_v61, %v4400_v6  ;;  %v4408_v46 = vcombine.low %v4401_v31, %v4402_v38 }
 0x74a   :  { %v4415_v63 = vrot.slane %v4407_v3, %v5901_v42  ;;  %v4422_v16 = vrot.slane %v4408_v46, %v5901_v42 }
 0x74c   :  { %v4423_v51 = vcombine.low %v4415_v63, %v4422_v16 }
 0x74e   :  { %4425 = vst [vmem:[#allocation13] sm:$0xff] %v4423_v51 }
 0x74f   :  { %5669 = shalt.err (!%p5666_p10)
}
 0x750   :  { %s5670_s25 = scalar_lea.hbm %s6476_s11, 128 }
 0x751   :  { %p5671_p11 = scmp.ne.s32.totalorder %s6476_s11, %s5670_s25  ;;  %p5674_p12 = scmp.lt.u32.totalorder %s5670_s25, %s6476_s11 }
 0x753   :  { %p5676_p13 = pnand %p5674_p12, %p5671_p11 }
 0x755   :  { %5679 = shalt.err (!%p5676_p13)
}
 0x756   :  { %4435 = dma.vmem_to_hbm [thread:$0]  %s4433_s19, 128, %s6476_s11, [#allocation4]  }
 0x757   :  { %5688 = dma.done.wait [#allocation4], 128  }
 0x758   :  { %5689 = vsyncadd [#allocation4], 4294967168 }
 0x759   :  { %4439 = vsyncpa [#allocation3], 1 }
 0x75a   :  { %4440 = vsyncpa [#allocation6], 1 }
 0x75b   :  { %4441 = vsyncpa [#allocation9], 1 }
 0x75c   :  { %4442 = vsyncpa [#allocation12], 1 }
 0x75d   :  { %4443 = vsyncpa [#allocation4], 1 }

</bundles_post_ra>
